<compile_context>
chip_gen: v5e
topology: v5e:2x2
jax: 0.10.0
libtpu: 0.0.40
codegen_flags: <defaults>
</compile_context>

<pallas_src>
import jax
import jax.numpy as jnp
from jax.experimental import pallas as pl
from jax.experimental.pallas import tpu as pltpu

_LEAKY_SLOPE = 0.2


def _sigmoid(v):
    return 1.0 / (1.0 + jnp.exp(-v))


def _leaky_relu(v):
    return jnp.where(v >= 0.0, v, _LEAKY_SLOPE * v)


def _im2col9(xp, rows, cols):
    """(rows+2, cols+2, C) zero-padded block -> (rows*cols, 9*C) 3x3 patches."""
    taps = [xp[ky:ky + rows, kx:kx + cols, :]
            for ky in range(3) for kx in range(3)]
    patches = jnp.concatenate(taps, axis=-1)               # (rows, cols, 9*C)
    return patches.reshape(rows * cols, patches.shape[-1])


# ----------------------------- Pallas kernels ------------------------------ #

def _gru_init_kernel(xw_ref, wx_ref, bx_ref, o_ref):
    """h = leaky_relu(sigmoid(conv_xz(x)) * tanh(conv_xn(x)))   (h is None)."""
    cout = o_ref.shape[2]
    rows = xw_ref.shape[1] - 2                              # tr
    cols = xw_ref.shape[2] - 2                              # Wt
    px = _im2col9(xw_ref[0], rows, cols)                    # (tr*Wt, 9*Cin)
    acc = jnp.dot(px, wx_ref[...], preferred_element_type=jnp.float32)
    acc = acc + bx_ref[...].astype(jnp.float32)             # (tr*Wt, 2*Cout)
    z = _sigmoid(acc[:, :cout])
    f = jnp.tanh(acc[:, cout:])
    o_ref[0] = _leaky_relu(z * f).astype(o_ref.dtype)


def _gru_rec_kernel(xw_ref, hw_ref, wx_ref, bx_ref, whzr_ref, bhzr_ref,
                    whn_ref, bhn_ref, o_ref):
    """Fully fused GRU update for one (batch, row-tile) block."""
    cout = o_ref.shape[2]
    cols = xw_ref.shape[2] - 2                              # Wt (multiple of 8)
    rows_mid = xw_ref.shape[1] - 2                          # tr + 2 (halo rows)
    rows_out = rows_mid - 2                                 # tr

    xw = xw_ref[0]                                          # (tr+4, Wt+2, Cin)
    hw = hw_ref[0]                                          # (tr+4, Wt+2, Cout)

    # Stage 1: conv_xz|conv_xr|conv_xn and conv_hz|conv_hr over the tr+2 "mid"
    # rows so r (hence r*h) is available one halo row above/below the output.
    px = _im2col9(xw, rows_mid, cols)                       # ((tr+2)*Wt, 9*Cin)
    ph = _im2col9(hw, rows_mid, cols)                       # ((tr+2)*Wt, 9*Cout)
    accx = jnp.dot(px, wx_ref[...], preferred_element_type=jnp.float32)
    accx = accx + bx_ref[...].astype(jnp.float32)           # (.., 3*Cout)
    acch = jnp.dot(ph, whzr_ref[...], preferred_element_type=jnp.float32)
    acch = acch + bhzr_ref[...].astype(jnp.float32)         # (.., 2*Cout)

    h_mid = hw[1:1 + rows_mid, 1:1 + cols, :].astype(jnp.float32)
    h_mid = h_mid.reshape(rows_mid * cols, cout)

    r_mid = _sigmoid(accx[:, cout:2 * cout] + acch[:, cout:])
    rh = (r_mid * h_mid).reshape(rows_mid, cols, cout)

    # SAME-pad r*h along W with zeros (columns outside the image have h == 0).
    zcol = jnp.zeros((rows_mid, 1, cout), dtype=rh.dtype)
    rh_pad = jnp.concatenate([zcol, rh, zcol], axis=1)      # (tr+2, Wt+2, Cout)

    # Stage 2: conv_hn(r*h) over the tr output rows.
    prh = _im2col9(rh_pad, rows_out, cols)                  # (tr*Wt, 9*Cout)
    accn = jnp.dot(prh, whn_ref[...], preferred_element_type=jnp.float32)
    accn = accn + bhn_ref[...].astype(jnp.float32)          # (tr*Wt, Cout)

    lo, hi = cols, (rows_out + 1) * cols                    # drop halo rows
    z = _sigmoid(accx[lo:hi, :cout] + acch[lo:hi, :cout])
    n = jnp.tanh(accx[lo:hi, 2 * cout:] + accn)
    h_prev = h_mid[lo:hi]
    h_new = (1.0 - z) * h_prev + z * n
    o_ref[0] = _leaky_relu(h_new).astype(o_ref.dtype)


# ------------------------------ Host helpers ------------------------------- #

def _round_up(v, m):
    return ((v + m - 1) // m) * m


def _tap_matrix(w_oihw):
    """Torch Conv2d weight (Cout,Cin,3,3) -> im2col RHS (9*Cin, Cout)."""
    cout, cin = w_oihw.shape[0], w_oihw.shape[1]
    return jnp.transpose(w_oihw, (2, 3, 1, 0)).reshape(9 * cin, cout)


def _pad_and_window(x_nhwc, h_total, w_total, halo, nt, tr):
    """Zero-pad NHWC (halo rows, 1 SAME col) and cut overlapping row windows.

    Returns (N*nt, tr + 2*halo, w_total + 2, C)."""
    n, h, w, c = x_nhwc.shape
    xp = jnp.pad(x_nhwc, ((0, 0),
                          (halo, halo + h_total - h),
                          (1, 1 + w_total - w),
                          (0, 0)))
    if nt == 1:
        return xp
    wins = jnp.stack([xp[:, t * tr:t * tr + tr + 2 * halo] for t in range(nt)],
                     axis=1)
    return wins.reshape(n * nt, tr + 2 * halo, w_total + 2, c)


def conv_gru_block(params, x_nchw, h_nchw=None, *, row_tile=64):
    """ConvGRUBlock.forward(x, h, x_skip=None) -> (h, h); NCHW in/out."""
    n, cin, height, width = x_nchw.shape
    cout = params["w_xz"].shape[0]
    fdtype = x_nchw.dtype

    wt = _round_up(width, 8)                   # sublane-friendly output width
    tr = height if height <= row_tile else max(8, (row_tile // 8) * 8)
    nt = (height + tr - 1) // tr
    htot = nt * tr
    grid = (n * nt,)

    x_nhwc = jnp.transpose(x_nchw, (0, 2, 3, 1))

    cparams = pltpu.CompilerParams(dimension_semantics=("parallel",))

    def full_spec(shape):
        return pl.BlockSpec(shape, lambda i: (0,) * len(shape))

    out_spec = pl.BlockSpec((1, tr * wt, cout), lambda i: (i, 0, 0))
    out_shape = jax.ShapeDtypeStruct((n * nt, tr * wt, cout), fdtype)

    if h_nchw is None:
        halo = 1
        xw = _pad_and_window(x_nhwc, htot, wt, halo, nt, tr)
        wx = jnp.concatenate(
            [_tap_matrix(params["w_xz"]), _tap_matrix(params["w_xn"])], axis=1)
        bx = jnp.concatenate([params["b_xz"], params["b_xn"]])[None, :]

        out = pl.pallas_call(
            _gru_init_kernel,
            out_shape=out_shape,
            grid=grid,
            in_specs=[pl.BlockSpec((1, tr + 2 * halo, wt + 2, cin),
                                   lambda i: (i, 0, 0, 0)),
                      full_spec(wx.shape),
                      full_spec(bx.shape)],
            out_specs=out_spec,
            compiler_params=cparams,
        )(xw, wx, bx)
    else:
        halo = 2
        h_nhwc = jnp.transpose(h_nchw, (0, 2, 3, 1))
        xw = _pad_and_window(x_nhwc, htot, wt, halo, nt, tr)
        hw = _pad_and_window(h_nhwc, htot, wt, halo, nt, tr)

        wx = jnp.concatenate([_tap_matrix(params["w_xz"]),
                              _tap_matrix(params["w_xr"]),
                              _tap_matrix(params["w_xn"])], axis=1)
        bx = jnp.concatenate(
            [params["b_xz"], params["b_xr"], params["b_xn"]])[None, :]
        whzr = jnp.concatenate([_tap_matrix(params["w_hz"]),
                                _tap_matrix(params["w_hr"])], axis=1)
        bhzr = jnp.concatenate([params["b_hz"], params["b_hr"]])[None, :]
        whn = _tap_matrix(params["w_hn"])
        bhn = params["b_hn"][None, :]

        out = pl.pallas_call(
            _gru_rec_kernel,
            out_shape=out_shape,
            grid=grid,
            in_specs=[pl.BlockSpec((1, tr + 2 * halo, wt + 2, cin),
                                   lambda i: (i, 0, 0, 0)),
                      pl.BlockSpec((1, tr + 2 * halo, wt + 2, cout),
                                   lambda i: (i, 0, 0, 0)),
                      full_spec(wx.shape), full_spec(bx.shape),
                      full_spec(whzr.shape), full_spec(bhzr.shape),
                      full_spec(whn.shape), full_spec(bhn.shape)],
            out_specs=out_spec,
            compiler_params=cparams,
        )(xw, hw, wx, bx, whzr, bhzr, whn, bhn)

    h_nhwc_out = out.reshape(n, nt * tr, wt, cout)[:, :height, :width, :]
    h_out = jnp.transpose(h_nhwc_out, (0, 3, 1, 2))
    # TODO(synk): x_skip / ConvTranspose2d ('up') path not implemented; with the
    # default conv_type='same' the PyTorch module only supports x_skip=None.
    return h_out, h_out


# --------------------------- Pure-JAX reference ----------------------------- #

def _conv3x3_same_ref(x_nchw, w, b):
    y = jax.lax.conv_general_dilated(
        x_nchw, w, window_strides=(1, 1), padding=((1, 1), (1, 1)),
        dimension_numbers=("NCHW", "OIHW", "NCHW"),
        precision=jax.lax.Precision.HIGHEST)
    return y + b[None, :, None, None]


def conv_gru_block_ref(params, x, h=None):
    xz = _conv3x3_same_ref(x, params["w_xz"], params["b_xz"])
    xn = _conv3x3_same_ref(x, params["w_xn"], params["b_xn"])
    if h is None:
        hnew = jax.nn.sigmoid(xz) * jnp.tanh(xn)
    else:
        xr = _conv3x3_same_ref(x, params["w_xr"], params["b_xr"])
        z = jax.nn.sigmoid(xz + _conv3x3_same_ref(h, params["w_hz"], params["b_hz"]))
        r = jax.nn.sigmoid(xr + _conv3x3_same_ref(h, params["w_hr"], params["b_hr"]))
        cand = jnp.tanh(xn + _conv3x3_same_ref(r * h, params["w_hn"], params["b_hn"]))
        hnew = (1.0 - z) * h + z * cand
    hnew = jnp.where(hnew >= 0.0, hnew, _LEAKY_SLOPE * hnew)
    return hnew, hnew


def init_params(key, input_nc, output_nc, dtype=jnp.float32):
    names = [("w_xz", input_nc), ("w_xr", input_nc), ("w_xn", input_nc),
             ("w_hz", output_nc), ("w_hr", output_nc), ("w_hn", output_nc)]
    params = {}
    keys = jax.random.split(key, 2 * len(names))
    for i, (name, cin) in enumerate(names):
        scale = (9 * cin) ** -0.5
        params[name] = scale * jax.random.normal(
            keys[2 * i], (output_nc, cin, 3, 3), dtype)
        params[name.replace("w_", "b_")] = scale * jax.random.normal(
            keys[2 * i + 1], (output_nc,), dtype)
    return params


if __name__ == "__main__":
    key = jax.random.PRNGKey(0)
    k_x, k_p = jax.random.split(key)
    N, CIN, COUT, H, W = 2, 4, 32, 16, 16

    x = jax.random.normal(k_x, (N, CIN, H, W), dtype=jnp.float32)  # NCHW
    params = init_params(k_p, CIN, COUT)

    fwd = jax.jit(conv_gru_block)

    # Step 1: no hidden state.
    h1, h1_state = fwd(params, x, None)
    jax.block_until_ready(h1)
    # Step 2: full GRU recurrence with the previous hidden state.
    h2, _ = fwd(params, x, h1_state)
    jax.block_until_ready(h2)

    # Verify against the pure-JAX reference of the PyTorch forward pass.
    r1, _ = conv_gru_block_ref(params, x, None)
    r2, _ = conv_gru_block_ref(params, x, r1)

    assert h1.shape == (N, COUT, H, W) and h2.shape == (N, COUT, H, W)
    assert bool(jnp.allclose(h1, r1, atol=5e-3, rtol=5e-3))
    assert bool(jnp.allclose(h2, r2, atol=5e-3, rtol=5e-3))

    print("KERNEL_OK")
</pallas_src>

<mosaic_0001>
module attributes {stable_mosaic.version = 11 : i64} {
  func.func @_gru_init_kernel(%arg0: i32, %arg1: memref<1x18x18x4xf32, #tpu.memory_space<vmem>>, %arg2: memref<36x64xf32, #tpu.memory_space<vmem>>, %arg3: memref<1x64xf32, #tpu.memory_space<vmem>>, %arg4: memref<1x256x32xf32, #tpu.memory_space<vmem>>) attributes {dimension_semantics = [#tpu.dimension_semantics<parallel>], iteration_bounds = array<i64: 2>, scalar_prefetch = 0 : i64, scratch_operands = 0 : i64, tpu.core_type = #tpu.core_type<tc>, window_params = [{transform_indices = @transform_0, window_bounds = array<i64: 1, 18, 18, 4>}, {pipeline_mode = #tpu.pipeline_mode<synchronous>, transform_indices = @transform_1, window_bounds = array<i64: 36, 64>}, {pipeline_mode = #tpu.pipeline_mode<synchronous>, transform_indices = @transform_2, window_bounds = array<i64: 1, 64>}, {transform_indices = @transform_3, window_bounds = array<i64: 1, 256, 32>}]} {
    %c0 = arith.constant 0 : index
    %c0_0 = arith.constant 0 : index
    %c0_1 = arith.constant 0 : index
    %c0_2 = arith.constant 0 : index
    %0 = vector.load %arg1[%c0, %c0_0, %c0_1, %c0_2] : memref<1x18x18x4xf32, #tpu.memory_space<vmem>>, vector<1x18x18x4xf32>
    %1 = vector.shape_cast %0 : vector<1x18x18x4xf32> to vector<18x18x4xf32>
    %2 = vector.extract_strided_slice %1 {offsets = [0, 0, 0], sizes = [16, 16, 4], strides = [1, 1, 1]} : vector<18x18x4xf32> to vector<16x16x4xf32>
    %3 = vector.extract_strided_slice %1 {offsets = [0, 1, 0], sizes = [16, 16, 4], strides = [1, 1, 1]} : vector<18x18x4xf32> to vector<16x16x4xf32>
    %4 = vector.extract_strided_slice %1 {offsets = [0, 2, 0], sizes = [16, 16, 4], strides = [1, 1, 1]} : vector<18x18x4xf32> to vector<16x16x4xf32>
    %5 = vector.extract_strided_slice %1 {offsets = [1, 0, 0], sizes = [16, 16, 4], strides = [1, 1, 1]} : vector<18x18x4xf32> to vector<16x16x4xf32>
    %6 = vector.extract_strided_slice %1 {offsets = [1, 1, 0], sizes = [16, 16, 4], strides = [1, 1, 1]} : vector<18x18x4xf32> to vector<16x16x4xf32>
    %7 = vector.extract_strided_slice %1 {offsets = [1, 2, 0], sizes = [16, 16, 4], strides = [1, 1, 1]} : vector<18x18x4xf32> to vector<16x16x4xf32>
    %8 = vector.extract_strided_slice %1 {offsets = [2, 0, 0], sizes = [16, 16, 4], strides = [1, 1, 1]} : vector<18x18x4xf32> to vector<16x16x4xf32>
    %9 = vector.extract_strided_slice %1 {offsets = [2, 1, 0], sizes = [16, 16, 4], strides = [1, 1, 1]} : vector<18x18x4xf32> to vector<16x16x4xf32>
    %10 = vector.extract_strided_slice %1 {offsets = [2, 2, 0], sizes = [16, 16, 4], strides = [1, 1, 1]} : vector<18x18x4xf32> to vector<16x16x4xf32>
    %11 = tpu.concatenate %2, %3, %4, %5, %6, %7, %8, %9, %10 in 2 : vector<16x16x4xf32>, vector<16x16x4xf32>, vector<16x16x4xf32>, vector<16x16x4xf32>, vector<16x16x4xf32>, vector<16x16x4xf32>, vector<16x16x4xf32>, vector<16x16x4xf32>, vector<16x16x4xf32> -> vector<16x16x36xf32>
    %12 = vector.shape_cast %11 : vector<16x16x36xf32> to vector<256x36xf32>
    %c0_3 = arith.constant 0 : index
    %c0_4 = arith.constant 0 : index
    %13 = vector.load %arg2[%c0_3, %c0_4] : memref<36x64xf32, #tpu.memory_space<vmem>>, vector<36x64xf32>
    %cst = arith.constant dense<0.000000e+00> : vector<256x64xf32>
    %14 = tpu.matmul %12, %13, %cst {dimension_numbers = #tpu.dot_dimension_numbers<[1], [0], [0], [1], [0, 0, 1, 1], [], []>} : vector<256x36xf32>, vector<36x64xf32>, vector<256x64xf32> -> vector<256x64xf32>
    %c0_5 = arith.constant 0 : index
    %c0_6 = arith.constant 0 : index
    %15 = vector.load %arg3[%c0_5, %c0_6] : memref<1x64xf32, #tpu.memory_space<vmem>>, vector<1x64xf32>
    %16 = vector.broadcast %15 : vector<1x64xf32> to vector<256x64xf32>
    %17 = arith.addf %14, %16 : vector<256x64xf32>
    %18 = vector.extract_strided_slice %17 {offsets = [0, 0], sizes = [256, 32], strides = [1, 1]} : vector<256x64xf32> to vector<256x32xf32>
    %cst_7 = arith.constant 0.000000e+00 : f32
    %19 = vector.broadcast %cst_7 : f32 to vector<256x32xf32>
    %20 = arith.subf %19, %18 : vector<256x32xf32>
    %21 = math.exp %20 : vector<256x32xf32>
    %cst_8 = arith.constant 1.000000e+00 : f32
    %22 = vector.broadcast %cst_8 : f32 to vector<256x32xf32>
    %23 = arith.addf %22, %21 : vector<256x32xf32>
    %cst_9 = arith.constant 1.000000e+00 : f32
    %24 = vector.broadcast %cst_9 : f32 to vector<256x32xf32>
    %25 = arith.divf %24, %23 : vector<256x32xf32>
    %26 = vector.extract_strided_slice %17 {offsets = [0, 32], sizes = [256, 32], strides = [1, 1]} : vector<256x64xf32> to vector<256x32xf32>
    %27 = math.tanh %26 : vector<256x32xf32>
    %28 = arith.mulf %25, %27 : vector<256x32xf32>
    %cst_10 = arith.constant 0.000000e+00 : f32
    %29 = vector.broadcast %cst_10 : f32 to vector<256x32xf32>
    %30 = arith.cmpf oge, %28, %29 : vector<256x32xf32>
    %cst_11 = arith.constant 2.000000e-01 : f32
    %31 = vector.broadcast %cst_11 : f32 to vector<256x32xf32>
    %32 = arith.mulf %31, %28 : vector<256x32xf32>
    %33 = arith.select %30, %28, %32 : vector<256x32xi1>, vector<256x32xf32>
    %c0_12 = arith.constant 0 : index
    %c0_13 = arith.constant 0 : index
    %c0_14 = arith.constant 0 : index
    %34 = vector.load %arg4[%c0_12, %c0_13, %c0_14] : memref<1x256x32xf32, #tpu.memory_space<vmem>>, vector<1x256x32xf32>
    %35 = vector.shape_cast %34 : vector<1x256x32xf32> to vector<256x32xf32>
    %36 = vector.shape_cast %33 : vector<256x32xf32> to vector<1x256x32xf32>
    tpu.vector_store %arg4[%c0_12, %c0_13, %c0_14], %36 {strides = array<i32>} : memref<1x256x32xf32, #tpu.memory_space<vmem>>, vector<1x256x32xf32>,
    return
  }
  func.func @transform_0(%arg0: i32) -> (i32, i32, i32, i32) {
    %c0_i32 = arith.constant 0 : i32
    %c0_i32_0 = arith.constant 0 : i32
    %c0_i32_1 = arith.constant 0 : i32
    %c0_i32_2 = arith.constant 0 : i32
    return %arg0, %c0_i32, %c0_i32_0, %c0_i32_1 : i32, i32, i32, i32
  }
  func.func @transform_1(%arg0: i32) -> (i32, i32) {
    %c0_i32 = arith.constant 0 : i32
    %c0_i32_0 = arith.constant 0 : i32
    %c0_i32_1 = arith.constant 0 : i32
    return %c0_i32, %c0_i32_0 : i32, i32
  }
  func.func @transform_2(%arg0: i32) -> (i32, i32) {
    %c0_i32 = arith.constant 0 : i32
    %c0_i32_0 = arith.constant 0 : i32
    %c0_i32_1 = arith.constant 0 : i32
    return %c0_i32, %c0_i32_0 : i32, i32
  }
  func.func @transform_3(%arg0: i32) -> (i32, i32, i32) {
    %c0_i32 = arith.constant 0 : i32
    %c0_i32_0 = arith.constant 0 : i32
    %c0_i32_1 = arith.constant 0 : i32
    return %arg0, %c0_i32, %c0_i32_0 : i32, i32, i32
  }
}

</mosaic_0001>

<bundles_post_ra>
// kernel: conv_gru_block.1
= control target key start
LH: loop header
LB: loop body
LE: loop exit
PB: predicated region body
PF: predicated region fallthrough
CT: control target
= control target key end

     0   :  { %s3038_s12 = smov 0   ;;  %s6063_s0 = inlined_call_operand.vmem [shape: f32[2,18,18,4], index: 0, kind: input, shape index: {}]   ;;  %s6064_s1 = inlined_call_operand.vmem [shape: f32[36,64], index: 1, kind: input, shape index: {}]   ;;  %s6065_s2 = inlined_call_operand.vmem [shape: f32[1,64], index: 2, kind: input, shape index: {}]   ;;  %s6066_s3 = inlined_call_operand.vmem [shape: f32[2,256,32], index: 3, kind: output, shape index: {}]  }
   0x1 LB: > { %s2699_s13 = sadd.s32 4294967295, %s3007_s12   ;;  %p2703_p0 = scmp.ge.s32.totalorder %s3007_s12, 1  ;;  %s3007_s12 = sphi %s3038_s12, %s13_s12  }
   0x2   : > { %p137_p1 = scmp.lt.s32.totalorder %s3007_s12, 3 }
   0x4   : > { %p138_p2 = pnand %p2703_p0, %p137_p1 }
   0x6   : > { %141 = sbr.rel (%p138_p2) target bundleno = 1115 (0x45b), region = 32 }
   0xb   : > { %p161_p3 = scmp.lt.s32.totalorder %s2699_s13, 1  ;;  %vm273_vm0 = vcmask 1046528   ;;  %s3009_s18 = smov 4   ;;  %vm450_vm1 = vcmask 1045504   ;;  %vm1229_vm2 = vcmask 31744   ;;  %vm1262_vm3 = vcmask 64512  }
   0xc   : > { %s3010_s19 = smov 8   ;;  %s3011_s20 = smov 12   ;;  %vm1295_vm4 = vcmask 97280   ;;  %vm1328_vm5 = vcmask 130048   ;;  %vm1361_vm6 = vcmask 162816   ;;  %vm1394_vm7 = vcmask 195584  }
   0xd   : > { %s6605_s13 = smov (!%p161_p3, %s2699_s13), 1  ;;  %s3012_s21 = smov 16   ;;  %vm1599_vm8 = vcmask 1043456   ;;  %vm1427_vm9 = vcmask 228352   ;;  %vm1460_vm10 = vcmask 261120   ;;  %vm1502_vm11 = vcmask 293888  }
   0xe   : > { %s2758_s14 = smul.u32 432, %s6605_s13  ;;  %s3013_s22 = smov 20  }
   0xf   : > { %s3014_s23 = smov 24   ;;  %s3015_s24 = smov 28  }
  0x10   : > { %s3052_s17 = scalar_lea.vmem %s6063_s0, %s2758_s14  ;;  %s3016_s25 = smov 32  }
  0x11   : > { %v3055_v0 = vld [vmem:[%s3052_s17 + $0x30] sm:$0xff]  ;;  %v3058_v1 = vld [vmem:[%s3052_s17 + $0x38] sm:$0xff]  ;;  %v3066_v5 = vld [vmem:[%s3052_s17 + $0x20] sm:$0xff]  ;;  %s3017_s11 = smov 96   ;;  %s2742_s14 = sshll.u32 %s6605_s13, 8 }
  0x12   : > { %v3061_v2 = vld [vmem:[%s3052_s17 + $0x18] sm:$0xff]  ;;  %v284_v3 = vrot.slane %v3055_v0, 1  ;;  %v285_v4 = vrot.slane %v3058_v1, 1  ;;  %v3070_v7 = vld [vmem:[%s3052_s17] sm:$0xff]  ;;  %v3073_v8 = vld [vmem:[%s3052_s17 + $0x8] sm:$0xff]  ;;  %v280_v9 = vrot.slane %v3066_v5, 1 }
  0x13   : > { %v279_v6 = vrot.slane %v3061_v2, 1  ;;  %v274_v10 = vrot.slane %v3070_v7, 1  ;;  %v275_v11 = vrot.slane %v3073_v8, 1  ;;  %v3079_v12 = vld [vmem:[%s3052_s17 + $0x40] sm:$0x3]  ;;  %v3113_v25 = vld [vmem:[%s3052_s17 + $0x68] sm:$0xff] }
  0x14   : > { %v3082_v13 = vsel %vm273_vm0, %v284_v3, %v285_v4  ;;  %v3085_v14 = vld [vmem:[%s3052_s17 + $0x28] sm:$0x3]  ;;  %v3088_v15 = vld [vmem:[%s3052_s17 + $0x10] sm:$0x3]  ;;  %v287_v18 = vrot.slane %v3079_v12, 1  ;;  %v3110_v24 = vld [vmem:[%s3052_s17 + $0x60] sm:$0xff] }
  0x15   : > { %362 = vrot.lane.b32.xlu2 %v3082_v13, %s3009_s18  ;;  %v3093_v16 = vsel %vm273_vm0, %v279_v6, %v280_v9  ;;  %v276_v17 = vsel %vm273_vm0, %v274_v10, %v275_v11  ;;  %v282_v19 = vrot.slane %v3085_v14, 1  ;;  %v277_v20 = vrot.slane %v3088_v15, 1  ;;  %v3116_v26 = vld [vmem:[%s3052_s17 + $0x50] sm:$0xff]  ;;  %v3119_v27 = vld [vmem:[%s3052_s17 + $0x58] sm:$0x3]  ;;  %v3122_v28 = vld [vmem:[%s3052_s17 + $0x48] sm:$0xff] }
  0x16   : > { %358 = vrot.lane.b32.xlu1 %v3093_v16, %s3009_s18  ;;  %354 = vrot.lane.b32.xlu0 %v276_v17, %s3009_s18  ;;  %v3103_v21 = vsel %vm273_vm0, %v285_v4, %v287_v18  ;;  %v294_v29 = vrot.slane %v3110_v24, 1  ;;  %v295_v30 = vrot.slane %v3113_v25, 1  ;;  %v290_v31 = vrot.slane %v3116_v26, 1  ;;  %v3144_v37 = vld [vmem:[%s3052_s17 + $0x80] sm:$0xff]  ;;  %v3147_v38 = vld [vmem:[%s3052_s17 + $0x88] sm:$0x3] }
  0x17   : > { %v3106_v22 = vsel %vm273_vm0, %v280_v9, %v282_v19  ;;  %v278_v23 = vsel %vm273_vm0, %v275_v11, %v277_v20  ;;  %v292_v32 = vrot.slane %v3119_v27, 1  ;;  %v289_v33 = vrot.slane %v3122_v28, 1  ;;  %v3150_v39 = vld [vmem:[%s3052_s17 + $0x78] sm:$0xff]  ;;  %v3153_v40 = vld [vmem:[%s3052_s17 + $0x70] sm:$0x3]  ;;  %v3175_v48 = vld [vmem:[%s3052_s17 + $0xa8] sm:$0xff] }
  0x18   : > { %v3135_v34 = vsel %vm273_vm0, %v294_v29, %v295_v30  ;;  %v300_v41 = vrot.slane %v3144_v37, 1  ;;  %v302_v42 = vrot.slane %v3147_v38, 1  ;;  %v299_v43 = vrot.slane %v3150_v39, 1  ;;  %v3178_v49 = vld [vmem:[%s3052_s17 + $0xb0] sm:$0xff]  ;;  %v3181_v50 = vld [vmem:[%s3052_s17 + $0x98] sm:$0xff]  ;;  %v3210_v61 = vld [vmem:[%s3052_s17 + $0xc8] sm:$0xff] }
  0x19   : > { %6151 = vst [vmem:[#allocation2_spill] sm:$0xff] %v3135_v34  ;;  %v3138_v35 = vsel %vm273_vm0, %v290_v31, %v292_v32  ;;  %v3141_v36 = vsel %vm273_vm0, %v289_v33, %v290_v31  ;;  %v297_v44 = vrot.slane %v3153_v40, 1  ;;  %v3184_v51 = vld [vmem:[%s3052_s17 + $0xa0] sm:$0x3]  ;;  %v3187_v52 = vld [vmem:[%s3052_s17 + $0x90] sm:$0xff]  ;;  %v309_v53 = vrot.slane %v3175_v48, 1 }
  0x1a   : > { %6152 = vst [vmem:[#allocation3_spill] sm:$0xff] %v3138_v35  ;;  %v3166_v45 = vsel %vm273_vm0, %v300_v41, %v302_v42  ;;  %v3169_v46 = vsel %vm273_vm0, %v299_v43, %v300_v41  ;;  %v310_v54 = vrot.slane %v3178_v49, 1  ;;  %v305_v55 = vrot.slane %v3181_v50, 1  ;;  %v3213_v62 = vld [vmem:[%s3052_s17 + $0xd0] sm:$0x3]  ;;  %v3216_v63 = vld [vmem:[%s3052_s17 + $0xc0] sm:$0xff] }
  0x1b   : > { %6153 = vst [vmem:[#allocation4_spill] sm:$0xff] %v3141_v36  ;;  %v3172_v47 = vsel %vm273_vm0, %v295_v30, %v297_v44  ;;  %v307_v56 = vrot.slane %v3184_v51, 1  ;;  %v304_v57 = vrot.slane %v3187_v52, 1  ;;  %v3219_v3 = vld [vmem:[%s3052_s17 + $0xb8] sm:$0x3]  ;;  %v315_v4 = vrot.slane %v3210_v61, 1 }
  0x1c   : > { %6154 = vst [vmem:[#allocation5_spill] sm:$0xff] %v3166_v45  ;;  %v3201_v58 = vsel %vm273_vm0, %v309_v53, %v310_v54  ;;  %v317_v6 = vrot.slane %v3213_v62, 1  ;;  %v314_v9 = vrot.slane %v3216_v63, 1  ;;  %v312_v10 = vrot.slane %v3219_v3, 1  ;;  %v3241_v19 = vld [vmem:[%s3052_s17 + $0xf0] sm:$0xff]  ;;  %v3244_v20 = vld [vmem:[%s3052_s17 + $0xf8] sm:$0xff] }
  0x1d   : > { %364 = vrot.lane.b32.xlu2 %v3103_v21, %s3009_s18  ;;  %6155 = vst [vmem:[#allocation6_spill] sm:$0xff] %v3169_v46  ;;  %v3204_v59 = vsel %vm273_vm0, %v305_v55, %v307_v56  ;;  %v3207_v60 = vsel %vm273_vm0, %v304_v57, %v305_v55  ;;  %v3250_v29 = vld [vmem:[%s3052_s17 + $0xe8] sm:$0x3]  ;;  %v3253_v30 = vld [vmem:[%s3052_s17 + $0xd8] sm:$0xff]  ;;  %v324_v31 = vrot.slane %v3241_v19, 1  ;;  %v325_v32 = vrot.slane %v3244_v20, 1 }
  0x1e   : > { %360 = vrot.lane.b32.xlu1 %v3106_v22, %s3009_s18  ;;  %356 = vrot.lane.b32.xlu0 %v278_v23, %s3009_s18  ;;  %6156 = vst [vmem:[#allocation7_spill] sm:$0xff] %v3172_v47  ;;  %v3232_v11 = vsel %vm273_vm0, %v315_v4, %v317_v6  ;;  %v3235_v17 = vsel %vm273_vm0, %v314_v9, %v315_v4  ;;  %v3247_v23 = vld [vmem:[%s3052_s17 + $0xe0] sm:$0xff]  ;;  %v322_v41 = vrot.slane %v3250_v29, 1  ;;  %v319_v42 = vrot.slane %v3253_v30, 1  ;;  %v3279_v55 = vld [vmem:[%s3052_s17 + $0x118] sm:$0x3] }
  0x1f   : > { %6157 = vst [vmem:[#allocation8_spill] sm:$0xff] %v3201_v58  ;;  %v3238_v18 = vsel %vm273_vm0, %v310_v54, %v312_v10  ;;  %v320_v33 = vrot.slane %v3247_v23, 1  ;;  %v3267_v43 = vsel %vm273_vm0, %v324_v31, %v325_v32  ;;  %v3276_v54 = vld [vmem:[%s3052_s17 + $0x110] sm:$0xff]  ;;  %v3282_v56 = vld [vmem:[%s3052_s17 + $0x108] sm:$0xff]  ;;  %v3285_v57 = vld [vmem:[%s3052_s17 + $0x100] sm:$0x3] }
  0x20   : > { %6158 = vst [vmem:[#allocation9_spill] sm:$0xff] %v3204_v59  ;;  %v330_v4 = vrot.slane %v3276_v54, 1  ;;  %v332_v6 = vrot.slane %v3279_v55, 1  ;;  %v329_v9 = vrot.slane %v3282_v56, 1  ;;  %v327_v10 = vrot.slane %v3285_v57, 1 }
  0x21   : > { %6159 = vst [vmem:[#allocation10_spill] sm:$0xff] %v3207_v60  ;;  %v3270_v44 = vsel %vm273_vm0, %v320_v33, %v322_v41  ;;  %v3273_v53 = vsel %vm273_vm0, %v319_v42, %v320_v33  ;;  %v3307_v42 = vld [vmem:[%s3052_s17 + $0x138] sm:$0xff] }
  0x22   : > { %6160 = vst [vmem:[#allocation11_spill] sm:$0xff] %v3232_v11  ;;  %v3298_v31 = vsel %vm273_vm0, %v330_v4, %v332_v6  ;;  %v3301_v33 = vsel %vm273_vm0, %v329_v9, %v330_v4  ;;  %v3304_v41 = vsel %vm273_vm0, %v325_v32, %v327_v10  ;;  %v3319_v6 = vld [vmem:[%s3052_s17 + $0x120] sm:$0xff]  ;;  %v339_v32 = vrot.slane %v3307_v42, 1 }
  0x23   : > { %6161 = vst [vmem:[#allocation12_spill] sm:$0xff] %v3235_v17 }
  0x24   : > { %6162 = vst [vmem:[#allocation13_spill] sm:$0xff] %v3238_v18 }
  0x25   : > { %370 = vrot.lane.b32.xlu2 %v3135_v34, %s3009_s18  ;;  %6163 = vst [vmem:[#allocation14_spill] sm:$0xff] %v3267_v43  ;;  %v3379_v34 = vld [vmem:[%s3052_s17 + $0x168] sm:$0xff] }
  0x26   : > { %368 = vrot.lane.b32.xlu1 %v3138_v35, %s3009_s18  ;;  %366 = vrot.lane.b32.xlu0 %v3141_v36, %s3009_s18  ;;  %6164 = vst [vmem:[#allocation15_spill] sm:$0xff] %v3270_v44 }
  0x27   : > { %6165 = vst [vmem:[#allocation16_spill] sm:$0xff] %v3273_v53 }
  0x28   : > { %6166 = vst [vmem:[#allocation17_spill] sm:$0xff] %v3298_v31 }
  0x29   : > { %6167 = vst [vmem:[#allocation18_spill] sm:$0xff] %v3301_v33 }
  0x2a   : > { %6168 = vst [vmem:[#allocation19_spill] sm:$0xff] %v3304_v41 }
  0x2d   : > { %376 = vrot.lane.b32.xlu2 %v3166_v45, %s3009_s18  ;;  %v3351_v45 = vld [vmem:[%s3052_s17 + $0x148] sm:$0x3] }
  0x2e   : > { %374 = vrot.lane.b32.xlu1 %v3169_v46, %s3009_s18  ;;  %372 = vrot.lane.b32.xlu0 %v3172_v47, %s3009_s18 }
  0x35   : > { %382 = vrot.lane.b32.xlu2 %v3201_v58, %s3009_s18 }
  0x36   : > { %380 = vrot.lane.b32.xlu1 %v3204_v59, %s3009_s18  ;;  %378 = vrot.lane.b32.xlu0 %v3207_v60, %s3009_s18 }
  0x3d   : > { %388 = vrot.lane.b32.xlu2 %v3232_v11, %s3009_s18  ;;  %v3313_v11 = vld [vmem:[%s3052_s17 + $0x128] sm:$0xff] }
  0x3e   : > { %386 = vrot.lane.b32.xlu1 %v3235_v17, %s3009_s18  ;;  %384 = vrot.lane.b32.xlu0 %v3238_v18, %s3009_s18  ;;  %v335_v9 = vrot.slane %v3313_v11, 1  ;;  %v3345_v18 = vld [vmem:[%s3052_s17 + $0x160] sm:$0x3]  ;;  %v3348_v17 = vld [vmem:[%s3052_s17 + $0x150] sm:$0xff] }
  0x45   : > { %394 = vrot.lane.b32.xlu2 %v3267_v43, %s3009_s18  ;;  %v3310_v43 = vld [vmem:[%s3052_s17 + $0x140] sm:$0xff] }
  0x46   : > { %392 = vrot.lane.b32.xlu1 %v3270_v44, %s3009_s18  ;;  %390 = vrot.lane.b32.xlu0 %v3273_v53, %s3009_s18  ;;  %v3316_v53 = vld [vmem:[%s3052_s17 + $0x130] sm:$0x3]  ;;  %v340_v4 = vrot.slane %v3310_v43, 1  ;;  %v334_v44 = vrot.slane %v3319_v6, 1 }
  0x47   : > { %v337_v10 = vrot.slane %v3316_v53, 1 }
  0x48   : > { %v3333_v58 = vsel %vm273_vm0, %v339_v32, %v340_v4  ;;  %v347_v32 = vrot.slane %v3345_v18, 1 }
  0x49   : > { %6169 = vst [vmem:[#allocation20_spill] sm:$0xff] %v3333_v58 }
  0x4d   : > { %400 = vrot.lane.b32.xlu2 %v3298_v31, %s3009_s18  ;;  %v3336_v31 = vsel %vm273_vm0, %v335_v9, %v337_v10  ;;  %v342_v10 = vrot.slane %v3351_v45, 1 }
  0x4e   : > { %398 = vrot.lane.b32.xlu1 %v3301_v33, %s3009_s18  ;;  %396 = vrot.lane.b32.xlu0 %v3304_v41, %s3009_s18  ;;  %6170 = vst [vmem:[#allocation21_spill] sm:$0xff] %v3336_v31  ;;  %v3339_v33 = vsel %vm273_vm0, %v334_v44, %v335_v9  ;;  %v3342_v41 = vld [vmem:[%s3052_s17 + $0x158] sm:$0xff]  ;;  %v344_v9 = vrot.slane %v3348_v17, 1 }
  0x4f   : > { %6171 = vst [vmem:[#allocation22_spill] sm:$0xff] %v3339_v33  ;;  %v345_v44 = vrot.slane %v3342_v41, 1 }
  0x51   : > { %v3364_v60 = vsel %vm273_vm0, %v345_v44, %v347_v32  ;;  %v3367_v59 = vsel %vm273_vm0, %v344_v9, %v345_v44  ;;  %v451_v44 = vrot.slane %v3070_v7, 2  ;;  %v457_v7 = vrot.slane %v3066_v5, 2 }
  0x52   : > { %6172 = vst [vmem:[#allocation23_spill] sm:$0xff] %v3364_v60 }
  0x53   : > { %6173 = vst [vmem:[#allocation24_spill] sm:$0xff] %v3367_v59 }
  0x55   : > { %406 = vrot.lane.b32.xlu2 %v3333_v58, %s3009_s18  ;;  %v3370_v58 = vsel %vm273_vm0, %v340_v4, %v342_v10  ;;  %v452_v4 = vrot.slane %v3073_v8, 2  ;;  %v349_v10 = vrot.slane %v3379_v34, 1  ;;  %v459_v8 = vrot.slane %v3085_v14, 2 }
  0x56   : > { %404 = vrot.lane.b32.xlu1 %v3336_v31, %s3009_s18  ;;  %402 = vrot.lane.b32.xlu0 %v3339_v33, %s3009_s18  ;;  %6174 = vst [vmem:[#allocation25_spill] sm:$0xff] %v3370_v58  ;;  %v3373_v31 = vld [vmem:[%s3052_s17 + $0x170] sm:$0xff]  ;;  %v3376_v33 = vld [vmem:[%s3052_s17 + $0x178] sm:$0x3]  ;;  %v466_v14 = vrot.slane %v3122_v28, 2 }
  0x57   : > { %v350_v32 = vrot.slane %v3373_v31, 1  ;;  %v352_v9 = vrot.slane %v3376_v33, 1  ;;  %v453_v47 = vsel %vm450_vm1, %v451_v44, %v452_v4  ;;  %v456_v44 = vrot.slane %v3061_v2, 2 }
  0x5d   : > { %412 = vrot.lane.b32.xlu2 %v3364_v60, %s3009_s18  ;;  %v3394_v60 = vsel %vm273_vm0, %v350_v32, %v352_v9  ;;  %v454_v9 = vrot.slane %v3088_v15, 2  ;;  %v467_v15 = vrot.slane %v3116_v26, 2 }
  0x5e   : > { %410 = vrot.lane.b32.xlu1 %v3367_v59, %s3009_s18  ;;  %408 = vrot.lane.b32.xlu0 %v3370_v58, %s3009_s18  ;;  %6175 = vst [vmem:[#allocation26_spill] sm:$0xff] %v3394_v60  ;;  %v3397_v59 = vsel %vm273_vm0, %v349_v10, %v350_v32  ;;  %v3409_v32 = vsel %vm450_vm1, %v457_v7, %v459_v8  ;;  %v462_v8 = vrot.slane %v3058_v1, 2 }
  0x5f   : > { %6176 = vst [vmem:[#allocation27_spill] sm:$0xff] %v3397_v59  ;;  %v3412_v10 = vsel %vm450_vm1, %v456_v44, %v457_v7  ;;  %v464_v7 = vrot.slane %v3079_v12, 2  ;;  %v3428_v44 = vsel %vm450_vm1, %v466_v14, %v467_v15  ;;  %v472_v12 = vrot.slane %v3113_v25, 2 }
  0x60   : > { %6177 = vst [vmem:[#allocation28_spill] sm:$0xff] %v3409_v32  ;;  %v474_v14 = vrot.slane %v3153_v40, 2  ;;  %v482_v40 = vrot.slane %v3181_v50, 2 }
  0x61   : > { %6179 = vst [vmem:[#allocation30_spill] sm:$0xff] %v3428_v44 }
  0x65   : > { %531 = vrot.lane.b32.xlu2 %v453_v47, %s3010_s19  ;;  %v455_v47 = vsel %vm450_vm1, %v452_v4, %v454_v9  ;;  %v461_v4 = vrot.slane %v3055_v0, 2  ;;  %v3431_v9 = vsel %vm450_vm1, %v462_v8, %v464_v7  ;;  %v471_v7 = vrot.slane %v3110_v24, 2 }
  0x66   : > { %416 = vrot.lane.b32.xlu1 %v3394_v60, %s3009_s18  ;;  %414 = vrot.lane.b32.xlu0 %v3397_v59, %s3009_s18 }
  0x6d   : > { %537 = vrot.lane.b32.xlu2 %v3409_v32, %s3010_s19 }
  0x6e   : > { %535 = vrot.lane.b32.xlu1 %v3412_v10, %s3010_s19  ;;  %533 = vrot.lane.b32.xlu0 %v455_v47, %s3010_s19  ;;  %v3434_v47 = vsel %vm450_vm1, %v461_v4, %v462_v8  ;;  %v469_v8 = vrot.slane %v3119_v27, 2  ;;  %v3449_v4 = vsel %vm450_vm1, %v472_v12, %v474_v14  ;;  %v481_v27 = vrot.slane %v3187_v52, 2 }
  0x6f   : > { %v3422_v59 = vpop.permute.xlu2 %362  ;;  %6181 = vst [vmem:[#allocation32_spill] sm:$0xff] %v3449_v4 }
  0x70   : > { %6178 = vst [vmem:[#allocation29_spill] sm:$0xff] %v3422_v59  ;;  %v3455_v32 = vsel %vm450_vm1, %v467_v15, %v469_v8  ;;  %v479_v15 = vrot.slane %v3147_v38, 2  ;;  %v3471_v8 = vsel %vm450_vm1, %v481_v27, %v482_v40  ;;  %v487_v38 = vrot.slane %v3178_v49, 2 }
  0x71   : > { %6183 = vst [vmem:[#allocation34_spill] sm:$0xff] %v3455_v32  ;;  %v489_v27 = vrot.slane %v3219_v3, 2  ;;  %v497_v3 = vrot.slane %v3247_v23, 2 }
  0x72   : > { %6185 = vst [vmem:[#allocation36_spill] sm:$0xff] %v3471_v8 }
  0x75   : > { %543 = vrot.lane.b32.xlu2 %v3428_v44, %s3010_s19  ;;  %v3452_v44 = vsel %vm450_vm1, %v471_v7, %v472_v12  ;;  %v477_v12 = vrot.slane %v3144_v37, 2  ;;  %v476_v7 = vrot.slane %v3150_v39, 2 }
  0x76   : > { %541 = vrot.lane.b32.xlu1 %v3431_v9, %s3010_s19  ;;  %539 = vrot.lane.b32.xlu0 %v3434_v47, %s3010_s19  ;;  %6182 = vst [vmem:[#allocation33_spill] sm:$0xff] %v3452_v44 }
  0x77   : > { %v3444_v59 = vpop.permute.xlu2 %364 }
  0x78   : > { %6180 = vst [vmem:[#allocation31_spill] sm:$0xff] %v3444_v59  ;;  %v3474_v59 = vsel %vm450_vm1, %v477_v12, %v479_v15  ;;  %v486_v15 = vrot.slane %v3175_v48, 2 }
  0x79   : > { %6186 = vst [vmem:[#allocation37_spill] sm:$0xff] %v3474_v59 }
  0x7d   : > { %549 = vrot.lane.b32.xlu2 %v3449_v4, %s3010_s19  ;;  %v3477_v4 = vsel %vm450_vm1, %v476_v7, %v477_v12  ;;  %v484_v12 = vrot.slane %v3184_v51, 2  ;;  %v496_v51 = vrot.slane %v3253_v30, 2 }
  0x7e   : > { %547 = vrot.lane.b32.xlu1 %v3452_v44, %s3010_s19  ;;  %545 = vrot.lane.b32.xlu0 %v3455_v32, %s3010_s19  ;;  %6187 = vst [vmem:[#allocation38_spill] sm:$0xff] %v3477_v4 }
  0x7f   : > { %v3465_v14 = vpop.permute.xlu2 %370 }
  0x80   : > { %6184 = vst [vmem:[#allocation35_spill] sm:$0xff] %v3465_v14 }
  0x85   : > { %555 = vrot.lane.b32.xlu2 %v3471_v8, %s3010_s19  ;;  %v3496_v8 = vsel %vm450_vm1, %v487_v38, %v489_v27 }
  0x86   : > { %553 = vrot.lane.b32.xlu1 %v3474_v59, %s3010_s19  ;;  %551 = vrot.lane.b32.xlu0 %v3477_v4, %s3010_s19  ;;  %6191 = vst [vmem:[#allocation42_spill] sm:$0xff] %v3496_v8  ;;  %v3499_v59 = vsel %vm450_vm1, %v486_v15, %v487_v38  ;;  %v3502_v4 = vsel %vm450_vm1, %v482_v40, %v484_v12  ;;  %v492_v38 = vrot.slane %v3210_v61, 2  ;;  %v494_v40 = vrot.slane %v3213_v62, 2 }
  0x87   : > { %v3487_v14 = vpop.permute.xlu2 %376  ;;  %v491_v15 = vrot.slane %v3216_v63, 2  ;;  %v502_v62 = vrot.slane %v3244_v20, 2 }
  0x88   : > { %6188 = vst [vmem:[#allocation39_spill] sm:$0xff] %v3487_v14  ;;  %v3491_v7 = vpop.permute.xlu1 %358  ;;  %v3493_v32 = vpop.permute.xlu0 %354 }
  0x89   : > { %6189 = vst [vmem:[#allocation40_spill] sm:$0xff] %v3491_v7  ;;  %v3522_v7 = vsel %vm450_vm1, %v496_v51, %v497_v3  ;;  %v504_v51 = vrot.slane %v3285_v57, 2  ;;  %v512_v57 = vrot.slane %v3313_v11, 2 }
  0x8a   : > { %6190 = vst [vmem:[#allocation41_spill] sm:$0xff] %v3493_v32  ;;  %v3525_v32 = vsel %vm450_vm1, %v492_v38, %v494_v40  ;;  %v501_v40 = vrot.slane %v3241_v19, 2 }
  0x8b   : > { %6195 = vst [vmem:[#allocation46_spill] sm:$0xff] %v3522_v7 }
  0x8c   : > { %6196 = vst [vmem:[#allocation47_spill] sm:$0xff] %v3525_v32 }
  0x8d   : > { %561 = vrot.lane.b32.xlu2 %v3496_v8, %s3010_s19  ;;  %v3528_v8 = vsel %vm450_vm1, %v491_v15, %v492_v38  ;;  %v499_v38 = vrot.slane %v3250_v29, 2  ;;  %v511_v29 = vrot.slane %v3319_v6, 2 }
  0x8e   : > { %559 = vrot.lane.b32.xlu1 %v3499_v59, %s3010_s19  ;;  %557 = vrot.lane.b32.xlu0 %v3502_v4, %s3010_s19  ;;  %6197 = vst [vmem:[#allocation48_spill] sm:$0xff] %v3528_v8 }
  0x8f   : > { %v3512_v27 = vpop.permute.xlu2 %382 }
  0x90   : > { %6192 = vst [vmem:[#allocation43_spill] sm:$0xff] %v3512_v27  ;;  %v3517_v12 = vpop.permute.xlu1 %360  ;;  %v3519_v14 = vpop.permute.xlu0 %356  ;;  %v3547_v27 = vsel %vm450_vm1, %v502_v62, %v504_v51 }
  0x91   : > { %6193 = vst [vmem:[#allocation44_spill] sm:$0xff] %v3517_v12 }
  0x92   : > { %6194 = vst [vmem:[#allocation45_spill] sm:$0xff] %v3519_v14 }
  0x93   : > { %6201 = vst [vmem:[#allocation52_spill] sm:$0xff] %v3547_v27 }
  0x95   : > { %567 = vrot.lane.b32.xlu2 %v3522_v7, %s3010_s19  ;;  %v3550_v7 = vsel %vm450_vm1, %v501_v40, %v502_v62  ;;  %v507_v62 = vrot.slane %v3276_v54, 2  ;;  %v506_v40 = vrot.slane %v3282_v56, 2 }
  0x96   : > { %565 = vrot.lane.b32.xlu1 %v3525_v32, %s3010_s19  ;;  %563 = vrot.lane.b32.xlu0 %v3528_v8, %s3010_s19  ;;  %v3553_v8 = vsel %vm450_vm1, %v497_v3, %v499_v38  ;;  %v509_v3 = vrot.slane %v3279_v55, 2  ;;  %v517_v55 = vrot.slane %v3310_v43, 2 }
  0x97   : > { %v3538_v12 = vpop.permute.xlu2 %388  ;;  %6202 = vst [vmem:[#allocation53_spill] sm:$0xff] %v3553_v8 }
  0x98   : > { %6198 = vst [vmem:[#allocation49_spill] sm:$0xff] %v3538_v12  ;;  %v3542_v15 = vpop.permute.xlu1 %368  ;;  %v3544_v14 = vpop.permute.xlu0 %366  ;;  %v3576_v12 = vsel %vm450_vm1, %v507_v62, %v509_v3  ;;  %v516_v3 = vrot.slane %v3307_v42, 2 }
  0x99   : > { %6199 = vst [vmem:[#allocation50_spill] sm:$0xff] %v3542_v15 }
  0x9a   : > { %6200 = vst [vmem:[#allocation51_spill] sm:$0xff] %v3544_v14  ;;  %v3573_v14 = vsel %vm450_vm1, %v511_v29, %v512_v57  ;;  %v519_v29 = vrot.slane %v3351_v45, 2  ;;  %v526_v45 = vrot.slane %v3379_v34, 2 }
  0x9b   : > { %6206 = vst [vmem:[#allocation57_spill] sm:$0xff] %v3573_v14 }
  0x9d   : > { %573 = vrot.lane.b32.xlu2 %v3547_v27, %s3010_s19  ;;  %v3579_v27 = vsel %vm450_vm1, %v506_v40, %v507_v62  ;;  %v514_v62 = vrot.slane %v3316_v53, 2  ;;  %v527_v53 = vrot.slane %v3373_v31, 2 }
  0x9e   : > { %571 = vrot.lane.b32.xlu1 %v3550_v7, %s3010_s19  ;;  %569 = vrot.lane.b32.xlu0 %v3553_v8, %s3010_s19  ;;  %6207 = vst [vmem:[#allocation58_spill] sm:$0xff] %v3579_v27 }
  0x9f   : > { %v3563_v51 = vpop.permute.xlu2 %394 }
  0xa0   : > { %6203 = vst [vmem:[#allocation54_spill] sm:$0xff] %v3563_v51  ;;  %v3568_v38 = vpop.permute.xlu1 %374  ;;  %v3570_v15 = vpop.permute.xlu0 %372  ;;  %v3598_v51 = vsel %vm450_vm1, %v517_v55, %v519_v29 }
  0xa1   : > { %6204 = vst [vmem:[#allocation55_spill] sm:$0xff] %v3568_v38 }
  0xa2   : > { %6205 = vst [vmem:[#allocation56_spill] sm:$0xff] %v3570_v15 }
  0xa3   : > { %6211 = vst [vmem:[#allocation62_spill] sm:$0xff] %v3598_v51 }
  0xa5   : > { %579 = vrot.lane.b32.xlu2 %v3573_v14, %s3010_s19  ;;  %v3601_v14 = vsel %vm450_vm1, %v516_v3, %v517_v55  ;;  %v522_v55 = vrot.slane %v3342_v41, 2  ;;  %v521_v3 = vrot.slane %v3348_v17, 2 }
  0xa6   : > { %577 = vrot.lane.b32.xlu1 %v3576_v12, %s3010_s19  ;;  %575 = vrot.lane.b32.xlu0 %v3579_v27, %s3010_s19  ;;  %6212 = vst [vmem:[#allocation63_spill] sm:$0xff] %v3601_v14  ;;  %v3604_v27 = vsel %vm450_vm1, %v512_v57, %v514_v62  ;;  %v524_v57 = vrot.slane %v3345_v18, 2 }
  0xa7   : > { %v3589_v38 = vpop.permute.xlu2 %400  ;;  %6213 = vst [vmem:[#allocation64_spill] sm:$0xff] %v3604_v27 }
  0xa8   : > { %6208 = vst [vmem:[#allocation59_spill] sm:$0xff] %v3589_v38  ;;  %v3593_v40 = vpop.permute.xlu1 %380  ;;  %v3595_v15 = vpop.permute.xlu0 %378  ;;  %v3624_v38 = vsel %vm450_vm1, %v526_v45, %v527_v53  ;;  %v529_v45 = vrot.slane %v3376_v33, 2 }
  0xa9   : > { %6209 = vst [vmem:[#allocation60_spill] sm:$0xff] %v3593_v40  ;;  %v3627_v40 = vsel %vm450_vm1, %v522_v55, %v524_v57 }
  0xaa   : > { %6210 = vst [vmem:[#allocation61_spill] sm:$0xff] %v3595_v15 }
  0xad   : > { %585 = vrot.lane.b32.xlu2 %v3598_v51, %s3010_s19  ;;  %v3630_v51 = vsel %vm450_vm1, %v521_v3, %v522_v55  ;;  %v3646_v55 = vsel %vm450_vm1, %v527_v53, %v529_v45 }
  0xae   : > { %583 = vrot.lane.b32.xlu1 %v3601_v14, %s3010_s19  ;;  %581 = vrot.lane.b32.xlu0 %v3604_v27, %s3010_s19 }
  0xaf   : > { %v3614_v29 = vpop.permute.xlu2 %406 }
  0xb0   : > { %6214 = vst [vmem:[#allocation65_spill] sm:$0xff] %v3614_v29  ;;  %v3619_v62 = vpop.permute.xlu1 %386  ;;  %v3621_v15 = vpop.permute.xlu0 %384 }
  0xb1   : > { %6215 = vst [vmem:[#allocation66_spill] sm:$0xff] %v3619_v62 }
  0xb2   : > { %6216 = vst [vmem:[#allocation67_spill] sm:$0xff] %v3621_v15 }
  0xb5   : > { %591 = vrot.lane.b32.xlu2 %v3624_v38, %s3010_s19 }
  0xb6   : > { %589 = vrot.lane.b32.xlu1 %v3627_v40, %s3010_s19  ;;  %587 = vrot.lane.b32.xlu0 %v3630_v51, %s3010_s19 }
  0xb7   : > { %v3638_v18 = vpop.permute.xlu2 %412 }
  0xb8   : > { %6217 = vst [vmem:[#allocation68_spill] sm:$0xff] %v3638_v18  ;;  %v3641_v29 = vpop.permute.xlu1 %392  ;;  %v3643_v57 = vpop.permute.xlu0 %390 }
  0xb9   : > { %6218 = vst [vmem:[#allocation69_spill] sm:$0xff] %v3641_v29 }
  0xba   : > { %6219 = vst [vmem:[#allocation70_spill] sm:$0xff] %v3643_v57 }
  0xbd   : > { %631 = vrot.lane.b32.xlu2 %v3066_v5, %s3011_s20 }
  0xbe   : > { %629 = vrot.lane.b32.xlu1 %v3061_v2, %s3011_s20  ;;  %593 = vrot.lane.b32.xlu0 %v3646_v55, %s3010_s19 }
  0xbf   : > { %v3654_v3 = vpop.permute.xlu2 %531 }
  0xc0   : > { %6220 = vst [vmem:[#allocation71_spill] sm:$0xff] %v3654_v3  ;;  %v3656_v33 = vpop.permute.xlu1 %398  ;;  %v3658_v62 = vpop.permute.xlu0 %396 }
  0xc1   : > { %6221 = vst [vmem:[#allocation72_spill] sm:$0xff] %v3656_v33 }
  0xc2   : > { %6222 = vst [vmem:[#allocation73_spill] sm:$0xff] %v3658_v62 }
  0xc5   : > { %637 = vrot.lane.b32.xlu2 %v3122_v28, %s3011_s20 }
  0xc6   : > { %635 = vrot.lane.b32.xlu1 %v3058_v1, %s3011_s20  ;;  %633 = vrot.lane.b32.xlu0 %v3055_v0, %s3011_s20 }
  0xc7   : > { %v3666_v5 = vpop.permute.xlu2 %537 }
  0xc8   : > { %6223 = vst [vmem:[#allocation74_spill] sm:$0xff] %v3666_v5  ;;  %v3668_v2 = vpop.permute.xlu1 %404  ;;  %v3670_v53 = vpop.permute.xlu0 %402 }
  0xc9   : > { %6224 = vst [vmem:[#allocation75_spill] sm:$0xff] %v3668_v2 }
  0xca   : > { %6225 = vst [vmem:[#allocation76_spill] sm:$0xff] %v3670_v53 }
  0xcd   : > { %643 = vrot.lane.b32.xlu2 %v3113_v25, %s3011_s20 }
  0xce   : > { %641 = vrot.lane.b32.xlu1 %v3110_v24, %s3011_s20  ;;  %639 = vrot.lane.b32.xlu0 %v3116_v26, %s3011_s20 }
  0xcf   : > { %v3678_v45 = vpop.permute.xlu2 %543 }
  0xd0   : > { %6226 = vst [vmem:[#allocation77_spill] sm:$0xff] %v3678_v45  ;;  %v3680_v3 = vpop.permute.xlu1 %410  ;;  %v3682_v18 = vpop.permute.xlu0 %408 }
  0xd1   : > { %6227 = vst [vmem:[#allocation78_spill] sm:$0xff] %v3680_v3  ;;  %v3772_v3 = vld [vmem:[%s3052_s17 + $0x180] sm:$0xff] }
  0xd2   : > { %6228 = vst [vmem:[#allocation79_spill] sm:$0xff] %v3682_v18 }
  0xd5   : > { %649 = vrot.lane.b32.xlu2 %v3187_v52, %s3011_s20 }
  0xd6   : > { %647 = vrot.lane.b32.xlu1 %v3144_v37, %s3011_s20  ;;  %645 = vrot.lane.b32.xlu0 %v3150_v39, %s3011_s20 }
  0xd7   : > { %v3690_v5 = vpop.permute.xlu2 %549 }
  0xd8   : > { %6229 = vst [vmem:[#allocation80_spill] sm:$0xff] %v3690_v5  ;;  %v3692_v2 = vpop.permute.xlu1 %416  ;;  %v3694_v53 = vpop.permute.xlu0 %414 }
  0xd9   : > { %6230 = vst [vmem:[#allocation81_spill] sm:$0xff] %v3692_v2 }
  0xda   : > { %6231 = vst [vmem:[#allocation82_spill] sm:$0xff] %v3694_v53 }
  0xdd   : > { %655 = vrot.lane.b32.xlu2 %v3178_v49, %s3011_s20 }
  0xde   : > { %653 = vrot.lane.b32.xlu1 %v3175_v48, %s3011_s20  ;;  %651 = vrot.lane.b32.xlu0 %v3181_v50, %s3011_s20 }
  0xdf   : > { %v3702_v45 = vpop.permute.xlu2 %555 }
  0xe0   : > { %6232 = vst [vmem:[#allocation83_spill] sm:$0xff] %v3702_v45  ;;  %v3704_v18 = vpop.permute.xlu1 %535  ;;  %v3706_v62 = vpop.permute.xlu0 %533 }
  0xe1   : > { %6233 = vst [vmem:[#allocation84_spill] sm:$0xff] %v3704_v18 }
  0xe2   : > { %6234 = vst [vmem:[#allocation85_spill] sm:$0xff] %v3706_v62 }
  0xe5   : > { %661 = vrot.lane.b32.xlu2 %v3253_v30, %s3011_s20 }
  0xe6   : > { %659 = vrot.lane.b32.xlu1 %v3210_v61, %s3011_s20  ;;  %657 = vrot.lane.b32.xlu0 %v3216_v63, %s3011_s20 }
  0xe7   : > { %v3714_v5 = vpop.permute.xlu2 %561 }
  0xe8   : > { %6235 = vst [vmem:[#allocation86_spill] sm:$0xff] %v3714_v5  ;;  %v3716_v53 = vpop.permute.xlu1 %541  ;;  %v3718_v2 = vpop.permute.xlu0 %539 }
  0xe9   : > { %6236 = vst [vmem:[#allocation87_spill] sm:$0xff] %v3716_v53 }
  0xea   : > { %6237 = vst [vmem:[#allocation88_spill] sm:$0xff] %v3718_v2 }
  0xed   : > { %667 = vrot.lane.b32.xlu2 %v3244_v20, %s3011_s20 }
  0xee   : > { %665 = vrot.lane.b32.xlu1 %v3241_v19, %s3011_s20  ;;  %663 = vrot.lane.b32.xlu0 %v3247_v23, %s3011_s20 }
  0xef   : > { %v3726_v45 = vpop.permute.xlu2 %567 }
  0xf0   : > { %6238 = vst [vmem:[#allocation89_spill] sm:$0xff] %v3726_v45  ;;  %v3728_v18 = vpop.permute.xlu1 %547  ;;  %v3730_v62 = vpop.permute.xlu0 %545 }
  0xf1   : > { %6239 = vst [vmem:[#allocation90_spill] sm:$0xff] %v3728_v18 }
  0xf2   : > { %6240 = vst [vmem:[#allocation91_spill] sm:$0xff] %v3730_v62 }
  0xf5   : > { %673 = vrot.lane.b32.xlu2 %v3319_v6, %s3011_s20 }
  0xf6   : > { %671 = vrot.lane.b32.xlu1 %v3276_v54, %s3011_s20  ;;  %669 = vrot.lane.b32.xlu0 %v3282_v56, %s3011_s20 }
  0xf7   : > { %v3738_v53 = vpop.permute.xlu2 %573 }
  0xf8   : > { %6241 = vst [vmem:[#allocation92_spill] sm:$0xff] %v3738_v53  ;;  %v3740_v2 = vpop.permute.xlu1 %553  ;;  %v3742_v45 = vpop.permute.xlu0 %551 }
  0xf9   : > { %6242 = vst [vmem:[#allocation93_spill] sm:$0xff] %v3740_v2 }
  0xfa   : > { %6243 = vst [vmem:[#allocation94_spill] sm:$0xff] %v3742_v45 }
  0xfd   : > { %679 = vrot.lane.b32.xlu2 %v3310_v43, %s3011_s20 }
  0xfe   : > { %677 = vrot.lane.b32.xlu1 %v3307_v42, %s3011_s20  ;;  %675 = vrot.lane.b32.xlu0 %v3313_v11, %s3011_s20 }
  0xff   : > { %v3750_v62 = vpop.permute.xlu2 %579 }
 0x100   : > { %6244 = vst [vmem:[#allocation95_spill] sm:$0xff] %v3750_v62  ;;  %v3752_v18 = vpop.permute.xlu1 %559  ;;  %v3754_v57 = vpop.permute.xlu0 %557  ;;  %v3769_v62 = vld [vmem:[%s3052_s17 + $0x188] sm:$0xff] }
 0x101   : > { %6245 = vst [vmem:[#allocation96_spill] sm:$0xff] %v3752_v18 }
 0x105   : > { %685 = vrot.lane.b32.xlu2 %v3379_v34, %s3011_s20 }
 0x106   : > { %683 = vrot.lane.b32.xlu1 %v3342_v41, %s3011_s20  ;;  %681 = vrot.lane.b32.xlu0 %v3348_v17, %s3011_s20 }
 0x107   : > { %v3762_v2 = vpop.permute.xlu2 %585 }
 0x108   : > { %6246 = vst [vmem:[#allocation97_spill] sm:$0xff] %v3762_v2  ;;  %v3764_v45 = vpop.permute.xlu1 %565  ;;  %v3766_v53 = vpop.permute.xlu0 %563 }
 0x109   : > { %6247 = vst [vmem:[#allocation98_spill] sm:$0xff] %v3764_v45 }
 0x10a   : > { %6248 = vst [vmem:[#allocation99_spill] sm:$0xff] %v3766_v53 }
 0x10d   : > { %691 = vrot.lane.b32.xlu2 %v3769_v62, %s3011_s20 }
 0x10e   : > { %689 = vrot.lane.b32.xlu1 %v3772_v3, %s3011_s20  ;;  %687 = vrot.lane.b32.xlu0 %v3373_v31, %s3011_s20 }
 0x10f   : > { %v3780_v18 = vpop.permute.xlu2 %591 }
 0x110   : > { %6249 = vst [vmem:[#allocation100_spill] sm:$0xff] %v3780_v18  ;;  %v3782_v2 = vpop.permute.xlu1 %571  ;;  %v3784_v45 = vpop.permute.xlu0 %569 }
 0x111   : > { %6250 = vst [vmem:[#allocation101_spill] sm:$0xff] %v3782_v2 }
 0x112   : > { %6251 = vst [vmem:[#allocation102_spill] sm:$0xff] %v3784_v45  ;;  %v6280_v45 = vld [vmem:[#allocation18_spill] sm:$0xff] }
 0x115   : > { %735 = vrot.lane.b32.xlu2 %v3082_v13, %s3012_s21 }
 0x116   : > { %733 = vrot.lane.b32.xlu1 %v3106_v22, %s3012_s21  ;;  %731 = vrot.lane.b32.xlu0 %v3093_v16, %s3012_s21 }
 0x117   : > { %v3792_v53 = vpop.permute.xlu2 %631 }
 0x118   : > { %6252 = vst [vmem:[#allocation103_spill] sm:$0xff] %v3792_v53  ;;  %v3794_v5 = vpop.permute.xlu1 %577  ;;  %v3796_v15 = vpop.permute.xlu0 %575  ;;  %v6258_v53 = vld [vmem:[#allocation7_spill] sm:$0xff] }
 0x119   : > { %6253 = vst [vmem:[#allocation104_spill] sm:$0xff] %v3794_v5  ;;  %v6259_v5 = vld [vmem:[#allocation2_spill] sm:$0xff] }
 0x11a   : > { %6254 = vst [vmem:[#allocation105_spill] sm:$0xff] %v3796_v15 }
 0x11d   : > { %741 = vrot.lane.b32.xlu2 %v3138_v35, %s3012_s21 }
 0x11e   : > { %739 = vrot.lane.b32.xlu1 %v3141_v36, %s3012_s21  ;;  %737 = vrot.lane.b32.xlu0 %v3103_v21, %s3012_s21 }
 0x11f   : > { %v3804_v18 = vpop.permute.xlu2 %637 }
 0x120   : > { %6255 = vst [vmem:[#allocation106_spill] sm:$0xff] %v3804_v18  ;;  %v3806_v22 = vpop.permute.xlu1 %583  ;;  %v3808_v16 = vpop.permute.xlu0 %581  ;;  %v6263_v18 = vld [vmem:[#allocation9_spill] sm:$0xff] }
 0x121   : > { %6256 = vst [vmem:[#allocation107_spill] sm:$0xff] %v3806_v22  ;;  %v6264_v22 = vld [vmem:[#allocation10_spill] sm:$0xff] }
 0x122   : > { %6257 = vst [vmem:[#allocation108_spill] sm:$0xff] %v3808_v16  ;;  %v6265_v16 = vld [vmem:[#allocation5_spill] sm:$0xff] }
 0x125   : > { %747 = vrot.lane.b32.xlu2 %v3169_v46, %s3012_s21 }
 0x126   : > { %745 = vrot.lane.b32.xlu1 %v6258_v53, %s3012_s21  ;;  %743 = vrot.lane.b32.xlu0 %v6259_v5, %s3012_s21 }
 0x127   : > { %v3816_v2 = vpop.permute.xlu2 %643 }
 0x128   : > { %6260 = vst [vmem:[#allocation109_spill] sm:$0xff] %v3816_v2  ;;  %v3818_v35 = vpop.permute.xlu1 %589  ;;  %v3820_v15 = vpop.permute.xlu0 %587  ;;  %v6269_v2 = vld [vmem:[#allocation12_spill] sm:$0xff] }
 0x129   : > { %6261 = vst [vmem:[#allocation110_spill] sm:$0xff] %v3818_v35  ;;  %v6270_v35 = vld [vmem:[#allocation13_spill] sm:$0xff] }
 0x12a   : > { %6262 = vst [vmem:[#allocation111_spill] sm:$0xff] %v3820_v15  ;;  %v6271_v15 = vld [vmem:[#allocation8_spill] sm:$0xff] }
 0x12d   : > { %753 = vrot.lane.b32.xlu2 %v6263_v18, %s3012_s21 }
 0x12e   : > { %751 = vrot.lane.b32.xlu1 %v6264_v22, %s3012_s21  ;;  %749 = vrot.lane.b32.xlu0 %v6265_v16, %s3012_s21 }
 0x12f   : > { %v3828_v46 = vpop.permute.xlu2 %649 }
 0x130   : > { %6266 = vst [vmem:[#allocation10_spill] sm:$0xff] %v3828_v46  ;;  %v3830_v53 = vpop.permute.xlu1 %629  ;;  %v3832_v5 = vpop.permute.xlu0 %593  ;;  %v6274_v46 = vld [vmem:[#allocation15_spill] sm:$0xff] }
 0x131   : > { %6267 = vst [vmem:[#allocation112_spill] sm:$0xff] %v3830_v53  ;;  %v6275_v53 = vld [vmem:[#allocation16_spill] sm:$0xff] }
 0x132   : > { %6268 = vst [vmem:[#allocation113_spill] sm:$0xff] %v3832_v5 }
 0x135   : > { %759 = vrot.lane.b32.xlu2 %v6269_v2, %s3012_s21  ;;  %v6276_v2 = vld [vmem:[#allocation11_spill] sm:$0xff] }
 0x136   : > { %757 = vrot.lane.b32.xlu1 %v6270_v35, %s3012_s21  ;;  %755 = vrot.lane.b32.xlu0 %v6271_v15, %s3012_s21 }
 0x137   : > { %v3840_v33 = vpop.permute.xlu2 %655 }
 0x138   : > { %v3842_v36 = vpop.permute.xlu1 %635  ;;  %v3844_v16 = vpop.permute.xlu0 %633 }
 0x139   : > { %6272 = vst [vmem:[#allocation114_spill] sm:$0xff] %v3842_v36  ;;  %v6281_v36 = vld [vmem:[#allocation19_spill] sm:$0xff] }
 0x13a   : > { %6273 = vst [vmem:[#allocation115_spill] sm:$0xff] %v3844_v16  ;;  %v6282_v16 = vld [vmem:[#allocation14_spill] sm:$0xff] }
 0x13d   : > { %765 = vrot.lane.b32.xlu2 %v6274_v46, %s3012_s21 }
 0x13e   : > { %763 = vrot.lane.b32.xlu1 %v6275_v53, %s3012_s21  ;;  %761 = vrot.lane.b32.xlu0 %v6276_v2, %s3012_s21 }
 0x13f   : > { %v3852_v5 = vpop.permute.xlu2 %661 }
 0x140   : > { %6277 = vst [vmem:[#allocation116_spill] sm:$0xff] %v3852_v5  ;;  %v3854_v35 = vpop.permute.xlu1 %641  ;;  %v3856_v15 = vpop.permute.xlu0 %639  ;;  %v6288_v5 = vld [vmem:[#allocation17_spill] sm:$0xff] }
 0x141   : > { %6278 = vst [vmem:[#allocation117_spill] sm:$0xff] %v3854_v35  ;;  %v6286_v35 = vld [vmem:[#allocation21_spill] sm:$0xff] }
 0x142   : > { %6279 = vst [vmem:[#allocation118_spill] sm:$0xff] %v3856_v15  ;;  %v6287_v15 = vld [vmem:[#allocation22_spill] sm:$0xff] }
 0x145   : > { %771 = vrot.lane.b32.xlu2 %v6280_v45, %s3012_s21 }
 0x146   : > { %769 = vrot.lane.b32.xlu1 %v6281_v36, %s3012_s21  ;;  %767 = vrot.lane.b32.xlu0 %v6282_v16, %s3012_s21 }
 0x147   : > { %v3864_v46 = vpop.permute.xlu2 %667 }
 0x148   : > { %6283 = vst [vmem:[#allocation19_spill] sm:$0xff] %v3864_v46  ;;  %v3866_v53 = vpop.permute.xlu1 %647  ;;  %v3868_v2 = vpop.permute.xlu0 %645  ;;  %v6292_v46 = vld [vmem:[#allocation24_spill] sm:$0xff] }
 0x149   : > { %6284 = vst [vmem:[#allocation14_spill] sm:$0xff] %v3866_v53  ;;  %v6293_v53 = vld [vmem:[#allocation20_spill] sm:$0xff] }
 0x14a   : > { %6285 = vst [vmem:[#allocation119_spill] sm:$0xff] %v3868_v2 }
 0x14d   : > { %777 = vrot.lane.b32.xlu2 %v6286_v35, %s3012_s21 }
 0x14e   : > { %775 = vrot.lane.b32.xlu1 %v6287_v15, %s3012_s21  ;;  %773 = vrot.lane.b32.xlu0 %v6288_v5, %s3012_s21  ;;  %v3895_v5 = vld [vmem:[%s3052_s17 + $0x190] sm:$0x3] }
 0x14f   : > { %v3876_v29 = vpop.permute.xlu2 %673 }
 0x150   : > { %6289 = vst [vmem:[#allocation120_spill] sm:$0xff] %v3876_v29  ;;  %v3878_v45 = vpop.permute.xlu1 %653  ;;  %v3880_v18 = vpop.permute.xlu0 %651 }
 0x151   : > { %6290 = vst [vmem:[#allocation121_spill] sm:$0xff] %v3878_v45  ;;  %v6297_v45 = vld [vmem:[#allocation27_spill] sm:$0xff] }
 0x152   : > { %6291 = vst [vmem:[#allocation122_spill] sm:$0xff] %v3880_v18  ;;  %v6298_v18 = vld [vmem:[#allocation23_spill] sm:$0xff] }
 0x155   : > { %783 = vrot.lane.b32.xlu2 %v6292_v46, %s3012_s21 }
 0x156   : > { %781 = vrot.lane.b32.xlu1 %v3370_v58, %s3012_s21  ;;  %779 = vrot.lane.b32.xlu0 %v6293_v53, %s3012_s21  ;;  %v727_v53 = vrot.slane %v3769_v62, 1 }
 0x157   : > { %v3888_v2 = vpop.permute.xlu2 %679 }
 0x158   : > { %6294 = vst [vmem:[#allocation24_spill] sm:$0xff] %v3888_v2  ;;  %v3890_v35 = vpop.permute.xlu1 %659  ;;  %v3892_v15 = vpop.permute.xlu0 %657  ;;  %v729_v2 = vrot.slane %v3895_v5, 1 }
 0x159   : > { %6295 = vst [vmem:[#allocation123_spill] sm:$0xff] %v3890_v35  ;;  %v726_v35 = vrot.slane %v3772_v3, 1 }
 0x15a   : > { %6296 = vst [vmem:[#allocation124_spill] sm:$0xff] %v3892_v15 }
 0x15d   : > { %789 = vrot.lane.b32.xlu2 %v3394_v60, %s3012_s21  ;;  %v3913_v60 = vsel %vm273_vm0, %v727_v53, %v729_v2 }
 0x15e   : > { %787 = vrot.lane.b32.xlu1 %v6297_v45, %s3012_s21  ;;  %785 = vrot.lane.b32.xlu0 %v6298_v18, %s3012_s21  ;;  %6302 = vst [vmem:[#allocation127_spill] sm:$0xff] %v3913_v60  ;;  %v3916_v45 = vsel %vm273_vm0, %v726_v35, %v727_v53  ;;  %v6307_v35 = vld [vmem:[#allocation28_spill] sm:$0xff] }
 0x15f   : > { %v3903_v58 = vpop.permute.xlu2 %685  ;;  %6303 = vst [vmem:[#allocation128_spill] sm:$0xff] %v3916_v45 }
 0x160   : > { %6299 = vst [vmem:[#allocation23_spill] sm:$0xff] %v3903_v58  ;;  %v3908_v15 = vpop.permute.xlu1 %665  ;;  %v3910_v29 = vpop.permute.xlu0 %663 }
 0x161   : > { %6300 = vst [vmem:[#allocation125_spill] sm:$0xff] %v3908_v15 }
 0x162   : > { %6301 = vst [vmem:[#allocation126_spill] sm:$0xff] %v3910_v29 }
 0x165   : > { %832 = vrot.lane.b32.xlu2 %v3412_v10, %s3013_s22 }
 0x166   : > { %793 = vrot.lane.b32.xlu1 %v3913_v60, %s3012_s21  ;;  %791 = vrot.lane.b32.xlu0 %v3916_v45, %s3012_s21  ;;  %v6311_v60 = vld [vmem:[#allocation34_spill] sm:$0xff] }
 0x167   : > { %v3924_v58 = vpop.permute.xlu2 %691  ;;  %v6312_v45 = vld [vmem:[#allocation30_spill] sm:$0xff] }
 0x168   : > { %6304 = vst [vmem:[#allocation129_spill] sm:$0xff] %v3924_v58  ;;  %v3926_v15 = vpop.permute.xlu1 %671  ;;  %v3928_v29 = vpop.permute.xlu0 %669 }
 0x169   : > { %6305 = vst [vmem:[#allocation130_spill] sm:$0xff] %v3926_v15 }
 0x16a   : > { %6306 = vst [vmem:[#allocation131_spill] sm:$0xff] %v3928_v29 }
 0x16d   : > { %838 = vrot.lane.b32.xlu2 %v3431_v9, %s3013_s22 }
 0x16e   : > { %836 = vrot.lane.b32.xlu1 %v3434_v47, %s3013_s22  ;;  %834 = vrot.lane.b32.xlu0 %v6307_v35, %s3013_s22 }
 0x16f   : > { %v3936_v10 = vpop.permute.xlu2 %735 }
 0x170   : > { %6308 = vst [vmem:[#allocation28_spill] sm:$0xff] %v3936_v10  ;;  %v3938_v2 = vpop.permute.xlu1 %677  ;;  %v3940_v53 = vpop.permute.xlu0 %675  ;;  %v6316_v10 = vld [vmem:[#allocation37_spill] sm:$0xff] }
 0x171   : > { %6309 = vst [vmem:[#allocation132_spill] sm:$0xff] %v3938_v2  ;;  %v6317_v2 = vld [vmem:[#allocation38_spill] sm:$0xff] }
 0x172   : > { %6310 = vst [vmem:[#allocation133_spill] sm:$0xff] %v3940_v53 }
 0x175   : > { %844 = vrot.lane.b32.xlu2 %v3452_v44, %s3013_s22  ;;  %v6318_v44 = vld [vmem:[#allocation32_spill] sm:$0xff] }
 0x176   : > { %842 = vrot.lane.b32.xlu1 %v6311_v60, %s3013_s22  ;;  %840 = vrot.lane.b32.xlu0 %v6312_v45, %s3013_s22 }
 0x177   : > { %v3948_v29 = vpop.permute.xlu2 %741 }
 0x178   : > { %6313 = vst [vmem:[#allocation30_spill] sm:$0xff] %v3948_v29  ;;  %v3950_v15 = vpop.permute.xlu1 %683  ;;  %v3952_v35 = vpop.permute.xlu0 %681  ;;  %v6322_v29 = vld [vmem:[#allocation36_spill] sm:$0xff] }
 0x179   : > { %6314 = vst [vmem:[#allocation134_spill] sm:$0xff] %v3950_v15 }
 0x17a   : > { %6315 = vst [vmem:[#allocation135_spill] sm:$0xff] %v3952_v35 }
 0x17d   : > { %850 = vrot.lane.b32.xlu2 %v6316_v10, %s3013_s22 }
 0x17e   : > { %848 = vrot.lane.b32.xlu1 %v6317_v2, %s3013_s22  ;;  %846 = vrot.lane.b32.xlu0 %v6318_v44, %s3013_s22  ;;  %v6327_v44 = vld [vmem:[#allocation42_spill] sm:$0xff] }
 0x17f   : > { %v3960_v53 = vpop.permute.xlu2 %747 }
 0x180   : > { %6319 = vst [vmem:[#allocation136_spill] sm:$0xff] %v3960_v53  ;;  %v3962_v60 = vpop.permute.xlu1 %689  ;;  %v3964_v58 = vpop.permute.xlu0 %687  ;;  %v6326_v53 = vld [vmem:[#allocation48_spill] sm:$0xff] }
 0x181   : > { %6320 = vst [vmem:[#allocation137_spill] sm:$0xff] %v3962_v60 }
 0x182   : > { %6321 = vst [vmem:[#allocation138_spill] sm:$0xff] %v3964_v58 }
 0x185   : > { %856 = vrot.lane.b32.xlu2 %v3499_v59, %s3013_s22 }
 0x186   : > { %854 = vrot.lane.b32.xlu1 %v3502_v4, %s3013_s22  ;;  %852 = vrot.lane.b32.xlu0 %v6322_v29, %s3013_s22 }
 0x187   : > { %v3972_v10 = vpop.permute.xlu2 %753 }
 0x188   : > { %6323 = vst [vmem:[#allocation36_spill] sm:$0xff] %v3972_v10  ;;  %v3974_v35 = vpop.permute.xlu1 %733  ;;  %v3976_v2 = vpop.permute.xlu0 %731  ;;  %v6330_v10 = vld [vmem:[#allocation46_spill] sm:$0xff] }
 0x189   : > { %6324 = vst [vmem:[#allocation139_spill] sm:$0xff] %v3974_v35 }
 0x18a   : > { %6325 = vst [vmem:[#allocation140_spill] sm:$0xff] %v3976_v2 }
 0x18d   : > { %862 = vrot.lane.b32.xlu2 %v3525_v32, %s3013_s22 }
 0x18e   : > { %860 = vrot.lane.b32.xlu1 %v6326_v53, %s3013_s22  ;;  %858 = vrot.lane.b32.xlu0 %v6327_v44, %s3013_s22 }
 0x18f   : > { %v3984_v58 = vpop.permute.xlu2 %759 }
 0x190   : > { %v3986_v60 = vpop.permute.xlu1 %739  ;;  %v3988_v15 = vpop.permute.xlu0 %737 }
 0x191   : > { %6328 = vst [vmem:[#allocation141_spill] sm:$0xff] %v3986_v60  ;;  %v6334_v60 = vld [vmem:[#allocation58_spill] sm:$0xff] }
 0x192   : > { %6329 = vst [vmem:[#allocation142_spill] sm:$0xff] %v3988_v15  ;;  %v6335_v15 = vld [vmem:[#allocation52_spill] sm:$0xff] }
 0x195   : > { %868 = vrot.lane.b32.xlu2 %v3550_v7, %s3013_s22 }
 0x196   : > { %866 = vrot.lane.b32.xlu1 %v3553_v8, %s3013_s22  ;;  %864 = vrot.lane.b32.xlu0 %v6330_v10, %s3013_s22 }
 0x197   : > { %v3996_v35 = vpop.permute.xlu2 %765 }
 0x198   : > { %6331 = vst [vmem:[#allocation143_spill] sm:$0xff] %v3996_v35  ;;  %v3998_v2 = vpop.permute.xlu1 %745  ;;  %v4000_v32 = vpop.permute.xlu0 %743 }
 0x199   : > { %6332 = vst [vmem:[#allocation144_spill] sm:$0xff] %v3998_v2  ;;  %v6339_v2 = vld [vmem:[#allocation57_spill] sm:$0xff] }
 0x19a   : > { %6333 = vst [vmem:[#allocation145_spill] sm:$0xff] %v4000_v32 }
 0x19d   : > { %874 = vrot.lane.b32.xlu2 %v3576_v12, %s3013_s22 }
 0x19e   : > { %872 = vrot.lane.b32.xlu1 %v6334_v60, %s3013_s22  ;;  %870 = vrot.lane.b32.xlu0 %v6335_v15, %s3013_s22 }
 0x19f   : > { %v4008_v53 = vpop.permute.xlu2 %771 }
 0x1a0   : > { %6336 = vst [vmem:[#allocation58_spill] sm:$0xff] %v4008_v53  ;;  %v4010_v8 = vpop.permute.xlu1 %751  ;;  %v4012_v10 = vpop.permute.xlu0 %749 }
 0x1a1   : > { %6337 = vst [vmem:[#allocation52_spill] sm:$0xff] %v4010_v8  ;;  %v827_v8 = vrot.slane %v3772_v3, 2 }
 0x1a2   : > { %6338 = vst [vmem:[#allocation146_spill] sm:$0xff] %v4012_v10  ;;  %v828_v10 = vrot.slane %v3769_v62, 2 }
 0x1a5   : > { %880 = vrot.lane.b32.xlu2 %v3601_v14, %s3013_s22  ;;  %v6342_v14 = vld [vmem:[#allocation62_spill] sm:$0xff] }
 0x1a6   : > { %878 = vrot.lane.b32.xlu1 %v3604_v27, %s3013_s22  ;;  %876 = vrot.lane.b32.xlu0 %v6339_v2, %s3013_s22 }
 0x1a7   : > { %v4020_v32 = vpop.permute.xlu2 %777 }
 0x1a8   : > { %6340 = vst [vmem:[#allocation147_spill] sm:$0xff] %v4020_v32  ;;  %v4022_v35 = vpop.permute.xlu1 %757  ;;  %v4024_v44 = vpop.permute.xlu0 %755 }
 0x1a9   : > { %6341 = vst [vmem:[#allocation148_spill] sm:$0xff] %v4024_v44  ;;  %v4041_v44 = vsel %vm450_vm1, %v827_v8, %v828_v10 }
 0x1aa   : > { %6345 = vst [vmem:[#allocation151_spill] sm:$0xff] %v4041_v44 }
 0x1ad   : > { %886 = vrot.lane.b32.xlu2 %v3627_v40, %s3013_s22 }
 0x1ae   : > { %884 = vrot.lane.b32.xlu1 %v3630_v51, %s3013_s22  ;;  %882 = vrot.lane.b32.xlu0 %v6342_v14, %s3013_s22 }
 0x1af   : > { %v4034_v27 = vpop.permute.xlu2 %783 }
 0x1b0   : > { %6343 = vst [vmem:[#allocation149_spill] sm:$0xff] %v4034_v27  ;;  %v4036_v32 = vpop.permute.xlu1 %763  ;;  %v4038_v2 = vpop.permute.xlu0 %761  ;;  %v830_v27 = vrot.slane %v3895_v5, 2 }
 0x1b1   : > { %6344 = vst [vmem:[#allocation150_spill] sm:$0xff] %v4036_v32 }
 0x1b2   : > { %v4057_v8 = vsel %vm450_vm1, %v828_v10, %v830_v27 }
 0x1b5   : > { %892 = vrot.lane.b32.xlu2 %v4041_v44, %s3013_s22 }
 0x1b6   : > { %890 = vrot.lane.b32.xlu1 %v3646_v55, %s3013_s22  ;;  %888 = vrot.lane.b32.xlu0 %v3624_v38, %s3013_s22 }
 0x1b7   : > { %v4049_v53 = vpop.permute.xlu2 %789 }
 0x1b8   : > { %6346 = vst [vmem:[#allocation152_spill] sm:$0xff] %v4049_v53  ;;  %v4052_v14 = vpop.permute.xlu1 %769  ;;  %v4054_v32 = vpop.permute.xlu0 %767 }
 0x1bd   : > { %932 = vrot.lane.b32.xlu2 %v3058_v1, %s3014_s23 }
 0x1be   : > { %930 = vrot.lane.b32.xlu1 %v3055_v0, %s3014_s23  ;;  %894 = vrot.lane.b32.xlu0 %v4057_v8, %s3013_s22 }
 0x1bf   : > { %v4065_v53 = vpop.permute.xlu2 %832 }
 0x1c0   : > { %v4067_v5 = vpop.permute.xlu1 %775  ;;  %v4069_v44 = vpop.permute.xlu0 %773 }
 0x1c5   : > { %938 = vrot.lane.b32.xlu2 %v3110_v24, %s3014_s23 }
 0x1c6   : > { %936 = vrot.lane.b32.xlu1 %v3116_v26, %s3014_s23  ;;  %934 = vrot.lane.b32.xlu0 %v3122_v28, %s3014_s23 }
 0x1c7   : > { %v4077_v1 = vpop.permute.xlu2 %838 }
 0x1c8   : > { %v4079_v0 = vpop.permute.xlu1 %781  ;;  %v4081_v27 = vpop.permute.xlu0 %779 }
 0x1cd   : > { %944 = vrot.lane.b32.xlu2 %v3144_v37, %s3014_s23 }
 0x1ce   : > { %942 = vrot.lane.b32.xlu1 %v3150_v39, %s3014_s23  ;;  %940 = vrot.lane.b32.xlu0 %v3113_v25, %s3014_s23 }
 0x1cf   : > { %v4089_v24 = vpop.permute.xlu2 %844 }
 0x1d0   : > { %6347 = vst [vmem:[#allocation153_spill] sm:$0xff] %v4089_v24  ;;  %v4091_v26 = vpop.permute.xlu1 %787  ;;  %v4093_v28 = vpop.permute.xlu0 %785 }
 0x1d5   : > { %950 = vrot.lane.b32.xlu2 %v3175_v48, %s3014_s23 }
 0x1d6   : > { %948 = vrot.lane.b32.xlu1 %v3181_v50, %s3014_s23  ;;  %946 = vrot.lane.b32.xlu0 %v3187_v52, %s3014_s23 }
 0x1d7   : > { %v4101_v37 = vpop.permute.xlu2 %850 }
 0x1d8   : > { %v4103_v39 = vpop.permute.xlu1 %793  ;;  %v4105_v25 = vpop.permute.xlu0 %791 }
 0x1dd   : > { %956 = vrot.lane.b32.xlu2 %v3210_v61, %s3014_s23 }
 0x1de   : > { %954 = vrot.lane.b32.xlu1 %v3216_v63, %s3014_s23  ;;  %952 = vrot.lane.b32.xlu0 %v3178_v49, %s3014_s23 }
 0x1df   : > { %v4113_v48 = vpop.permute.xlu2 %856 }
 0x1e0   : > { %6348 = vst [vmem:[#allocation154_spill] sm:$0xff] %v4113_v48  ;;  %v4115_v50 = vpop.permute.xlu1 %836  ;;  %v4117_v52 = vpop.permute.xlu0 %834  ;;  %v6354_v48 = vld [vmem:[#allocation60_spill] sm:$0xff] }
 0x1e5   : > { %962 = vrot.lane.b32.xlu2 %v3241_v19, %s3014_s23 }
 0x1e6   : > { %960 = vrot.lane.b32.xlu1 %v3247_v23, %s3014_s23  ;;  %958 = vrot.lane.b32.xlu0 %v3253_v30, %s3014_s23 }
 0x1e7   : > { %v4125_v61 = vpop.permute.xlu2 %862 }
 0x1e8   : > { %v4127_v63 = vpop.permute.xlu1 %842  ;;  %v4129_v49 = vpop.permute.xlu0 %840 }
 0x1e9   : > { %6349 = vst [vmem:[#allocation155_spill] sm:$0xff] %v4127_v63 }
 0x1ea   : > { %6350 = vst [vmem:[#allocation156_spill] sm:$0xff] %v4129_v49  ;;  %v6355_v49 = vld [vmem:[#allocation9_spill] sm:$0xff] }
 0x1ed   : > { %968 = vrot.lane.b32.xlu2 %v3276_v54, %s3014_s23 }
 0x1ee   : > { %966 = vrot.lane.b32.xlu1 %v3282_v56, %s3014_s23  ;;  %964 = vrot.lane.b32.xlu0 %v3244_v20, %s3014_s23 }
 0x1ef   : > { %v4137_v19 = vpop.permute.xlu2 %868 }
 0x1f0   : > { %v4139_v23 = vpop.permute.xlu1 %848  ;;  %v4141_v30 = vpop.permute.xlu0 %846 }
 0x1f1   : > { %6351 = vst [vmem:[#allocation157_spill] sm:$0xff] %v4141_v30  ;;  %v4181_v30 = vld [vmem:[%s3052_s17 + $0x198] sm:$0xff] }
 0x1f5   : > { %974 = vrot.lane.b32.xlu2 %v3307_v42, %s3014_s23 }
 0x1f6   : > { %972 = vrot.lane.b32.xlu1 %v3313_v11, %s3014_s23  ;;  %970 = vrot.lane.b32.xlu0 %v3319_v6, %s3014_s23 }
 0x1f7   : > { %v4149_v54 = vpop.permute.xlu2 %874 }
 0x1f8   : > { %v4151_v20 = vpop.permute.xlu1 %854  ;;  %v4153_v56 = vpop.permute.xlu0 %852 }
 0x1fd   : > { %980 = vrot.lane.b32.xlu2 %v3342_v41, %s3014_s23 }
 0x1fe   : > { %978 = vrot.lane.b32.xlu1 %v3348_v17, %s3014_s23  ;;  %976 = vrot.lane.b32.xlu0 %v3310_v43, %s3014_s23  ;;  %v4178_v43 = vld [vmem:[%s3052_s17 + $0x1a0] sm:$0xff] }
 0x1ff   : > { %v4161_v11 = vpop.permute.xlu2 %880 }
 0x200   : > { %v4163_v42 = vpop.permute.xlu1 %860  ;;  %v859_v6 = vpop.permute.xlu0 %858 }
 0x205   : > { %986 = vrot.lane.b32.xlu2 %v3772_v3, %s3014_s23 }
 0x206   : > { %984 = vrot.lane.b32.xlu1 %v3373_v31, %s3014_s23  ;;  %982 = vrot.lane.b32.xlu0 %v3379_v34, %s3014_s23 }
 0x207   : > { %v4171_v41 = vpop.permute.xlu2 %886 }
 0x208   : > { %v4173_v17 = vpop.permute.xlu1 %866  ;;  %v4175_v10 = vpop.permute.xlu0 %864 }
 0x20d   : > { %992 = vrot.lane.b32.xlu2 %v4178_v43, %s3014_s23 }
 0x20e   : > { %990 = vrot.lane.b32.xlu1 %v4181_v30, %s3014_s23  ;;  %988 = vrot.lane.b32.xlu0 %v3769_v62, %s3014_s23 }
 0x20f   : > { %v4189_v34 = vpop.permute.xlu2 %892 }
 0x210   : > { %v4191_v31 = vpop.permute.xlu1 %872  ;;  %v871_v3 = vpop.permute.xlu0 %870 }
 0x215   : > { %1064 = vrot.lane.b32.xlu2 %v6282_v16, %s3015_s24 }
 0x216   : > { %1034 = vrot.lane.b32.xlu1 %v3103_v21, %s3015_s24  ;;  %1032 = vrot.lane.b32.xlu0 %v3082_v13, %s3015_s24 }
 0x217   : > { %v4199_v24 = vpop.permute.xlu2 %932 }
 0x218   : > { %v4201_v63 = vpop.permute.xlu1 %878  ;;  %v4203_v62 = vpop.permute.xlu0 %876 }
 0x21d   : > { %1181 = vrot.lane.b32.xlu2 %v3630_v51, %s3016_s25 }
 0x21e   : > { %1165 = vrot.lane.b32.xlu1 %v3550_v7, %s3016_s25  ;;  %1080 = vrot.lane.b32.xlu0 %v6292_v46, %s3015_s24 }
 0x21f   : > { %v4211_v21 = vpop.permute.xlu2 %938 }
 0x220   : > { %6352 = vst [vmem:[#allocation158_spill] sm:$0xff] %v4211_v21  ;;  %v4213_v13 = vpop.permute.xlu1 %884  ;;  %v4215_v16 = vpop.permute.xlu0 %882 }
 0x225   : > { %1149 = vrot.lane.b32.xlu2 %v6322_v29, %s3016_s25 }
 0x226   : > { %1133 = vrot.lane.b32.xlu1 %v3434_v47, %s3016_s25  ;;  %1048 = vrot.lane.b32.xlu0 %v6264_v22, %s3015_s24 }
 0x227   : > { %v4223_v7 = vpop.permute.xlu2 %944 }
 0x228   : > { %6353 = vst [vmem:[#allocation159_spill] sm:$0xff] %v4223_v7  ;;  %v4225_v51 = vpop.permute.xlu1 %890  ;;  %v4227_v46 = vpop.permute.xlu0 %888  ;;  %v2969_v7 = vld [vmem:[%s3052_s17 + $0x98] sm:$0xff] }
 0x229   : > { %v1243_v21 = vsel %vm1229_vm2, %v2969_v7, %v6354_v48  ;;  %v6358_v7 = vld [vmem:[#allocation18_spill] sm:$0xff] }
 0x22d   : > { %1167 = vrot.lane.b32.xlu2 %v6335_v15, %s3016_s25  ;;  %v1276_v15 = vsel %vm1262_vm3, %v1243_v21, %v3754_v57 }
 0x22e   : > { %1082 = vrot.lane.b32.xlu1 %v6298_v18, %s3015_s24  ;;  %1066 = vrot.lane.b32.xlu0 %v6281_v36, %s3015_s24  ;;  %v1309_v18 = vsel %vm1295_vm4, %v1276_v15, %v3840_v33  ;;  %v2970_v15 = vld [vmem:[%s3052_s17 + $0xe0] sm:$0xff] }
 0x22f   : > { %v4235_v29 = vpop.permute.xlu2 %950  ;;  %v1342_v36 = vsel %vm1328_vm5, %v1309_v18, %v4022_v35  ;;  %v6357_v35 = vld [vmem:[#allocation27_spill] sm:$0xff]  ;;  %v6360_v18 = vld [vmem:[#allocation69_spill] sm:$0xff] }
 0x230   : > { %v4237_v47 = vpop.permute.xlu1 %930  ;;  %v4239_v22 = vpop.permute.xlu0 %894  ;;  %v1375_v57 = vsel %vm1361_vm6, %v1342_v36, %v859_v6  ;;  %v1249_v36 = vsel %vm1229_vm2, %v2970_v15, %v6360_v18 }
 0x235   : > { %1135 = vrot.lane.b32.xlu2 %v3431_v9, %s3016_s25 }
 0x236   : > { %1050 = vrot.lane.b32.xlu1 %v6355_v49, %s3015_s24  ;;  %1183 = vrot.lane.b32.xlu0 %v3627_v40, %s3016_s25 }
 0x237   : > { %v957_v48 = vpop.permute.xlu2 %956 }
 0x238   : > { %v4257_v33 = vpop.permute.xlu1 %936  ;;  %v4260_v21 = vsel %vm1394_vm7, %v1375_v57, %v957_v48  ;;  %v4262_v9 = vpop.permute.xlu0 %934  ;;  %v6361_v57 = vld [vmem:[#allocation102_spill] sm:$0xff] }
 0x239   : > { %6356 = vst [vmem:[#allocation60_spill] sm:$0xff] %v4260_v21  ;;  %v1282_v48 = vsel %vm1262_vm3, %v1249_v36, %v6361_v57  ;;  %v6363_v21 = vld [vmem:[#allocation4_spill] sm:$0xff] }
 0x23d   : > { %1084 = vrot.lane.b32.xlu2 %v6357_v35, %s3015_s24  ;;  %v6362_v35 = vld [vmem:[#allocation19_spill] sm:$0xff] }
 0x23e   : > { %1068 = vrot.lane.b32.xlu1 %v6358_v7, %s3015_s24  ;;  %1151 = vrot.lane.b32.xlu0 %v3502_v4, %s3016_s25  ;;  %v1315_v7 = vsel %vm1295_vm4, %v1282_v48, %v6362_v35 }
 0x23f   : > { %v4270_v40 = vpop.permute.xlu2 %962  ;;  %v1348_v4 = vsel %vm1328_vm5, %v1315_v7, %v4052_v14  ;;  %v6364_v14 = vld [vmem:[#allocation72_spill] sm:$0xff] }
 0x240   : > { %v4272_v49 = vpop.permute.xlu1 %942  ;;  %v4274_v6 = vpop.permute.xlu0 %940  ;;  %v1381_v15 = vsel %vm1361_vm6, %v1348_v4, %v871_v3  ;;  %v6367_v4 = vld [vmem:[#allocation8_spill] sm:$0xff] }
 0x241   : > { %6359 = vst [vmem:[#allocation9_spill] sm:$0xff] %v4272_v49 }
 0x245   : > { %1036 = vrot.lane.b32.xlu2 %v6363_v21, %s3015_s24  ;;  %v2971_v21 = vld [vmem:[%s3052_s17 + $0x108] sm:$0xff] }
 0x246   : > { %1185 = vrot.lane.b32.xlu1 %v3624_v38, %s3016_s25  ;;  %1169 = vrot.lane.b32.xlu0 %v6334_v60, %s3016_s25  ;;  %v1252_v48 = vsel %vm1229_vm2, %v2971_v21, %v6364_v14  ;;  %v6365_v38 = vld [vmem:[#allocation105_spill] sm:$0xff]  ;;  %v6366_v60 = vld [vmem:[#allocation120_spill] sm:$0xff] }
 0x247   : > { %v969_v18 = vpop.permute.xlu2 %968  ;;  %v1285_v35 = vsel %vm1262_vm3, %v1252_v48, %v6365_v38  ;;  %v6369_v38 = vld [vmem:[#allocation43_spill] sm:$0xff] }
 0x248   : > { %v4292_v49 = vpop.permute.xlu1 %948  ;;  %v4295_v36 = vsel %vm1394_vm7, %v1381_v15, %v969_v18  ;;  %v4297_v57 = vpop.permute.xlu0 %946  ;;  %v1318_v3 = vsel %vm1295_vm4, %v1285_v35, %v6366_v60  ;;  %v2973_v35 = vld [vmem:[%s3052_s17 + $0xb0] sm:$0xff] }
 0x249   : > { %v1351_v7 = vsel %vm1328_vm5, %v1318_v3, %v4067_v5  ;;  %v6371_v3 = vld [vmem:[#allocation86_spill] sm:$0xff] }
 0x24a   : > { %v1384_v15 = vsel %vm1361_vm6, %v1351_v7, %v4203_v62  ;;  %v6372_v62 = vld [vmem:[#allocation96_spill] sm:$0xff] }
 0x24d   : > { %1153 = vrot.lane.b32.xlu2 %v3499_v59, %s3016_s25  ;;  %v2972_v59 = vld [vmem:[%s3052_s17 + $0xa8] sm:$0xff] }
 0x24e   : > { %1137 = vrot.lane.b32.xlu1 %v6312_v45, %s3016_s25  ;;  %1052 = vrot.lane.b32.xlu0 %v6367_v4, %s3015_s24  ;;  %v1244_v5 = vsel %vm1229_vm2, %v2972_v59, %v6369_v38  ;;  %v6370_v45 = vld [vmem:[#allocation67_spill] sm:$0xff]  ;;  %v6375_v38 = vld [vmem:[#allocation26_spill] sm:$0xff] }
 0x24f   : > { %v975_v18 = vpop.permute.xlu2 %974  ;;  %v1245_v60 = vsel %vm1229_vm2, %v2973_v35, %v6370_v45  ;;  %v1277_v7 = vsel %vm1262_vm3, %v1244_v5, %v6372_v62  ;;  %v6376_v35 = vld [vmem:[#allocation17_spill] sm:$0xff] }
 0x250   : > { %v4316_v21 = vpop.permute.xlu1 %954  ;;  %v4319_v14 = vsel %vm1394_vm7, %v1384_v15, %v975_v18  ;;  %v4321_v48 = vpop.permute.xlu0 %952  ;;  %v1278_v4 = vsel %vm1262_vm3, %v1245_v60, %v6371_v3  ;;  %v6373_v15 = vld [vmem:[#allocation123_spill] sm:$0xff] }
 0x251   : > { %6368 = vst [vmem:[#allocation27_spill] sm:$0xff] %v4319_v14  ;;  %v1311_v18 = vsel %vm1295_vm4, %v1278_v4, %v6373_v15  ;;  %v6374_v14 = vld [vmem:[#allocation124_spill] sm:$0xff]  ;;  %v6378_v15 = vld [vmem:[#allocation78_spill] sm:$0xff] }
 0x252   : > { %v1310_v59 = vsel %vm1295_vm4, %v1277_v7, %v6374_v14  ;;  %v1344_v5 = vsel %vm1328_vm5, %v1311_v18, %v4038_v2  ;;  %v2975_v18 = vld [vmem:[%s3052_s17 + $0xd8] sm:$0xff] }
 0x253   : > { %v1343_v45 = vsel %vm1328_vm5, %v1310_v59, %v3984_v58  ;;  %v1377_v60 = vsel %vm1361_vm6, %v1344_v5, %v4125_v61  ;;  %v2974_v58 = vld [vmem:[%s3052_s17 + $0x150] sm:$0xff]  ;;  %v6379_v59 = vld [vmem:[#allocation70_spill] sm:$0xff]  ;;  %v6380_v61 = vld [vmem:[#allocation111_spill] sm:$0xff] }
 0x254   : > { %v1376_v14 = vsel %vm1361_vm6, %v1343_v45, %v4163_v42  ;;  %v1258_v2 = vsel %vm1229_vm2, %v2974_v58, %v6378_v15  ;;  %v6381_v42 = vld [vmem:[#allocation89_spill] sm:$0xff]  ;;  %v6382_v5 = vld [vmem:[#allocation23_spill] sm:$0xff] }
 0x255   : > { %1171 = vrot.lane.b32.xlu2 %v3576_v12, %s3016_s25  ;;  %v6385_v15 = vld [vmem:[#allocation3_spill] sm:$0xff] }
 0x256   : > { %1086 = vrot.lane.b32.xlu1 %v6375_v38, %s3015_s24  ;;  %1070 = vrot.lane.b32.xlu0 %v6376_v35, %s3015_s24  ;;  %v1248_v38 = vsel %vm1229_vm2, %v2975_v18, %v6379_v59  ;;  %v1291_v35 = vsel %vm1262_vm3, %v1258_v2, %v6380_v61 }
 0x257   : > { %v4347_v12 = vpop.permute.xlu2 %980  ;;  %v1281_v45 = vsel %vm1262_vm3, %v1248_v38, %v6381_v42 }
 0x258   : > { %v961_v3 = vpop.permute.xlu1 %960  ;;  %v959_v4 = vpop.permute.xlu0 %958 }
 0x259   : > { %v4354_v62 = vsel %vm1394_vm7, %v1377_v60, %v961_v3  ;;  %v4357_v7 = vsel %vm1394_vm7, %v1376_v14, %v959_v4  ;;  %v1324_v60 = vsel %vm1295_vm4, %v1291_v35, %v6382_v5  ;;  %v6383_v14 = vld [vmem:[#allocation13_spill] sm:$0xff]  ;;  %v2977_v5 = vld [vmem:[%s3052_s17 + $0xf0] sm:$0xff] }
 0x25a   : > { %6377 = vst [vmem:[#allocation18_spill] sm:$0xff] %v4354_v62  ;;  %v6384_v3 = vld [vmem:[#allocation125_spill] sm:$0xff]  ;;  %v1357_v58 = vsel %vm1328_vm5, %v1324_v60, %v4091_v26  ;;  %v6387_v60 = vld [vmem:[#allocation54_spill] sm:$0xff] }
 0x25b   : > { %v1314_v4 = vsel %vm1295_vm4, %v1281_v45, %v6384_v3  ;;  %v1390_v18 = vsel %vm1361_vm6, %v1357_v58, %v4227_v46  ;;  %v6386_v45 = vld [vmem:[#allocation81_spill] sm:$0xff]  ;;  %v1250_v46 = vsel %vm1229_vm2, %v2977_v5, %v6387_v60  ;;  %v6395_v60 = vld [vmem:[#allocation131_spill] sm:$0xff] }
 0x25c   : > { %v1347_v2 = vsel %vm1328_vm5, %v1314_v4, %v4054_v32  ;;  %v6388_v3 = vld [vmem:[#allocation73_spill] sm:$0xff] }
 0x25d   : > { %1054 = vrot.lane.b32.xlu2 %v6383_v14, %s3015_s24  ;;  %v1380_v38 = vsel %vm1361_vm6, %v1347_v2, %v4137_v19  ;;  %v2978_v14 = vld [vmem:[%s3052_s17 + $0xf8] sm:$0xff] }
 0x25e   : > { %1038 = vrot.lane.b32.xlu1 %v6385_v15, %s3015_s24  ;;  %1187 = vrot.lane.b32.xlu0 %v3646_v55, %s3016_s25  ;;  %v2976_v55 = vld [vmem:[%s3052_s17 + $0x170] sm:$0xff]  ;;  %v1251_v19 = vsel %vm1229_vm2, %v2978_v14, %v6388_v3  ;;  %v6389_v4 = vld [vmem:[#allocation113_spill] sm:$0xff]  ;;  %v6396_v3 = vld [vmem:[#allocation42_spill] sm:$0xff] }
 0x25f   : > { %v987_v59 = vpop.permute.xlu2 %986  ;;  %v1261_v32 = vsel %vm1229_vm2, %v2976_v55, %v6386_v45  ;;  %v6390_v15 = vld [vmem:[#allocation92_spill] sm:$0xff]  ;;  %v6393_v55 = vld [vmem:[#allocation22_spill] sm:$0xff] }
 0x260   : > { %v967_v61 = vpop.permute.xlu1 %966  ;;  %v4388_v35 = vsel %vm1394_vm7, %v1390_v18, %v987_v59  ;;  %v4390_v26 = vpop.permute.xlu0 %964  ;;  %v1294_v58 = vsel %vm1262_vm3, %v1261_v32, %v6389_v4  ;;  %v1284_v2 = vsel %vm1262_vm3, %v1251_v19, %v6390_v15  ;;  %v6391_v18 = vld [vmem:[#allocation101_spill] sm:$0xff]  ;;  %v6394_v45 = vld [vmem:[#allocation130_spill] sm:$0xff] }
 0x261   : > { %v4393_v42 = vsel %vm1394_vm7, %v1380_v38, %v967_v61  ;;  %v1283_v59 = vsel %vm1262_vm3, %v1250_v46, %v6391_v18  ;;  %v6392_v38 = vld [vmem:[#allocation129_spill] sm:$0xff]  ;;  %v1317_v5 = vsel %vm1295_vm4, %v1284_v2, %v6394_v45  ;;  %v6397_v46 = vld [vmem:[#allocation34_spill] sm:$0xff]  ;;  %v2979_v45 = vld [vmem:[%s3052_s17 + $0x110] sm:$0xff] }
 0x262   : > { %v1327_v61 = vsel %vm1295_vm4, %v1294_v58, %v6392_v38  ;;  %v1316_v14 = vsel %vm1295_vm4, %v1283_v59, %v6395_v60  ;;  %v6398_v19 = vld [vmem:[#allocation58_spill] sm:$0xff]  ;;  %v1350_v58 = vsel %vm1328_vm5, %v1317_v5, %v4069_v44  ;;  %v6400_v5 = vld [vmem:[#allocation59_spill] sm:$0xff] }
 0x263   : > { %v1360_v32 = vsel %vm1328_vm5, %v1327_v61, %v4103_v39  ;;  %v1349_v4 = vsel %vm1328_vm5, %v1316_v14, %v6398_v19  ;;  %v1383_v18 = vsel %vm1361_vm6, %v1350_v58, %v4149_v54  ;;  %v1497_v44 = vld [vmem:[%s6064_s1 + $0x20] sm:$0xf]  ;;  %v1496_v54 = vld [vmem:[%s6064_s1 + $0x18] sm:$0xff]  ;;  %v1253_v60 = vsel %vm1229_vm2, %v2979_v45, %v6400_v5  ;;  %v6401_v14 = vld [vmem:[#allocation104_spill] sm:$0xff] }
 0x264   : > { %v1393_v15 = vsel %vm1361_vm6, %v1360_v32, %v4239_v22  ;;  %v1382_v39 = vsel %vm1361_vm6, %v1349_v4, %v4191_v31  ;;  %2744 = vmatpush.msk.msra.mxu2 %vm1599_vm8, %v1497_v44  ;;  %2745 = vmatpush.msk.msra.mxu3 %vm1599_vm8, %v1497_v44  ;;  %v1495_v31 = vld [vmem:[%s6064_s1 + $0x10] sm:$0xff]  ;;  %v1286_v32 = vsel %vm1262_vm3, %v1253_v60, %v6401_v14  ;;  %v6404_v4 = vld [vmem:[#allocation57_spill] sm:$0xff]  ;;  %v1493_v5 = vld [vmem:[%s6064_s1] sm:$0xff] }
 0x265   : > { %1072 = vrot.lane.b32.xlu2 %v6393_v55, %s3015_s24  ;;  %2707 = vmatpush.msk.msra.mxu0 %vm1599_vm8, %v1497_v44  ;;  %v6405_v58 = vld [vmem:[#allocation128_spill] sm:$0xff]  ;;  %v2980_v14 = vld [vmem:[%s3052_s17 + $0x140] sm:$0xff] }
 0x266   : > { %1155 = vrot.lane.b32.xlu1 %v6396_v3, %s3016_s25  ;;  %1139 = vrot.lane.b32.xlu0 %v6397_v46, %s3016_s25  ;;  %v6402_v3 = vld [vmem:[#allocation151_spill] sm:$0xff]  ;;  %v6403_v46 = vld [vmem:[#allocation133_spill] sm:$0xff] }
 0x267   : > { %v993_v2 = vpop.permute.xlu2 %992  ;;  %2743 = vmatpush.msk.msra.mxu1 %vm1599_vm8, %v1497_v44  ;;  %2747 = vmatpush.msra.mxu2 %v1496_v54  ;;  %v1319_v19 = vsel %vm1295_vm4, %v1286_v32, %v6403_v46  ;;  %v6408_v32 = vld [vmem:[#allocation79_spill] sm:$0xff] }
 0x268   : > { %v973_v59 = vpop.permute.xlu1 %972  ;;  %v4435_v38 = vsel %vm1394_vm7, %v1393_v15, %v993_v2  ;;  %v971_v61 = vpop.permute.xlu0 %970  ;;  %2748 = vmatpush.msra.mxu3 %v1496_v54  ;;  %1615 = vmatpush.msra.mxu0 %v1496_v54  ;;  %v1494_v15 = vld [vmem:[%s6064_s1 + $0x8] sm:$0xff] }
 0x269   : > { %6399 = vst [vmem:[#allocation69_spill] sm:$0xff] %v4435_v38  ;;  %v4441_v22 = vsel %vm1394_vm7, %v1383_v18, %v973_v59  ;;  %v4444_v55 = vsel %vm1394_vm7, %v1382_v39, %v971_v61  ;;  %2746 = vmatpush.msra.mxu1 %v1496_v54  ;;  %2750 = vmatpush.msra.mxu2 %v1495_v31  ;;  %v6406_v2 = vld [vmem:[#allocation147_spill] sm:$0xff]  ;;  %v1027_v39 = vrot.slane %v4181_v30, 1  ;;  %v6149_v59 = vrot.slane %v4178_v43, 1  ;;  %v6432_v38 = vld [vmem:[#allocation150_spill] sm:$0xff] }
 0x26a   : > { %v1352_v18 = vsel %vm1328_vm5, %v1319_v19, %v6406_v2  ;;  %2751 = vmatpush.msra.mxu3 %v1495_v31  ;;  %1616 = vmatpush.msra.mxu0 %v1495_v31  ;;  %v6410_v19 = vld [vmem:[#allocation33_spill] sm:$0xff]  ;;  %v6413_v2 = vld [vmem:[#allocation2_spill] sm:$0xff] }
 0x26b   : > { %2753 = vmatpush.msra.mxu2 %v1494_v15  ;;  %v1385_v44 = vsel %vm1361_vm6, %v1352_v18, %v4201_v63  ;;  %2749 = vmatpush.msra.mxu1 %v1495_v31  ;;  %v4487_v63 = vsel %vm273_vm0, %v1027_v39, %v6149_v59  ;;  %v6409_v31 = vld [vmem:[#allocation97_spill] sm:$0xff] }
 0x26c   : > { %2754 = vmatpush.msra.mxu3 %v1494_v15  ;;  %1617 = vmatpush.msra.mxu0 %v1494_v15 }
 0x26d   : > { %1189 = vrot.lane.b32.xlu2 %v6402_v3, %s3016_s25  ;;  %2756 = vmatpush.msra.mxu2 %v1493_v5  ;;  %v1257_v3 = vsel %vm1229_vm2, %v2980_v14, %v6408_v32  ;;  %v1128_v14 = vrot.slane %v4181_v30, 2  ;;  %v6150_v32 = vrot.slane %v4178_v43, 2  ;;  %v6418_v30 = vld [vmem:[#allocation127_spill] sm:$0xff] }
 0x26e   : > { %1173 = vrot.lane.b32.xlu1 %v6404_v4, %s3016_s25  ;;  %1088 = vrot.lane.b32.xlu0 %v6405_v58, %s3015_s24  ;;  %v1290_v46 = vsel %vm1262_vm3, %v1257_v3, %v6409_v31  ;;  %v6411_v4 = vld [vmem:[#allocation134_spill] sm:$0xff]  ;;  %v2981_v31 = vld [vmem:[%s3052_s17 + $0x158] sm:$0xff] }
 0x26f   : > { %v4472_v61 = vpop.permute.xlu2 %1064  ;;  %2752 = vmatpush.msra.mxu1 %v1494_v15  ;;  %2757 = vmatpush.msra.mxu3 %v1493_v5  ;;  %v1323_v58 = vsel %vm1295_vm4, %v1290_v46, %v6411_v4  ;;  %v6412_v15 = vld [vmem:[#allocation12_spill] sm:$0xff]  ;;  %v6415_v4 = vld [vmem:[#allocation82_spill] sm:$0xff] }
 0x270   : > { %v4476_v54 = vpop.permute.xlu1 %978  ;;  %v977_v45 = vpop.permute.xlu0 %976  ;;  %1618 = vmatpush.msra.mxu0 %v1493_v5  ;;  %v1356_v18 = vsel %vm1328_vm5, %v1323_v58, %v4093_v28  ;;  %v6414_v46 = vld [vmem:[#allocation68_spill] sm:$0xff]  ;;  %v2982_v28 = vld [vmem:[%s3052_s17 + $0x168] sm:$0xff] }
 0x271   : > { %v4482_v60 = vsel %vm1394_vm7, %v1385_v44, %v977_v45  ;;  %2755 = vmatpush.msra.mxu1 %v1493_v5  ;;  %v1389_v44 = vsel %vm1361_vm6, %v1356_v18, %v4171_v41  ;;  %v1260_v58 = vsel %vm1229_vm2, %v2982_v28, %v6415_v4  ;;  %v6421_v4 = vld [vmem:[#allocation21_spill] sm:$0xff] }
 0x272   : > { %6407 = vst [vmem:[#allocation102_spill] sm:$0xff] %v4482_v60 }
 0x275   : > { %1141 = vrot.lane.b32.xlu2 %v6410_v19, %s3016_s25  ;;  %v1259_v19 = vsel %vm1229_vm2, %v2981_v31, %v6414_v46  ;;  %v6420_v46 = vld [vmem:[#allocation138_spill] sm:$0xff] }
 0x276   : > { %1056 = vrot.lane.b32.xlu1 %v6412_v15, %s3015_s24  ;;  %1040 = vrot.lane.b32.xlu0 %v6413_v2, %s3015_s24  ;;  %v6416_v15 = vld [vmem:[#allocation100_spill] sm:$0xff]  ;;  %v6417_v2 = vld [vmem:[#allocation110_spill] sm:$0xff] }
 0x277   : > { %v4504_v39 = vpop.permute.xlu2 %1181  ;;  %v1293_v41 = vsel %vm1262_vm3, %v1260_v58, %v6416_v15  ;;  %v1292_v18 = vsel %vm1262_vm3, %v1259_v19, %v6417_v2  ;;  %v6422_v58 = vld [vmem:[#allocation48_spill] sm:$0xff] }
 0x278   : > { %v985_v45 = vpop.permute.xlu1 %984  ;;  %v4508_v5 = vpop.permute.xlu0 %982  ;;  %v1325_v28 = vsel %vm1295_vm4, %v1292_v18, %v6420_v46  ;;  %v6423_v19 = vld [vmem:[#allocation152_spill] sm:$0xff] }
 0x279   : > { %v4513_v3 = vsel %vm1394_vm7, %v1389_v44, %v985_v45  ;;  %v4530_v44 = vsel %vm450_vm1, %v1128_v14, %v6150_v32  ;;  %v6419_v45 = vld [vmem:[#allocation137_spill] sm:$0xff]  ;;  %v1358_v15 = vsel %vm1328_vm5, %v1325_v28, %v6423_v19  ;;  %v6424_v28 = vld [vmem:[#allocation7_spill] sm:$0xff]  ;;  %v6426_v19 = vld [vmem:[#allocation66_spill] sm:$0xff] }
 0x27a   : > { %v1326_v31 = vsel %vm1295_vm4, %v1293_v41, %v6419_v45  ;;  %v1391_v18 = vsel %vm1361_vm6, %v1358_v15, %v4225_v51  ;;  %v6431_v32 = vld [vmem:[#allocation132_spill] sm:$0xff] }
 0x27b   : > { %v1359_v14 = vsel %vm1328_vm5, %v1326_v31, %v4105_v25  ;;  %v6425_v25 = vld [vmem:[#allocation64_spill] sm:$0xff] }
 0x27c   : > { %v1392_v41 = vsel %vm1361_vm6, %v1359_v14, %v4189_v34  ;;  %v2984_v14 = vld [vmem:[%s3052_s17 + $0x120] sm:$0xff] }
 0x27d   : > { %1090 = vrot.lane.b32.xlu2 %v6418_v30, %s3015_s24 }
 0x27e   : > { %1074 = vrot.lane.b32.xlu1 %v6421_v4, %s3015_s24  ;;  %1157 = vrot.lane.b32.xlu0 %v6422_v58, %s3016_s25  ;;  %v2983_v58 = vld [vmem:[%s3052_s17 + $0xc0] sm:$0xff] }
 0x27f   : > { %v4544_v2 = vpop.permute.xlu2 %1149  ;;  %v1246_v15 = vsel %vm1229_vm2, %v2983_v58, %v6426_v19  ;;  %v6433_v58 = vld [vmem:[#allocation47_spill] sm:$0xff] }
 0x280   : > { %v991_v30 = vpop.permute.xlu1 %990  ;;  %v989_v45 = vpop.permute.xlu0 %988 }
 0x281   : > { %v4551_v46 = vsel %vm1394_vm7, %v1392_v41, %v991_v30  ;;  %v4554_v4 = vsel %vm1394_vm7, %v1391_v18, %v989_v45  ;;  %v6427_v41 = vld [vmem:[#allocation76_spill] sm:$0xff]  ;;  %v6428_v30 = vld [vmem:[#allocation99_spill] sm:$0xff] }
 0x282   : > { %v1254_v18 = vsel %vm1229_vm2, %v2984_v14, %v6427_v41  ;;  %v1279_v45 = vsel %vm1262_vm3, %v1246_v15, %v6428_v30  ;;  %v6434_v14 = vld [vmem:[#allocation32_spill] sm:$0xff]  ;;  %v6435_v41 = vld [vmem:[#allocation11_spill] sm:$0xff] }
 0x285   : > { %1042 = vrot.lane.b32.xlu2 %v6424_v28, %s3015_s24 }
 0x286   : > { %1191 = vrot.lane.b32.xlu1 %v4057_v8, %s3016_s25  ;;  %1175 = vrot.lane.b32.xlu0 %v6425_v25, %s3016_s25  ;;  %v6429_v8 = vld [vmem:[#allocation95_spill] sm:$0xff]  ;;  %v6430_v25 = vld [vmem:[#allocation116_spill] sm:$0xff] }
 0x287   : > { %v4562_v34 = vpop.permute.xlu2 %1167  ;;  %v1287_v28 = vsel %vm1262_vm3, %v1254_v18, %v6429_v8  ;;  %v1312_v59 = vsel %vm1295_vm4, %v1279_v45, %v6430_v25  ;;  %v2985_v45 = vld [vmem:[%s3052_s17] sm:$0xff]  ;;  %v6436_v8 = vld [vmem:[#allocation41_spill] sm:$0xff] }
 0x288   : > { %v4564_v51 = vpop.permute.xlu1 %1034  ;;  %v1033_v31 = vpop.permute.xlu0 %1032  ;;  %v1320_v62 = vsel %vm1295_vm4, %v1287_v28, %v6431_v32  ;;  %v1345_v60 = vsel %vm1328_vm5, %v1312_v59, %v6432_v38  ;;  %v2986_v28 = vld [vmem:[%s3052_s17 + $0x60] sm:$0xff] }
 0x289   : > { %v1353_v19 = vsel %vm1328_vm5, %v1320_v62, %v4081_v27  ;;  %v1378_v15 = vsel %vm1361_vm6, %v1345_v60, %v4175_v10 }
 0x28a   : > { %v1386_v38 = vsel %vm1361_vm6, %v1353_v19, %v4161_v11  ;;  %v1411_v59 = vsel %vm1394_vm7, %v1378_v15, %v4270_v40  ;;  %v1230_v11 = vsel %vm1229_vm2, %v2985_v45, %v6436_v8  ;;  %v6439_v19 = vld [vmem:[#allocation90_spill] sm:$0xff] }
 0x28b   : > { %v1419_v27 = vsel %vm1394_vm7, %v1386_v38, %v4476_v54  ;;  %v1444_v10 = vsel %vm1427_vm9, %v1411_v59, %v4472_v61  ;;  %v6437_v54 = vld [vmem:[#allocation35_spill] sm:$0xff] }
 0x28c   : > { %v1238_v25 = vsel %vm1229_vm2, %v2986_v28, %v6437_v54  ;;  %v6438_v61 = vld [vmem:[#allocation71_spill] sm:$0xff] }
 0x28d   : > { %1159 = vrot.lane.b32.xlu2 %v6433_v58, %s3016_s25  ;;  %v1263_v58 = vsel %vm1262_vm3, %v1230_v11, %v6438_v61  ;;  %v1271_v15 = vsel %vm1262_vm3, %v1238_v25, %v6439_v19  ;;  %v6441_v38 = vld [vmem:[#allocation119_spill] sm:$0xff] }
 0x28e   : > { %1143 = vrot.lane.b32.xlu1 %v6434_v14, %s3016_s25  ;;  %1058 = vrot.lane.b32.xlu0 %v6435_v41, %s3015_s24  ;;  %v6440_v14 = vld [vmem:[#allocation112_spill] sm:$0xff]  ;;  %v1304_v59 = vsel %vm1295_vm4, %v1271_v15, %v6441_v38  ;;  %v2987_v61 = vld [vmem:[%s3052_s17 + $0x8] sm:$0xff]  ;;  %v6447_v15 = vld [vmem:[#allocation49_spill] sm:$0xff] }
 0x28f   : > { %v1136_v32 = vpop.permute.xlu2 %1135  ;;  %v1296_v41 = vsel %vm1295_vm4, %v1263_v58, %v6440_v14  ;;  %v6446_v58 = vld [vmem:[#allocation45_spill] sm:$0xff]  ;;  %v2988_v19 = vld [vmem:[%s3052_s17 + $0xc8] sm:$0xff] }
 0x290   : > { %v1166_v62 = vpop.permute.xlu1 %1165  ;;  %v1081_v60 = vpop.permute.xlu0 %1080 }
 0x291   : > { %v1452_v18 = vsel %vm1427_vm9, %v1419_v27, %v1081_v60  ;;  %v1477_v30 = vsel %vm1460_vm10, %v1444_v10, %v1166_v62  ;;  %v6442_v27 = vld [vmem:[#allocation140_spill] sm:$0xff]  ;;  %v6443_v10 = vld [vmem:[#allocation63_spill] sm:$0xff] }
 0x292   : > { %2724 = vmatmul.msk.f32.vlgmr.msra.gmra.mxu2 %vm1502_vm11, %v1477_v30  ;;  %v1485_v40 = vsel %vm1460_vm10, %v1452_v18, %v4504_v39  ;;  %v1329_v39 = vsel %vm1328_vm5, %v1296_v41, %v6442_v27  ;;  %v6444_v62 = vld [vmem:[#allocation136_spill] sm:$0xff]  ;;  %v6449_v41 = vld [vmem:[#allocation98_spill] sm:$0xff] }
 0x293   : > { %2732 = vmatmul.msk.f32.vlgmr.msra.gmra.mxu3 %vm1502_vm11, %v1485_v40  ;;  %v1337_v60 = vsel %vm1328_vm5, %v1304_v59, %v6444_v62  ;;  %v1362_v18 = vsel %vm1361_vm6, %v1329_v39, %v4065_v53  ;;  %v6445_v30 = vld [vmem:[#allocation20_spill] sm:$0xff]  ;;  %v6450_v59 = vld [vmem:[#allocation103_spill] sm:$0xff]  ;;  %v6451_v39 = vld [vmem:[#allocation126_spill] sm:$0xff] }
 0x294   : > { %v1370_v45 = vsel %vm1361_vm6, %v1337_v60, %v4139_v23  ;;  %v1395_v8 = vsel %vm1394_vm7, %v1362_v18, %v4237_v47  ;;  %v1231_v23 = vsel %vm1229_vm2, %v2987_v61, %v6446_v58  ;;  %v6452_v62 = vld [vmem:[#allocation139_spill] sm:$0xff]  ;;  %v6453_v60 = vld [vmem:[#allocation16_spill] sm:$0xff] }
 0x295   : > { %1177 = vrot.lane.b32.xlu2 %v6443_v10, %s3016_s25  ;;  %v1403_v40 = vsel %vm1394_vm7, %v1370_v45, %v4297_v57  ;;  %v1428_v53 = vsel %vm1427_vm9, %v1395_v8, %v1033_v31  ;;  %v1247_v57 = vsel %vm1229_vm2, %v2988_v19, %v6447_v15  ;;  %v6448_v31 = vld [vmem:[#allocation85_spill] sm:$0xff]  ;;  %v6454_v18 = vld [vmem:[#allocation143_spill] sm:$0xff]  ;;  %v6455_v8 = vld [vmem:[#allocation6_spill] sm:$0xff] }
 0x296   : > { %1092 = vrot.lane.b32.xlu1 %v4487_v63, %s3015_s24  ;;  %1076 = vrot.lane.b32.xlu0 %v6445_v30, %s3015_s24  ;;  %v1264_v14 = vsel %vm1262_vm3, %v1231_v23, %v6448_v31  ;;  %v1280_v38 = vsel %vm1262_vm3, %v1247_v57, %v6449_v41  ;;  %v2989_v58 = vld [vmem:[%s3052_s17 + $0x128] sm:$0xff]  ;;  %v6459_v57 = vld [vmem:[#allocation25_spill] sm:$0xff] }
 0x297   : > { %v4636_v11 = vpop.permute.xlu2 %1084  ;;  %v1297_v27 = vsel %vm1295_vm4, %v1264_v14, %v6450_v59  ;;  %v1313_v10 = vsel %vm1295_vm4, %v1280_v38, %v6451_v39  ;;  %v224_v15 = vld [vmem:[%s3052_s17 + $0x1a8] sm:$0x3]  ;;  %v6461_v14 = vld [vmem:[#allocation38_spill] sm:$0xff] }
 0x298   : > { %v1134_v28 = vpop.permute.xlu1 %1133  ;;  %v1049_v54 = vpop.permute.xlu0 %1048  ;;  %v1346_v30 = vsel %vm1328_vm5, %v1313_v10, %v6454_v18  ;;  %v1131_v41 = vrot.slane %v224_v15, 2  ;;  %v6463_v18 = vrot.slane %v4178_v43, 2 }
 0x299   : > { %v1436_v63 = vsel %vm1427_vm9, %v1403_v40, %v1049_v54  ;;  %v1461_v25 = vsel %vm1460_vm10, %v1428_v53, %v1134_v28  ;;  %v1379_v40 = vsel %vm1361_vm6, %v1346_v30, %v4173_v17  ;;  %v6456_v17 = vld [vmem:[#allocation75_spill] sm:$0xff]  ;;  %v6464_v30 = vld [vmem:[#allocation80_spill] sm:$0xff] }
 0x29a   : > { %2708 = vmatmul.msk.f32.vlgmr.msra.gmra.mxu0 %vm1502_vm11, %v1461_v25  ;;  %v1469_v47 = vsel %vm1460_vm10, %v1436_v63, %v4544_v2  ;;  %v1330_v2 = vsel %vm1328_vm5, %v1297_v27, %v6452_v62  ;;  %v1412_v54 = vsel %vm1394_vm7, %v1379_v40, %v4390_v26  ;;  %v1255_v23 = vsel %vm1229_vm2, %v2989_v58, %v6456_v17 }
 0x29b   : > { %2716 = vmatmul.msk.f32.vlgmr.msra.gmra.mxu1 %vm1502_vm11, %v1469_v47  ;;  %v1363_v45 = vsel %vm1361_vm6, %v1330_v2, %v4117_v52  ;;  %v6457_v47 = vld [vmem:[#allocation108_spill] sm:$0xff]  ;;  %v1030_v27 = vrot.slane %v224_v15, 1  ;;  %v6471_v15 = vld [vmem:[#allocation135_spill] sm:$0xff] }
 0x29c   : > { %v1396_v53 = vsel %vm1394_vm7, %v1363_v45, %v4199_v24  ;;  %v1288_v26 = vsel %vm1262_vm3, %v1255_v23, %v6457_v47  ;;  %v6462_v2 = vld [vmem:[#allocation56_spill] sm:$0xff]  ;;  %v2991_v47 = vld [vmem:[%s3052_s17 + $0x138] sm:$0xff] }
 0x29d   : > { %1060 = vrot.lane.b32.xlu2 %v6453_v60, %s3015_s24  ;;  %v1429_v52 = vsel %vm1427_vm9, %v1396_v53, %v4564_v51  ;;  %v6458_v51 = vld [vmem:[#allocation24_spill] sm:$0xff]  ;;  %v6466_v53 = vld [vmem:[#allocation14_spill] sm:$0xff] }
 0x29e   : > { %1044 = vrot.lane.b32.xlu1 %v6455_v8, %s3015_s24  ;;  %1193 = vrot.lane.b32.xlu0 %v4530_v44, %s3016_s25  ;;  %v1462_v44 = vsel %vm1460_vm10, %v1429_v52, %v1136_v32  ;;  %v1321_v19 = vsel %vm1295_vm4, %v1288_v26, %v6458_v51  ;;  %v6465_v8 = vrot.slane %v4178_v43, 1  ;;  %v6467_v52 = vld [vmem:[#allocation146_spill] sm:$0xff]  ;;  %v6469_v26 = vld [vmem:[#allocation65_spill] sm:$0xff] }
 0x29f   : > { %v4677_v28 = vpop.permute.xlu2 %1036  ;;  %v1354_v32 = vsel %vm1328_vm5, %v1321_v19, %v4079_v0  ;;  %v1256_v51 = vsel %vm1229_vm2, %v2991_v47, %v6469_v26 }
 0x2a0   : > { %v1083_v63 = vpop.permute.xlu1 %1082  ;;  %v1067_v25 = vpop.permute.xlu0 %1066  ;;  %v1387_v31 = vsel %vm1361_vm6, %v1354_v32, %v4215_v16  ;;  %v2990_v16 = vld [vmem:[%s3052_s17 + $0x68] sm:$0xff]  ;;  %v1031_v40 = vsel %vm273_vm0, %v6465_v8, %v1030_v27  ;;  %v6472_v32 = vld [vmem:[#allocation149_spill] sm:$0xff] }
 0x2a1   : > { %v1445_v61 = vsel %vm1427_vm9, %v1412_v54, %v1067_v25  ;;  %v1420_v38 = vsel %vm1394_vm7, %v1387_v31, %v4347_v12  ;;  %v1239_v60 = vsel %vm1229_vm2, %v2990_v16, %v6462_v2  ;;  %v1132_v12 = vsel %vm450_vm1, %v6463_v18, %v1131_v41  ;;  %v6473_v31 = vld [vmem:[#allocation37_spill] sm:$0xff]  ;;  %v6476_v2 = vld [vmem:[#allocation40_spill] sm:$0xff]  ;;  %v6477_v18 = vld [vmem:[#allocation55_spill] sm:$0xff] }
 0x2a2   : > { %2709 = vmatmul.msk.f32.gmra.mxu0 %vm1502_vm11, %v1462_v44  ;;  %v1478_v24 = vsel %vm1460_vm10, %v1445_v61, %v4562_v34  ;;  %v6460_v34 = vld [vmem:[#allocation46_spill] sm:$0xff]  ;;  %v1453_v0 = vsel %vm1427_vm9, %v1420_v38, %v1083_v63  ;;  %v1272_v45 = vsel %vm1262_vm3, %v1239_v60, %v6464_v30  ;;  %v6475_v41 = vld [vmem:[#allocation5_spill] sm:$0xff] }
 0x2a3   : > { %2725 = vmatmul.msk.f32.gmra.mxu2 %vm1502_vm11, %v1478_v24  ;;  %v1305_v54 = vsel %vm1295_vm4, %v1272_v45, %v6466_v53  ;;  %v6468_v61 = vld [vmem:[#allocation62_spill] sm:$0xff]  ;;  %v2992_v16 = vld [vmem:[%s3052_s17 + $0x18] sm:$0xff] }
 0x2a4   : > { %v1338_v63 = vsel %vm1328_vm5, %v1305_v54, %v6467_v52  ;;  %v1232_v60 = vsel %vm1229_vm2, %v2992_v16, %v6476_v2  ;;  %v6479_v45 = vld [vmem:[#allocation94_spill] sm:$0xff] }
 0x2a5   : > { %1078 = vrot.lane.b32.xlu2 %v6459_v57, %s3015_s24  ;;  %v1371_v25 = vsel %vm1361_vm6, %v1338_v63, %v4101_v37  ;;  %v6470_v37 = vld [vmem:[#allocation107_spill] sm:$0xff]  ;;  %v6481_v54 = vld [vmem:[#allocation10_spill] sm:$0xff]  ;;  %v6482_v63 = vld [vmem:[#allocation28_spill] sm:$0xff] }
 0x2a6   : > { %1161 = vrot.lane.b32.xlu1 %v6460_v34, %s3016_s25  ;;  %1145 = vrot.lane.b32.xlu0 %v6461_v14, %s3016_s25  ;;  %v1404_v43 = vsel %vm1394_vm7, %v1371_v25, %v4292_v49  ;;  %v1289_v19 = vsel %vm1262_vm3, %v1256_v51, %v6470_v37  ;;  %v6474_v14 = vld [vmem:[#allocation15_spill] sm:$0xff]  ;;  %v6490_v16 = vld [vmem:[#allocation122_spill] sm:$0xff] }
 0x2a7   : > { %v4709_v59 = vpop.permute.xlu2 %1153  ;;  %v1322_v49 = vsel %vm1295_vm4, %v1289_v19, %v6471_v15 }
 0x2a8   : > { %v1051_v39 = vpop.permute.xlu1 %1050  ;;  %v1184_v10 = vpop.permute.xlu0 %1183  ;;  %v1355_v57 = vsel %vm1328_vm5, %v1322_v49, %v6472_v32 }
 0x2a9   : > { %v1486_v62 = vsel %vm1460_vm10, %v1453_v0, %v1184_v10  ;;  %v1437_v44 = vsel %vm1427_vm9, %v1404_v43, %v1051_v39  ;;  %v1388_v34 = vsel %vm1361_vm6, %v1355_v57, %v4213_v13 }
 0x2aa   : > { %2733 = vmatmul.msk.f32.gmra.mxu3 %vm1502_vm11, %v1486_v62  ;;  %v1421_v38 = vsel %vm1394_vm7, %v1388_v34, %v4508_v5  ;;  %v2993_v5 = vld [vmem:[%s3052_s17 + $0x78] sm:$0xff] }
 0x2ab   : > { %v1454_v27 = vsel %vm1427_vm9, %v1421_v38, %v4636_v11  ;;  %v1240_v11 = vsel %vm1229_vm2, %v2993_v5, %v6477_v18  ;;  %v6492_v18 = vld [vmem:[#allocation142_spill] sm:$0xff] }
 0x2ac   : > { %v1273_v8 = vsel %vm1262_vm3, %v1240_v11, %v6479_v45 }
 0x2ad   : > { %1195 = vrot.lane.b32.xlu2 %v1132_v12, %s3016_s25  ;;  %v6478_v12 = vld [vmem:[#allocation84_spill] sm:$0xff]  ;;  %v1306_v52 = vsel %vm1295_vm4, %v1273_v8, %v6481_v54 }
 0x2ae   : > { %1179 = vrot.lane.b32.xlu1 %v6468_v61, %s3016_s25  ;;  %1094 = vrot.lane.b32.xlu0 %v1031_v40, %s3015_s24  ;;  %v6480_v40 = vld [vmem:[#allocation115_spill] sm:$0xff]  ;;  %v6483_v61 = vld [vmem:[#allocation52_spill] sm:$0xff] }
 0x2af   : > { %v1172_v23 = vpop.permute.xlu2 %1171  ;;  %v1339_v43 = vsel %vm1328_vm5, %v1306_v52, %v6483_v61 }
 0x2b0   : > { %v1069_v58 = vpop.permute.xlu1 %1068  ;;  %v1152_v17 = vpop.permute.xlu0 %1151 }
 0x2b1   : > { %v1470_v24 = vsel %vm1460_vm10, %v1437_v44, %v1152_v17  ;;  %v1446_v0 = vsel %vm1427_vm9, %v4393_v42, %v1069_v58  ;;  %v1265_v42 = vsel %vm1262_vm3, %v1232_v60, %v6478_v12  ;;  %v6484_v58 = vld [vmem:[#allocation53_spill] sm:$0xff]  ;;  %v1372_v17 = vsel %vm1361_vm6, %v1339_v43, %v4153_v56  ;;  %v6491_v60 = vld [vmem:[#allocation36_spill] sm:$0xff] }
 0x2b2   : > { %2717 = vmatmul.msk.f32.gmra.mxu1 %vm1502_vm11, %v1470_v24  ;;  %v1298_v53 = vsel %vm1295_vm4, %v1265_v42, %v6480_v40  ;;  %v1405_v47 = vsel %vm1394_vm7, %v1372_v17, %v4235_v29 }
 0x2b3   : > { %v1331_v25 = vsel %vm1328_vm5, %v1298_v53, %v6482_v63 }
 0x2b4   : > { %v1364_v44 = vsel %vm1361_vm6, %v1331_v25, %v4115_v50 }
 0x2b5   : > { %1147 = vrot.lane.b32.xlu2 %v6473_v31, %s3016_s25  ;;  %v1397_v24 = vsel %vm1394_vm7, %v1364_v44, %v4262_v9  ;;  %v2996_v44 = vld [vmem:[%s3052_s17 + $0x30] sm:$0xff] }
 0x2b6   : > { %1062 = vrot.lane.b32.xlu1 %v6474_v14, %s3015_s24  ;;  %1046 = vrot.lane.b32.xlu0 %v6475_v41, %s3015_s24  ;;  %v1430_v26 = vsel %vm1427_vm9, %v1397_v24, %v4677_v28  ;;  %v2994_v14 = vld [vmem:[%s3052_s17 + $0x80] sm:$0xff]  ;;  %v6485_v41 = vld [vmem:[#allocation39_spill] sm:$0xff] }
 0x2b7   : > { %v1055_v30 = vpop.permute.xlu2 %1054  ;;  %v1241_v38 = vsel %vm1229_vm2, %v2994_v14, %v6485_v41  ;;  %v6501_v14 = vld [vmem:[#allocation121_spill] sm:$0xff] }
 0x2b8   : > { %v1186_v39 = vpop.permute.xlu1 %1185  ;;  %v1170_v10 = vpop.permute.xlu0 %1169 }
 0x2b9   : > { %v1479_v62 = vsel %vm1460_vm10, %v1446_v0, %v1170_v10  ;;  %v1487_v13 = vsel %vm1460_vm10, %v1454_v27, %v1186_v39  ;;  %v2995_v27 = vld [vmem:[%s3052_s17 + $0x20] sm:$0xff]  ;;  %v6486_v0 = vld [vmem:[#allocation44_spill] sm:$0xff]  ;;  %v6488_v10 = vld [vmem:[#allocation93_spill] sm:$0xff] }
 0x2ba   : > { %2726 = vmatmul.msk.f32.gmra.mxu2 %vm1502_vm11, %v1479_v62  ;;  %2734 = vmatmul.msk.f32.gmra.mxu3 %vm1502_vm11, %v1487_v13  ;;  %v6489_v62 = vld [vmem:[#allocation114_spill] sm:$0xff] }
 0x2be   : > { %1163 = vrot.lane.b32.xlu0 %v6484_v58, %s3016_s25  ;;  %v6493_v58 = vld [vmem:[#allocation29_spill] sm:$0xff] }
 0x2bf   : > { %v1073_v9 = vpop.permute.xlu2 %1072  ;;  %v1234_v17 = vsel %vm1229_vm2, %v2996_v44, %v6493_v58 }
 0x2c0   : > { %v1138_v51 = vpop.permute.xlu1 %1137  ;;  %v1053_v37 = vpop.permute.xlu0 %1052 }
 0x2c1   : > { %v1438_v19 = vsel %vm1427_vm9, %v1405_v47, %v1053_v37  ;;  %v1463_v50 = vsel %vm1460_vm10, %v1430_v26, %v1138_v51  ;;  %v6495_v26 = vld [vmem:[#allocation106_spill] sm:$0xff]  ;;  %v6496_v51 = vld [vmem:[#allocation141_spill] sm:$0xff] }
 0x2c2   : > { %2710 = vmatmul.msk.f32.gmra.mxu0 %vm1502_vm11, %v1463_v50  ;;  %v1471_v56 = vsel %vm1460_vm10, %v1438_v19, %v4709_v59  ;;  %v6497_v19 = vld [vmem:[#allocation156_spill] sm:$0xff] }
 0x2c3   : > { %2718 = vmatmul.msk.f32.gmra.mxu1 %vm1502_vm11, %v1471_v56  ;;  %v6498_v56 = vld [vmem:[#allocation158_spill] sm:$0xff] }
 0x2c7   : > { %v1190_v32 = vpop.permute.xlu2 %1189 }
 0x2c8   : > { %v1087_v29 = vpop.permute.xlu1 %1086  ;;  %v1071_v15 = vpop.permute.xlu0 %1070 }
 0x2c9   : > { %v1447_v28 = vsel %vm1427_vm9, %v4295_v36, %v1071_v15  ;;  %v1455_v57 = vsel %vm1427_vm9, %v4513_v3, %v1087_v29  ;;  %v1233_v36 = vsel %vm1229_vm2, %v2995_v27, %v6486_v0  ;;  %v1274_v3 = vsel %vm1262_vm3, %v1241_v38, %v6488_v10  ;;  %v6502_v38 = vld [vmem:[#allocation148_spill] sm:$0xff] }
 0x2ca   : > { %v1480_v49 = vsel %vm1460_vm10, %v1447_v28, %v1172_v23  ;;  %v6487_v23 = vld [vmem:[#allocation74_spill] sm:$0xff]  ;;  %v1307_v2 = vsel %vm1295_vm4, %v1274_v3, %v6490_v16 }
 0x2cb   : > { %2727 = vmatmul.msk.f32.gmra.mxu2 %vm1502_vm11, %v1480_v49  ;;  %v1266_v39 = vsel %vm1262_vm3, %v1233_v36, %v6487_v23  ;;  %v1340_v5 = vsel %vm1328_vm5, %v1307_v2, %v6491_v60  ;;  %v2997_v49 = vld [vmem:[%s3052_s17 + $0x90] sm:$0xff]  ;;  %v6503_v36 = vld [vmem:[#allocation154_spill] sm:$0xff] }
 0x2cc   : > { %v1299_v13 = vsel %vm1295_vm4, %v1266_v39, %v6489_v62  ;;  %v1373_v42 = vsel %vm1361_vm6, %v1340_v5, %v4151_v20  ;;  %v1448_v20 = vsel %vm1427_vm9, %v4444_v55, %v1073_v9  ;;  %v6494_v55 = vld [vmem:[#allocation88_spill] sm:$0xff] }
 0x2cd   : > { %v1332_v11 = vsel %vm1328_vm5, %v1299_v13, %v6492_v18  ;;  %v1406_v8 = vsel %vm1394_vm7, %v1373_v42, %v4321_v48  ;;  %v1267_v47 = vsel %vm1262_vm3, %v1234_v17, %v6494_v55  ;;  %v6504_v42 = vld [vmem:[#allocation31_spill] sm:$0xff] }
 0x2ce   : > { %v1365_v12 = vsel %vm1361_vm6, %v1332_v11, %v4077_v1  ;;  %v1439_v40 = vsel %vm1427_vm9, %v1406_v8, %v1055_v30  ;;  %v6505_v8 = vld [vmem:[#allocation87_spill] sm:$0xff] }
 0x2cf   : > { %v1398_v45 = vsel %vm1394_vm7, %v1365_v12, %v4257_v33  ;;  %v1142_v63 = vpop.permute.xlu2 %1141  ;;  %v2998_v12 = vld [vmem:[%s3052_s17 + $0x38] sm:$0xff] }
 0x2d0   : > { %v1039_v31 = vpop.permute.xlu1 %1038  ;;  %v1188_v34 = vpop.permute.xlu0 %1187 }
 0x2d1   : > { %v1488_v59 = vsel %vm1460_vm10, %v1455_v57, %v1188_v34  ;;  %v1431_v53 = vsel %vm1427_vm9, %v1398_v45, %v1039_v31  ;;  %v6500_v34 = vld [vmem:[#allocation83_spill] sm:$0xff]  ;;  %v1235_v45 = vsel %vm1229_vm2, %v2998_v12, %v6504_v42  ;;  %v3000_v42 = vld [vmem:[%s3052_s17 + $0x50] sm:$0xff] }
 0x2d2   : > { %2735 = vmatmul.msk.f32.gmra.mxu3 %vm1502_vm11, %v1488_v59 }
 0x2d7   : > { %v1091_v24 = vpop.permute.xlu2 %1090 }
 0x2d8   : > { %v1156_v54 = vpop.permute.xlu1 %1155  ;;  %v1140_v52 = vpop.permute.xlu0 %1139  ;;  %v1457_v2 = vsel %vm1427_vm9, %v4554_v4, %v1091_v24  ;;  %v1268_v4 = vsel %vm1262_vm3, %v1235_v45, %v6505_v8  ;;  %v6519_v45 = vld [vmem:[#allocation50_spill] sm:$0xff] }
 0x2d9   : > { %v1464_v25 = vsel %vm1460_vm10, %v1431_v53, %v1140_v52  ;;  %v1472_v1 = vsel %vm1460_vm10, %v1439_v40, %v1156_v54  ;;  %v6506_v40 = vld [vmem:[#allocation118_spill] sm:$0xff]  ;;  %v6508_v52 = vld [vmem:[#allocation155_spill] sm:$0xff]  ;;  %v1237_v8 = vsel %vm1229_vm2, %v3000_v42, %v6519_v45 }
 0x2da   : > { %2711 = vmatmul.msk.f32.gmra.mxu0 %vm1502_vm11, %v1464_v25  ;;  %2719 = vmatmul.msk.f32.gmra.mxu1 %vm1502_vm11, %v1472_v1  ;;  %v6507_v53 = vld [vmem:[#allocation30_spill] sm:$0xff] }
 0x2df   : > { %v1043_v0 = vpop.permute.xlu2 %1042 }
 0x2e0   : > { %v1174_v33 = vpop.permute.xlu1 %1173  ;;  %v1089_v48 = vpop.permute.xlu0 %1088 }
 0x2e1   : > { %v1456_v30 = vsel %vm1427_vm9, %v4388_v35, %v1089_v48  ;;  %v1481_v61 = vsel %vm1460_vm10, %v1448_v20, %v1174_v33  ;;  %v1300_v35 = vsel %vm1295_vm4, %v1267_v47, %v6495_v26  ;;  %v6509_v48 = vld [vmem:[#allocation60_spill] sm:$0xff] }
 0x2e2   : > { %2728 = vmatmul.msk.f32.gmra.mxu2 %vm1502_vm11, %v1481_v61  ;;  %v1489_v43 = vsel %vm1460_vm10, %v1456_v30, %v1190_v32  ;;  %v1333_v37 = vsel %vm1328_vm5, %v1300_v35, %v6496_v51  ;;  %v6499_v32 = vld [vmem:[#allocation61_spill] sm:$0xff] }
 0x2e3   : > { %2736 = vmatmul.msk.f32.gmra.mxu3 %vm1502_vm11, %v1489_v43  ;;  %v1366_v50 = vsel %vm1361_vm6, %v1333_v37, %v6497_v19  ;;  %v1242_v57 = vsel %vm1229_vm2, %v2997_v49, %v6499_v32  ;;  %v2999_v19 = vld [vmem:[%s3052_s17 + $0x48] sm:$0xff]  ;;  %v6514_v49 = vld [vmem:[#allocation145_spill] sm:$0xff]  ;;  %s5009_s17 = scalar_lea.vmem %s6066_s3, %s2742_s14 }
 0x2e4   : > { %v1399_v9 = vsel %vm1394_vm7, %v1366_v50, %v6498_v56  ;;  %v1275_v59 = vsel %vm1262_vm3, %v1242_v57, %v6500_v34  ;;  %v6511_v50 = vld [vmem:[#allocation51_spill] sm:$0xff]  ;;  %v4931_v57 = vld [vmem:[%s6065_s2] ss:$0 sm:$0xff] }
 0x2e5   : > { %v1308_v41 = vsel %vm1295_vm4, %v1275_v59, %v6501_v14  ;;  %v1236_v56 = vsel %vm1229_vm2, %v2999_v19, %v6511_v50  ;;  %v6516_v14 = vld [vmem:[#allocation9_spill] sm:$0xff] }
 0x2e6   : > { %v1341_v27 = vsel %vm1328_vm5, %v1308_v41, %v6502_v38 }
 0x2e7   : > { %v1374_v23 = vsel %vm1361_vm6, %v1341_v27, %v6503_v36  ;;  %v1160_v16 = vpop.permute.xlu2 %1159 }
 0x2e8   : > { %v1057_v29 = vpop.permute.xlu1 %1056  ;;  %v1041_v15 = vpop.permute.xlu0 %1040  ;;  %v1407_v39 = vsel %vm1394_vm7, %v1374_v23, %v4316_v21 }
 0x2e9   : > { %v1432_v28 = vsel %vm1427_vm9, %v1399_v9, %v1041_v15  ;;  %v1440_v10 = vsel %vm1427_vm9, %v1407_v39, %v1057_v29  ;;  %v6512_v9 = vld [vmem:[#allocation77_spill] sm:$0xff] }
 0x2ea   : > { %v1465_v31 = vsel %vm1460_vm10, %v1432_v28, %v1142_v63  ;;  %v1269_v29 = vsel %vm1262_vm3, %v1236_v56, %v6512_v9  ;;  %v6513_v15 = vld [vmem:[#allocation117_spill] sm:$0xff] }
 0x2eb   : > { %2712 = vmatmul.msk.f32.gmra.mxu0 %vm1502_vm11, %v1465_v31  ;;  %v1302_v28 = vsel %vm1295_vm4, %v1269_v29, %v6513_v15  ;;  %v6515_v31 = vld [vmem:[#allocation153_spill] sm:$0xff] }
 0x2ec   : > { %v1335_v32 = vsel %vm1328_vm5, %v1302_v28, %v6514_v49 }
 0x2ed   : > { %v1368_v34 = vsel %vm1361_vm6, %v1335_v32, %v6515_v31 }
 0x2ee   : > { %v1401_v41 = vsel %vm1394_vm7, %v1368_v34, %v6516_v14 }
 0x2ef   : > { %v1178_v43 = vpop.permute.xlu2 %1177 }
 0x2f0   : > { %v1075_v3 = vpop.permute.xlu1 %1074  ;;  %v1158_v62 = vpop.permute.xlu0 %1157 }
 0x2f1   : > { %v1473_v13 = vsel %vm1460_vm10, %v1440_v10, %v1158_v62  ;;  %v1449_v60 = vsel %vm1427_vm9, %v4441_v22, %v1075_v3  ;;  %v1301_v22 = vsel %vm1295_vm4, %v1268_v4, %v6506_v40  ;;  %v6520_v4 = vld [vmem:[#allocation91_spill] sm:$0xff] }
 0x2f2   : > { %2720 = vmatmul.msk.f32.gmra.mxu1 %vm1502_vm11, %v1473_v13  ;;  %v1334_v54 = vsel %vm1328_vm5, %v1301_v22, %v6507_v53  ;;  %v1270_v40 = vsel %vm1262_vm3, %v1237_v8, %v6520_v4  ;;  %v6521_v22 = vld [vmem:[#allocation109_spill] sm:$0xff] }
 0x2f3   : > { %v1367_v63 = vsel %vm1361_vm6, %v1334_v54, %v6508_v52  ;;  %v1303_v53 = vsel %vm1295_vm4, %v1270_v40, %v6521_v22  ;;  %v6522_v54 = vld [vmem:[#allocation144_spill] sm:$0xff] }
 0x2f4   : > { %v1400_v25 = vsel %vm1394_vm7, %v1367_v63, %v4274_v6  ;;  %v6510_v6 = vld [vmem:[#allocation27_spill] sm:$0xff]  ;;  %v1336_v52 = vsel %vm1328_vm5, %v1303_v53, %v6522_v54 }
 0x2f5   : > { %v1433_v1 = vsel %vm1427_vm9, %v1400_v25, %v1043_v0  ;;  %v6523_v25 = vld [vmem:[#allocation157_spill] sm:$0xff] }
 0x2f7   : > { %v1061_v47 = vpop.permute.xlu2 %1060 }
 0x2f8   : > { %v1192_v5 = vpop.permute.xlu1 %1191  ;;  %v1176_v18 = vpop.permute.xlu0 %1175  ;;  %v1442_v38 = vsel %vm1427_vm9, %v4357_v7, %v1061_v47  ;;  %v6517_v7 = vld [vmem:[#allocation102_spill] sm:$0xff] }
 0x2f9   : > { %v1482_v11 = vsel %vm1460_vm10, %v1449_v60, %v1176_v18  ;;  %v1490_v21 = vsel %vm1460_vm10, %v1457_v2, %v1192_v5 }
 0x2fa   : > { %2729 = vmatmul.msk.f32.gmra.mxu2 %vm1502_vm11, %v1482_v11  ;;  %2737 = vmatmul.msk.f32.gmra.mxu3 %vm1502_vm11, %v1490_v21  ;;  %v6518_v11 = vld [vmem:[#allocation69_spill] sm:$0xff] }
 0x300   : > { %v1144_v20 = vpop.permute.xlu1 %1143  ;;  %v1059_v33 = vpop.permute.xlu0 %1058 }
 0x301   : > { %v1441_v30 = vsel %vm1427_vm9, %v6509_v48, %v1059_v33  ;;  %v1466_v61 = vsel %vm1460_vm10, %v1433_v1, %v1144_v20  ;;  %v1369_v1 = vsel %vm1361_vm6, %v1336_v52, %v6523_v25  ;;  %v6524_v33 = vld [vmem:[#allocation159_spill] sm:$0xff] }
 0x302   : > { %2713 = vmatmul.msk.f32.gmra.mxu0 %vm1502_vm11, %v1466_v61  ;;  %v1474_v44 = vsel %vm1460_vm10, %v1441_v30, %v1160_v16  ;;  %v1402_v48 = vsel %vm1394_vm7, %v1369_v1, %v6524_v33 }
 0x303   : > { %2721 = vmatmul.msk.f32.gmra.mxu1 %vm1502_vm11, %v1474_v44 }
 0x308   : > { %v1093_v58 = vpop.permute.xlu1 %1092  ;;  %v1077_v17 = vpop.permute.xlu0 %1076 }
 0x309   : > { %v1450_v24 = vsel %vm1427_vm9, %v6510_v6, %v1077_v17  ;;  %v1458_v26 = vsel %vm1427_vm9, %v4551_v46, %v1093_v58  ;;  %v1079_v46 = vpop.permute.xlu2 %1078  ;;  %v6525_v58 = vld [vmem:[#allocation18_spill] sm:$0xff] }
 0x30a   : > { %v1483_v55 = vsel %vm1460_vm10, %v1450_v24, %v1178_v43  ;;  %v1451_v16 = vsel %vm1427_vm9, %v6517_v7, %v1079_v46 }
 0x30b   : > { %2730 = vmatmul.msk.f32.gmra.mxu2 %vm1502_vm11, %v1483_v55 }
 0x310   : > { %v1045_v35 = vpop.permute.xlu1 %1044  ;;  %v1194_v51 = vpop.permute.xlu0 %1193 }
 0x311   : > { %v1491_v37 = vsel %vm1460_vm10, %v1458_v26, %v1194_v51  ;;  %v1434_v36 = vsel %vm1427_vm9, %v1401_v41, %v1045_v35  ;;  %v1196_v3 = vpop.permute.xlu2 %1195 }
 0x312   : > { %2738 = vmatmul.msk.f32.gmra.mxu3 %vm1502_vm11, %v1491_v37 }
 0x315   : > { %v4992_v14 = vpop.f32.mrf.mxu2 }
 0x317   : > { %v1620_v59 = vpop.f32.mrf.mxu0 }
 0x318   : > { %v1621_v27 = vadd.f32 %v4931_v57, %v1620_v59  ;;  %v1162_v0 = vpop.permute.xlu1 %1161  ;;  %v1146_v23 = vpop.permute.xlu0 %1145 }
 0x319   : > { %v1475_v39 = vsel %vm1460_vm10, %v1442_v38, %v1162_v0  ;;  %v1467_v10 = vsel %vm1460_vm10, %v1434_v36, %v1146_v23  ;;  %v1148_v20 = vpop.permute.xlu2 %1147  ;;  %v1644_v28 = vpop.f32.mrf.mxu1 }
 0x31a   : > { %2777 = vtanh.f32 %v1621_v27  ;;  %2722 = vmatmul.msk.f32.gmra.mxu1 %vm1502_vm11, %v1475_v39  ;;  %2714 = vmatmul.msk.f32.gmra.mxu0 %vm1502_vm11, %v1467_v10  ;;  %v1716_v9 = vsub.f32 0.0, %v1621_v27  ;;  %v5012_v8 = vadd.f32 %v4931_v57, %v1644_v28 }
 0x31c   : > { %v1748_v15 = vmul.f32 1.442695, %v1716_v9  ;;  %v5042_v9 = vadd.f32 %v4931_v57, %v4992_v14 }
 0x31f   : > { %v1623_v62 = vpop.f32.mrf.mxu0 }
 0x320   : > { %v2778_v13 = vpop.eup %2777  ;;  %v1624_v2 = vadd.f32 %v4931_v57, %v1623_v62  ;;  %v1180_v60 = vpop.permute.xlu1 %1179 }
 0x321   : > { %v1095_v5 = vpop.permute.xlu0 %1094  ;;  %2388 = vrot.lane.b32.xlu1 %v2778_v13, %s3017_s11  ;;  %v1484_v18 = vsel %vm1460_vm10, %v1451_v16, %v1180_v60 }
 0x322   : > { %2779 = vtanh.f32 %v1624_v2  ;;  %v1459_v21 = vsel %vm1427_vm9, %v6518_v11, %v1095_v5  ;;  %2731 = vmatmul.msk.f32.gmra.mxu2 %vm1502_vm11, %v1484_v18  ;;  %v1717_v35 = vsub.f32 0.0, %v1624_v2 }
 0x323   : > { %v1492_v12 = vsel %vm1460_vm10, %v1459_v21, %v1196_v3 }
 0x324   : > { %2739 = vmatmul.msk.f32.gmra.mxu3 %vm1502_vm11, %v1492_v12  ;;  %v1750_v51 = vmul.f32 1.442695, %v1717_v35 }
 0x326   : > { %v4997_v23 = vpop.f32.mrf.mxu2 }
 0x328   : > { %v2780_v63 = vpop.eup %2779  ;;  %v1063_v44 = vpop.permute.xlu1 %1062 }
 0x329   : > { %v1047_v30 = vpop.permute.xlu0 %1046  ;;  %2390 = vrot.lane.b32.xlu2 %v2780_v63, %s3017_s11  ;;  %v1443_v17 = vsel %vm1427_vm9, %v6525_v58, %v1063_v44 }
 0x32a   : > { %v1435_v61 = vsel %vm1427_vm9, %v1402_v48, %v1047_v30 }
 0x32b   : > { %v1468_v43 = vsel %vm1460_vm10, %v1435_v61, %v1148_v20 }
 0x32c   : > { %2715 = vmatmul.msk.f32.gmra.mxu0 %vm1502_vm11, %v1468_v43 }
 0x32f   : > { %v4990_v31 = vpop.f32.mrf.mxu1 }
 0x330   : > { %v5060_v14 = vadd.f32 %v4931_v57, %v4990_v31 }
 0x331   : > { %v1164_v6 = vpop.permute.xlu0 %1163 }
 0x332   : > { %v1476_v24 = vsel %vm1460_vm10, %v1443_v17, %v1164_v6  ;;  %v1692_v6 = vpop.f32.mrf.mxu3 }
 0x333   : > { %2723 = vmatmul.msk.f32.gmra.mxu1 %vm1502_vm11, %v1476_v24 }
 0x33a   : > { %v1695_v28 = vpop.f32.mrf.mxu3 }
 0x33d   : > { %v5002_v18 = vpop.f32.mrf.mxu2 }
 0x33f   : > { %v1626_v55 = vpop.f32.mrf.mxu0 }
 0x340   : > { %v4977_v47 = vadd.f32 %v4931_v57, %v1626_v55  ;;  %v4995_v0 = vpop.f32.mrf.mxu1 }
 0x342   : > { %2781 = vtanh.f32 %v4977_v47  ;;  %v1718_v54 = vsub.f32 0.0, %v4977_v47 }
 0x343   : > { %2783 = vpow2.f32 %v1750_v51 }
 0x344   : > { %v1752_v1 = vmul.f32 1.442695, %v1718_v54 }
 0x348   : > { %v2782_v26 = vpop.eup %2781 }
 0x349   : > { %2392 = vrot.lane.b32.xlu0 %v2782_v26, %s3017_s11  ;;  %v2784_v50 = vpop.eup %2783 }
 0x34a   : > { %v1813_v29 = vadd.f32 1.0, %v2784_v50 }
 0x34c   : > { %v1870_v3 = vand.u32 2147483648, %v1813_v29  ;;  %vm1864_vm13 = vweird.f32 %v1813_v29  ;;  %v1868_v62 = vand.u32 2147483647, %v1813_v29 }
 0x34e   : > { %v1871_v5 = vor.u32 1.1754944e-38, %v1870_v3  ;;  %vm1869_vm15 = vcmp.eq.f32.partialorder %v1868_v62, 8.507059e+37  ;;  %v5021_v52 = vpop.f32.mrf.mxu2 }
 0x357   : > { %v1629_v37 = vpop.f32.mrf.mxu0  ;;  %v1653_v13 = vpop.f32.mrf.mxu1 }
 0x358   : > { %v4982_v19 = vadd.f32 %v4931_v57, %v1629_v37  ;;  %v5024_v33 = vadd.f32 %v4931_v57, %v1653_v13 }
 0x35a   : > { %2785 = vtanh.f32 %v4982_v19 }
 0x35b   : > { %2787 = vrcp.f32 %v1813_v29 }
 0x35c   : > { %2789 = vpow2.f32 %v1748_v15  ;;  %v5048_v15 = vadd.f32 %v4931_v57, %v1692_v6 }
 0x360   : > { %v2786_v56 = vpop.eup %2785 }
 0x361   : > { %2394 = vrot.lane.b32.xlu1 %v2786_v56, %s3017_s11  ;;  %v2788_v46 = vpop.eup %2787 }
 0x362   : > { %v2790_v34 = vpop.eup %2789  ;;  %v1860_v59 = vmul.f32 %v2788_v46, %v1813_v29  ;;  %vm1865_vm12 = vweird.f32 %v2788_v46 }
 0x363   : > { %v1812_v41 = vadd.f32 1.0, %v2790_v34  ;;  %vm1866_vm14 = vmor %vm1864_vm13, %vm1865_vm12  ;;  %v5055_v34 = vadd.f32 %v4931_v57, %v4997_v23 }
 0x364   : > { %v1861_v27 = vsub.f32 1.0, %v1860_v59  ;;  %v1732_v59 = vsub.f32 0.0, %v5042_v9 }
 0x365   : > { %v1855_v25 = vand.u32 2147483648, %v1812_v41  ;;  %vm1849_vm2 = vweird.f32 %v1812_v41  ;;  %v1853_v20 = vand.u32 2147483647, %v1812_v41  ;;  %v1680_v44 = vpop.f32.mrf.mxu2 }
 0x366   : > { %v1862_v36 = vmul.f32 %v2788_v46, %v1861_v27  ;;  %v5074_v13 = vadd.f32 %v4931_v57, %v1680_v44 }
 0x367   : > { %v1856_v43 = vor.u32 1.1754944e-38, %v1855_v25  ;;  %vm1854_vm4 = vcmp.eq.f32.partialorder %v1853_v20, 8.507059e+37 }
 0x368   : > { %v1632_v49 = vpop.f32.mrf.mxu0  ;;  %v1863_v39 = vadd.f32 %v2788_v46, %v1862_v36 }
 0x369   : > { %v4987_v32 = vadd.f32 %v4931_v57, %v1632_v49 }
 0x36a   : > { %v1867_v2 = vsel %vm1866_vm14, %v2788_v46, %v1863_v39  ;;  %v1719_v39 = vsub.f32 0.0, %v4982_v19  ;;  %v1724_v19 = vsub.f32 0.0, %v5012_v8 }
 0x36b   : > { %2791 = vtanh.f32 %v4987_v32  ;;  %v1872_v21 = vsel %vm1869_vm15, %v1871_v5, %v1867_v2  ;;  %v1720_v46 = vsub.f32 0.0, %v4987_v32  ;;  %v1780_v32 = vmul.f32 1.442695, %v1732_v59 }
 0x36c   : > { %2793 = vrcp.f32 %v1812_v41  ;;  %v1754_v3 = vmul.f32 1.442695, %v1719_v39 }
 0x36d   : > { %v1756_v27 = vmul.f32 1.442695, %v1720_v46 }
 0x36f   : > { %v5014_v4 = vpop.f32.mrf.mxu1 }
 0x371   : > { %v2792_v38 = vpop.eup %2791 }
 0x372   : > { %2396 = vrot.lane.b32.xlu2 %v2792_v38, %s3017_s11  ;;  %v2794_v10 = vpop.eup %2793  ;;  %v1740_v38 = vsub.f32 0.0, %v5048_v15 }
 0x373   : > { %v1845_v60 = vmul.f32 %v2794_v10, %v1812_v41  ;;  %vm1850_vm1 = vweird.f32 %v2794_v10 }
 0x374   : > { %vm1851_vm3 = vmor %vm1849_vm2, %vm1850_vm1  ;;  %v1796_v23 = vmul.f32 1.442695, %v1740_v38 }
 0x375   : > { %v1846_v42 = vsub.f32 1.0, %v1845_v60 }
 0x377   : > { %v1847_v22 = vmul.f32 %v2794_v10, %v1846_v42  ;;  %v1764_v42 = vmul.f32 1.442695, %v1724_v19 }
 0x379   : > { %v1848_v63 = vadd.f32 %v2794_v10, %v1847_v22 }
 0x37b   : > { %v1852_v30 = vsel %vm1851_vm3, %v2794_v10, %v1848_v63  ;;  %v1698_v10 = vpop.f32.mrf.mxu3 }
 0x37c   : > { %v1857_v17 = vsel %vm1854_vm4, %v1856_v43, %v1852_v30 }
 0x37d   : > { %v5044_v29 = vpop.f32.mrf.mxu2 }
 0x37f   : > { %v1635_v7 = vpop.f32.mrf.mxu0 }
 0x380   : > { %v5000_v16 = vadd.f32 %v4931_v57, %v1635_v7  ;;  %v5026_v48 = vpop.f32.mrf.mxu1  ;;  %v5079_v7 = vadd.f32 %v4931_v57, %v5014_v4 }
 0x381   : > { %v5150_v39 = vadd.f32 %v4931_v57, %v5026_v48 }
 0x382   : > { %2795 = vtanh.f32 %v5000_v16 }
 0x383   : > { %v2391_v11 = vpop.permute.xlu2 %2390  ;;  %2797 = vtanh.f32 %v5012_v8  ;;  %v5090_v8 = vpop.f32.mrf.mxu3 }
 0x384   : > { %v2485_v12 = vmul.f32 %v2391_v11, %v1872_v21  ;;  %2799 = vpow2.f32 %v1752_v1  ;;  %v1733_v1 = vsub.f32 0.0, %v5055_v34 }
 0x385   : > { %2801 = vtanh.f32 %v5024_v33 }
 0x386   : > { %vm2517_vm0 = vcmp.ge.f32.partialorder %v2485_v12, 0.0  ;;  %v2549_v45 = vmul.f32 0.2, %v2485_v12 }
 0x388   : > { %v2581_v40 = vsel %vm2517_vm0, %v2485_v12, %v2549_v45  ;;  %v2796_v53 = vpop.eup %2795 }
 0x389   : > { %2613 = vst.msk [vmem:[%s5009_s17 + $0x8] sm:$0xff] %vm1460_vm10, %v2581_v40  ;;  %2398 = vrot.lane.b32.xlu0 %v2796_v53, %s3017_s11  ;;  %v2798_v61 = vpop.eup %2797 }
 0x38a   : > { %v2800_v26 = vpop.eup %2799 }
 0x38b   : > { %v2802_v50 = vpop.eup %2801  ;;  %v5050_v49 = vadd.f32 1.0, %v2800_v26  ;;  %v1782_v26 = vmul.f32 1.442695, %v1733_v1 }
 0x38d   : > { %vm1879_vm7 = vweird.f32 %v5050_v49  ;;  %v1883_v59 = vand.u32 2147483647, %v5050_v49 }
 0x38e   : > { %v5069_v31 = vpop.f32.mrf.mxu2 }
 0x38f   : > { %vm1884_vm9 = vcmp.eq.f32.partialorder %v1883_v59, 8.507059e+37 }
 0x391   : > { %2404 = vrot.lane.b32.xlu0 %v2798_v61, %s3017_s11  ;;  %v5101_v61 = vadd.f32 %v4931_v57, %v4995_v0 }
 0x393   : > { %v2389_v58 = vpop.permute.xlu1 %2388 }
 0x394   : > { %v2484_v24 = vmul.f32 %v2389_v58, %v1857_v17  ;;  %v5111_v17 = vadd.f32 %v4931_v57, %v1695_v28  ;;  %v1885_v28 = vand.u32 2147483648, %v5050_v49 }
 0x396   : > { %vm2516_vm5 = vcmp.ge.f32.partialorder %v2484_v24, 0.0  ;;  %v2548_v55 = vmul.f32 0.2, %v2484_v24 }
 0x397   : > { %v1662_v47 = vpop.f32.mrf.mxu1  ;;  %v1638_v51 = vpop.f32.mrf.mxu0 }
 0x398   : > { %v2580_v35 = vsel %vm2516_vm5, %v2484_v24, %v2548_v55  ;;  %v5031_v37 = vadd.f32 %v4931_v57, %v1662_v47  ;;  %v5036_v56 = vadd.f32 %v4931_v57, %v1638_v51  ;;  %v5121_v55 = vpop.f32.mrf.mxu3  ;;  %v1741_v51 = vsub.f32 0.0, %v5111_v17 }
 0x399   : > { %2612 = vst.msk [vmem:[%s5009_s17] sm:$0xff] %vm1460_vm10, %v2580_v35  ;;  %2410 = vrot.lane.b32.xlu0 %v2802_v50, %s3017_s11  ;;  %v1675_v50 = vadd.f32 %v4931_v57, %v5002_v18 }
 0x39a   : > { %2803 = vtanh.f32 %v5031_v37 }
 0x39b   : > { %2805 = vtanh.f32 %v5036_v56 }
 0x39c   : > { %2807 = vrcp.f32 %v5050_v49 }
 0x39d   : > { %2809 = vtanh.f32 %v5055_v34  ;;  %v5135_v34 = vadd.f32 %v4931_v57, %v1698_v10 }
 0x39e   : > { %2811 = vtanh.f32 %v5060_v14 }
 0x39f   : > { %2813 = vpow2.f32 %v1756_v27 }
 0x3a0   : > { %v2804_v41 = vpop.eup %2803  ;;  %2815 = vpow2.f32 %v1780_v32  ;;  %v1798_v32 = vmul.f32 1.442695, %v1741_v51  ;;  %v1707_v48 = vpop.f32.mrf.mxu3 }
 0x3a1   : > { %v2806_v36 = vpop.eup %2805  ;;  %2416 = vrot.lane.b32.xlu0 %v2804_v41, %s3017_s11  ;;  %2817 = vpow2.f32 %v1796_v23  ;;  %v1886_v23 = vor.u32 1.1754944e-38, %v1885_v28 }
 0x3a2   : > { %2400 = vrot.lane.b32.xlu1 %v2806_v36, %s3017_s11  ;;  %v5071_v62 = vpop.eup %2807  ;;  %2819 = vpow2.f32 %v1754_v3  ;;  %v1725_v36 = vsub.f32 0.0, %v5060_v14 }
 0x3a3   : > { %v2810_v2 = vpop.eup %2809  ;;  %v1875_v11 = vmul.f32 %v5071_v62, %v5050_v49  ;;  %2821 = vtanh.f32 %v5074_v13  ;;  %vm1880_vm6 = vweird.f32 %v5071_v62 }
 0x3a4   : > { %v2812_v60 = vpop.eup %2811  ;;  %2823 = vtanh.f32 %v5079_v7  ;;  %vm5143_vm8 = vmor %vm1879_vm7, %vm1880_vm6 }
 0x3a5   : > { %v2814_v21 = vpop.eup %2813  ;;  %v1689_v45 = vpop.f32.mrf.mxu2  ;;  %v1876_v22 = vsub.f32 1.0, %v1875_v11 }
 0x3a6   : > { %v2816_v4 = vpop.eup %2815  ;;  %v5092_v40 = vadd.f32 1.0, %v2814_v21  ;;  %v5096_v54 = vadd.f32 %v4931_v57, %v1689_v45  ;;  %v5171_v21 = vadd.f32 %v4931_v57, %v5044_v29  ;;  %v1734_v45 = vsub.f32 0.0, %v1675_v50 }
 0x3a7   : > { %v2818_v53 = vpop.eup %2817  ;;  %v1877_v44 = vmul.f32 %v5071_v62, %v1876_v22  ;;  %v5108_v58 = vadd.f32 1.0, %v2816_v4  ;;  %v5174_v4 = vadd.f32 %v4931_v57, %v1707_v48 }
 0x3a8   : > { %v2820_v63 = vpop.eup %2819  ;;  %v5119_v24 = vadd.f32 1.0, %v2818_v53  ;;  %vm1909_vm13 = vweird.f32 %v5092_v40 }
 0x3a9   : > { %v1641_v5 = vpop.f32.mrf.mxu0  ;;  %2422 = vrot.lane.b32.xlu0 %v2810_v2, %s3017_s11  ;;  %v2822_v25 = vpop.eup %2821  ;;  %v5116_v6 = vadd.f32 1.0, %v2820_v63  ;;  %v1878_v35 = vadd.f32 %v5071_v62, %v1877_v44  ;;  %v1742_v44 = vsub.f32 0.0, %v5135_v34  ;;  %vm2089_vm5 = vweird.f32 %v5108_v58 }
 0x3aa   : > { %v5085_v12 = vadd.f32 %v4931_v57, %v1641_v5  ;;  %2406 = vrot.lane.b32.xlu1 %v2812_v60, %s3017_s11  ;;  %v2824_v30 = vpop.eup %2823  ;;  %v1766_v60 = vmul.f32 1.442695, %v1725_v36 }
 0x3ab   : > { %v1882_v49 = vsel %vm5143_vm8, %v5071_v62, %v1878_v35  ;;  %v1726_v35 = vsub.f32 0.0, %v5101_v61  ;;  %v1800_v18 = vmul.f32 1.442695, %v1742_v44  ;;  %vm1894_vm2 = vweird.f32 %v5116_v6 }
 0x3ac   : > { %2825 = vtanh.f32 %v5085_v12  ;;  %v1887_v3 = vsel %vm1884_vm9, %v1886_v23, %v1882_v49 }
 0x3ad   : > { %2827 = vpow2.f32 %v1764_v42  ;;  %v1768_v49 = vmul.f32 1.442695, %v1726_v35  ;;  %v1900_v35 = vand.u32 2147483648, %v5116_v6 }
 0x3ae   : > { %2829 = vrcp.f32 %v5092_v40 }
 0x3af   : > { %2831 = vtanh.f32 %v5096_v54 }
 0x3b0   : > { %v1665_v20 = vpop.f32.mrf.mxu1 }
 0x3b1   : > { %v5105_v43 = vadd.f32 %v4931_v57, %v1665_v20  ;;  %2428 = vrot.lane.b32.xlu0 %v2822_v25, %s3017_s11 }
 0x3b2   : > { %2412 = vrot.lane.b32.xlu1 %v2824_v30, %s3017_s11  ;;  %v2826_v0 = vpop.eup %2825 }
 0x3b3   : > { %2833 = vtanh.f32 %v5105_v43  ;;  %2402 = vrot.lane.b32.xlu2 %v2826_v0, %s3017_s11  ;;  %v2828_v47 = vpop.eup %2827  ;;  %v2095_v0 = vand.u32 2147483648, %v5108_v58 }
 0x3b4   : > { %2835 = vtanh.f32 %v5101_v61  ;;  %v5132_v46 = vpop.eup %2829  ;;  %v5141_v38 = vadd.f32 1.0, %v2828_v47 }
 0x3b5   : > { %2837 = vrcp.f32 %v5108_v58  ;;  %v2832_v41 = vpop.eup %2831  ;;  %v1905_v19 = vmul.f32 %v5132_v46, %v5092_v40  ;;  %vm1910_vm12 = vweird.f32 %v5132_v46 }
 0x3b6   : > { %2839 = vrcp.f32 %v5116_v6  ;;  %v1973_v59 = vand.u32 2147483647, %v5141_v38  ;;  %vm5227_vm14 = vmor %vm1909_vm13, %vm1910_vm12  ;;  %vm1969_vm6 = vweird.f32 %v5141_v38  ;;  %vm2209_vm12 = vweird.f32 %v5119_v24 }
 0x3b7   : > { %2841 = vrcp.f32 %v5119_v24  ;;  %v1906_v63 = vsub.f32 1.0, %v1905_v19  ;;  %v5214_v19 = vadd.f32 %v4931_v57, %v5021_v52  ;;  %v1721_v52 = vsub.f32 0.0, %v5000_v16 }
 0x3b8   : > { %2843 = vpow2.f32 %v1782_v26  ;;  %v1784_v26 = vmul.f32 1.442695, %v1734_v45  ;;  %vm5290_vm9 = vcmp.eq.f32.partialorder %v1973_v59, 8.507059e+37 }
 0x3b9   : > { %v2834_v27 = vpop.eup %2833  ;;  %2845 = vtanh.f32 %v1675_v50  ;;  %2434 = vrot.lane.b32.xlu0 %v2832_v41, %s3017_s11  ;;  %v1907_v28 = vmul.f32 %v5132_v46, %v1906_v63  ;;  %v2093_v41 = vand.u32 2147483647, %v5108_v58 }
 0x3ba   : > { %2418 = vrot.lane.b32.xlu1 %v2834_v27, %s3017_s11  ;;  %v2836_v10 = vpop.eup %2835  ;;  %2847 = vtanh.f32 %v5135_v34  ;;  %v1975_v27 = vand.u32 2147483648, %v5141_v38 }
 0x3bb   : > { %v5158_v14 = vpop.eup %2837  ;;  %2849 = vrcp.f32 %v5141_v38  ;;  %2408 = vrot.lane.b32.xlu2 %v2836_v10, %s3017_s11  ;;  %v2393_v62 = vpop.permute.xlu0 %2392  ;;  %v1908_v48 = vadd.f32 %v5132_v46, %v1907_v28 }
 0x3bc   : > { %v5164_v2 = vpop.eup %2839  ;;  %2851 = vtanh.f32 %v5150_v39  ;;  %v2486_v5 = vmul.f32 %v2393_v62, %v1887_v3  ;;  %v2085_v51 = vmul.f32 %v5158_v14, %v5108_v58  ;;  %vm2090_vm0 = vweird.f32 %v5158_v14 }
 0x3bd   : > { %v5167_v11 = vpop.eup %2841  ;;  %2853 = vpow2.f32 %v1798_v32  ;;  %v1890_v25 = vmul.f32 %v5164_v2, %v5116_v6  ;;  %vm1895_vm15 = vweird.f32 %v5164_v2 }
 0x3be   : > { %v2844_v42 = vpop.eup %2843  ;;  %vm2518_vm11 = vcmp.ge.f32.partialorder %v2486_v5, 0.0  ;;  %v2550_v22 = vmul.f32 0.2, %v2486_v5  ;;  %2855 = vpow2.f32 %v1766_v60  ;;  %v2205_v61 = vmul.f32 %v5167_v11, %v5119_v24  ;;  %vm5254_vm4 = vmor %vm1894_vm2, %vm1895_vm15 }
 0x3bf   : > { %v2846_v53 = vpop.eup %2845  ;;  %v5180_v29 = vadd.f32 1.0, %v2844_v42  ;;  %2857 = vtanh.f32 %v5171_v21  ;;  %v1891_v34 = vsub.f32 1.0, %v1890_v25  ;;  %v2086_v32 = vsub.f32 1.0, %v2085_v51 }
 0x3c0   : > { %v2848_v1 = vpop.eup %2847  ;;  %v2582_v20 = vsel %vm2518_vm11, %v2486_v5, %v2550_v22  ;;  %2859 = vtanh.f32 %v5174_v4  ;;  %v1915_v60 = vand.u32 2147483648, %v5092_v40  ;;  %v2206_v5 = vsub.f32 1.0, %v2205_v61 }
 0x3c1   : > { %v5178_v30 = vpop.eup %2849  ;;  %2614 = vst.msk [vmem:[%s5009_s17 + $0x10] sm:$0xff] %vm1460_vm10, %v2582_v20  ;;  %2440 = vrot.lane.b32.xlu0 %v2848_v1, %s3017_s11  ;;  %2861 = vtanh.f32 %v5042_v9  ;;  %v5203_v9 = vor.u32 1.1754944e-38, %v2095_v0  ;;  %v1892_v3 = vmul.f32 %v5164_v2, %v1891_v34  ;;  %v2087_v20 = vmul.f32 %v5158_v14, %v2086_v32 }
 0x3c2   : > { %2424 = vrot.lane.b32.xlu1 %v2846_v53, %s3017_s11  ;;  %v2852_v47 = vpop.eup %2851  ;;  %2863 = vtanh.f32 %v5048_v15  ;;  %v1965_v15 = vmul.f32 %v5178_v30, %v5141_v38  ;;  %v1913_v53 = vand.u32 2147483647, %v5092_v40  ;;  %v1912_v40 = vsel %vm5227_vm14, %v5132_v46, %v1908_v48  ;;  %vm5324_vm14 = vmor %vm2089_vm5, %vm2090_vm0 }
 0x3c3   : > { %v2854_v50 = vpop.eup %2853  ;;  %2414 = vrot.lane.b32.xlu2 %v2852_v47, %s3017_s11  ;;  %2865 = vrcp.f32 %v5180_v29  ;;  %v1893_v16 = vadd.f32 %v5164_v2, %v1892_v3  ;;  %v5244_v47 = vadd.f32 %v4931_v57, %v5090_v8  ;;  %v1898_v46 = vand.u32 2147483647, %v5116_v6 }
 0x3c4   : > { %v2856_v36 = vpop.eup %2855  ;;  %2867 = vpow2.f32 %v1784_v26  ;;  %v5207_v10 = vadd.f32 1.0, %v2854_v50  ;;  %v1966_v1 = vsub.f32 1.0, %v1965_v15  ;;  %v1916_v26 = vor.u32 1.1754944e-38, %v1915_v60 }
 0x3c5   : > { %v2858_v23 = vpop.eup %2857  ;;  %v5218_v22 = vadd.f32 1.0, %v2856_v36  ;;  %2869 = vpow2.f32 %v1800_v18  ;;  %vm1914_vm1 = vcmp.eq.f32.partialorder %v1913_v53, 8.507059e+37  ;;  %vm1970_vm3 = vweird.f32 %v5178_v30 }
 0x3c6   : > { %v2860_v62 = vpop.eup %2859  ;;  %2871 = vpow2.f32 %v1768_v49  ;;  %v1758_v51 = vmul.f32 1.442695, %v1721_v52  ;;  %v1917_v28 = vsel %vm1914_vm1, %v1916_v26, %v1912_v40  ;;  %v5262_v61 = vmul.f32 %v5167_v11, %v2206_v5  ;;  %vm5334_vm15 = vmor %vm1969_vm6, %vm1970_vm3 }
 0x3c7   : > { %v2862_v45 = vpop.eup %2861  ;;  %2873 = vrcp.f32 %v5207_v10  ;;  %v1897_v49 = vsel %vm5254_vm4, %v5164_v2, %v1893_v16  ;;  %v1967_v15 = vmul.f32 %v5178_v30, %v1966_v1  ;;  %v5275_v48 = vadd.f32 %v4931_v57, %v5069_v31  ;;  %v1710_v1 = vpop.f32.mrf.mxu3 }
 0x3c8   : > { %v2864_v63 = vpop.eup %2863  ;;  %2875 = vtanh.f32 %v5214_v19  ;;  %v1901_v3 = vor.u32 1.1754944e-38, %v1900_v35  ;;  %v1727_v60 = vsub.f32 0.0, %v5024_v33  ;;  %vm1899_vm8 = vcmp.eq.f32.partialorder %v1898_v46, 8.507059e+37 }
 0x3c9   : > { %2446 = vrot.lane.b32.xlu0 %v2860_v62, %s3017_s11  ;;  %v5232_v44 = vpop.eup %2865  ;;  %2877 = vrcp.f32 %v5218_v22  ;;  %v2088_v16 = vadd.f32 %v5158_v14, %v2087_v20  ;;  %vm5297_vm11 = vcmp.eq.f32.partialorder %v2093_v41, 8.507059e+37  ;;  %v1968_v59 = vadd.f32 %v5178_v30, %v1967_v15 }
 0x3ca   : > { %2430 = vrot.lane.b32.xlu1 %v2858_v23, %s3017_s11  ;;  %v2868_v0 = vpop.eup %2867  ;;  %v2100_v34 = vmul.f32 %v5232_v44, %v5180_v29  ;;  %v1735_v23 = vsub.f32 0.0, %v5214_v19  ;;  %2879 = vtanh.f32 %v5244_v47  ;;  %v1902_v53 = vsel %vm1899_vm8, %v1901_v3, %v1897_v49 }
 0x3cb   : > { %2420 = vrot.lane.b32.xlu2 %v2862_v45, %s3017_s11  ;;  %v2870_v6 = vpop.eup %2869  ;;  %v5264_v18 = vadd.f32 1.0, %v2868_v0  ;;  %2881 = vpow2.f32 %v1758_v51  ;;  %v1770_v20 = vmul.f32 1.442695, %v1727_v60  ;;  %v5311_v51 = vadd.f32 %v4931_v57, %v1710_v1 }
 0x3cc   : > { %v2397_v50 = vpop.permute.xlu2 %2396  ;;  %v2872_v32 = vpop.eup %2871  ;;  %v5281_v45 = vadd.f32 1.0, %v2870_v6  ;;  %v2101_v52 = vsub.f32 1.0, %v2100_v34  ;;  %v1786_v26 = vmul.f32 1.442695, %v1735_v23  ;;  %2883 = vtanh.f32 %v5275_v48 }
 0x3cd   : > { %v2488_v36 = vmul.f32 %v2397_v50, %v1917_v28  ;;  %v5277_v62 = vpop.eup %2873  ;;  %v5285_v25 = vadd.f32 1.0, %v2872_v32  ;;  %2885 = vrcp.f32 %v5264_v18  ;;  %v1976_v34 = vor.u32 1.1754944e-38, %v1975_v27 }
 0x3ce   : > { %v2876_v5 = vpop.eup %2875  ;;  %v2220_v35 = vmul.f32 %v5277_v62, %v5207_v10  ;;  %2887 = vrcp.f32 %v5281_v45  ;;  %v2102_v28 = vmul.f32 %v5232_v44, %v2101_v52  ;;  %v2108_v6 = vand.u32 2147483647, %v5180_v29 }
 0x3cf   : > { %vm2520_vm7 = vcmp.ge.f32.partialorder %v2488_v36, 0.0  ;;  %v2552_v2 = vmul.f32 0.2, %v2488_v36  ;;  %v5283_v31 = vpop.eup %2877  ;;  %2889 = vrcp.f32 %v5285_v25  ;;  %v2110_v15 = vand.u32 2147483648, %v5180_v29  ;;  %v1713_v1 = vpop.f32.mrf.mxu3 }
 0x3d0   : > { %v2880_v46 = vpop.eup %2879  ;;  %v1980_v50 = vmul.f32 %v5283_v31, %v5218_v22  ;;  %2891 = vpow2.f32 %v1786_v26  ;;  %v2092_v58 = vsel %vm5324_vm14, %v5158_v14, %v2088_v16  ;;  %vm2210_vm0 = vweird.f32 %v5167_v11 }
 0x3d1   : > { %v2584_v40 = vsel %vm2520_vm7, %v2488_v36, %v2552_v2  ;;  %v2882_v49 = vpop.eup %2881  ;;  %2893 = vpow2.f32 %v1770_v20  ;;  %v1972_v32 = vsel %vm5334_vm15, %v5178_v30, %v1968_v59  ;;  %v2221_v38 = vsub.f32 1.0, %v2220_v35  ;;  %vm5382_vm4 = vmor %vm2209_vm12, %vm2210_vm0 }
 0x3d2   : > { %2436 = vrot.lane.b32.xlu1 %v2864_v63, %s3017_s11  ;;  %2616 = vst.msk [vmem:[%s5009_s17 + $0x20] sm:$0xff] %vm1460_vm10, %v2584_v40  ;;  %v5349_v23 = vadd.f32 %v5167_v11, %v5262_v61  ;;  %v2884_v3 = vpop.eup %2883  ;;  %2895 = vtanh.f32 %v5311_v51  ;;  %v1981_v60 = vsub.f32 1.0, %v1980_v50  ;;  %v2103_v14 = vadd.f32 %v5232_v44, %v2102_v28 }
 0x3d3   : > { %v2395_v19 = vpop.permute.xlu1 %2394  ;;  %2426 = vrot.lane.b32.xlu2 %v2876_v5, %s3017_s11  ;;  %vm2105_vm1 = vweird.f32 %v5232_v44  ;;  %v5354_v2 = vpop.eup %2885  ;;  %2897 = vtanh.f32 %v5111_v17  ;;  %v5357_v5 = vadd.f32 1.0, %v2882_v49  ;;  %vm2104_vm2 = vweird.f32 %v5180_v29 }
 0x3d4   : > { %v2487_v33 = vmul.f32 %v2395_v19, %v1902_v53  ;;  %vm5361_vm3 = vcmp.eq.f32.partialorder %v2108_v6, 8.507059e+37  ;;  %v5365_v61 = vpop.eup %2887  ;;  %v1723_v19 = vsub.f32 0.0, %v5085_v12  ;;  %v5370_v53 = vsel %vm5290_vm9, %v1976_v34, %v1972_v32  ;;  %vm5388_vm5 = vmor %vm2104_vm2, %vm2105_vm1 }
 0x3d5   : > { %v1990_v17 = vand.u32 2147483648, %v5218_v22  ;;  %v5376_v52 = vsel %vm5297_vm11, %v5203_v9, %v2092_v58  ;;  %v5386_v12 = vpop.eup %2889  ;;  %v2111_v40 = vor.u32 1.1754944e-38, %v2110_v15  ;;  %v1982_v0 = vmul.f32 %v5283_v31, %v1981_v60 }
 0x3d6   : > { %vm2519_vm13 = vcmp.ge.f32.partialorder %v2487_v33, 0.0  ;;  %v2551_v41 = vmul.f32 0.2, %v2487_v33  ;;  %v2892_v16 = vpop.eup %2891  ;;  %v2107_v26 = vsel %vm5388_vm5, %v5232_v44, %v2103_v14  ;;  %v2230_v35 = vand.u32 2147483648, %v5207_v10 }
 0x3d7   : > { %v2894_v20 = vpop.eup %2893  ;;  %2899 = vrcp.f32 %v5357_v5  ;;  %v2115_v50 = vmul.f32 %v5354_v2, %v5264_v18  ;;  %v1762_v34 = vmul.f32 1.442695, %v1723_v19  ;;  %v1995_v44 = vmul.f32 %v5386_v12, %v5285_v25 }
 0x3d8   : > { %v2583_v8 = vsel %vm2519_vm13, %v2487_v33, %v2551_v41  ;;  %v2222_v33 = vmul.f32 %v5277_v62, %v2221_v38  ;;  %v1705_v41 = vadd.f32 %v4931_v57, %v5121_v55  ;;  %v2896_v28 = vpop.eup %2895  ;;  %vm1984_vm6 = vweird.f32 %v5218_v22 }
 0x3d9   : > { %2615 = vst.msk [vmem:[%s5009_s17 + $0x18] sm:$0xff] %vm1460_vm10, %v2583_v8  ;;  %v1736_v8 = vsub.f32 0.0, %v5074_v13  ;;  %v5414_v6 = vor.u32 1.1754944e-38, %v1990_v17  ;;  %v2898_v36 = vpop.eup %2897  ;;  %v1722_v55 = vsub.f32 0.0, %v5036_v56  ;;  %vm1985_vm7 = vweird.f32 %v5283_v31 }
 0x3da   : > { %2442 = vrot.lane.b32.xlu1 %v2880_v46, %s3017_s11  ;;  %v1988_v46 = vand.u32 2147483647, %v5218_v22  ;;  %v5421_v49 = vsel %vm5361_vm3, %v2111_v40, %v2107_v26  ;;  %v5424_v13 = vadd.f32 %v5277_v62, %v2222_v33  ;;  %v5426_v27 = vadd.f32 1.0, %v2892_v16  ;;  %vm5463_vm12 = vmor %vm1984_vm6, %vm1985_vm7 }
 0x3db   : > { %2432 = vrot.lane.b32.xlu2 %v2884_v3, %s3017_s11  ;;  %v1730_v15 = vsub.f32 0.0, %v5031_v37  ;;  %v1983_v58 = vadd.f32 %v5283_v31, %v1982_v0  ;;  %v2235_v56 = vmul.f32 %v5365_v61, %v5281_v45  ;;  %v1743_v32 = vsub.f32 0.0, %v5244_v47 }
 0x3dc   : > { %v5433_v38 = vadd.f32 1.0, %v2894_v20  ;;  %2901 = vtanh.f32 %v1705_v41  ;;  %v2116_v3 = vsub.f32 1.0, %v2115_v50  ;;  %v1788_v60 = vmul.f32 1.442695, %v1736_v8 }
 0x3dd   : > { %2903 = vpow2.f32 %v1762_v34  ;;  %v1996_v14 = vsub.f32 1.0, %v1995_v44  ;;  %v2123_v30 = vand.u32 2147483647, %v5264_v18  ;;  %v5437_v19 = vpop.eup %2899  ;;  %v1744_v37 = vsub.f32 0.0, %v1705_v41 }
 0x3de   : > { %v1760_v17 = vmul.f32 1.442695, %v1722_v55  ;;  %v2003_v40 = vand.u32 2147483647, %v5285_v25  ;;  %vm5440_vm8 = vcmp.eq.f32.partialorder %v1988_v46, 8.507059e+37  ;;  %vm2119_vm9 = vweird.f32 %v5264_v18 }
 0x3df   : > { %v2125_v33 = vand.u32 2147483648, %v5264_v18  ;;  %2905 = vrcp.f32 %v5426_v27  ;;  %v1728_v16 = vsub.f32 0.0, %v5079_v7  ;;  %v1776_v0 = vmul.f32 1.442695, %v1730_v15 }
 0x3e0   : > { %v2236_v26 = vsub.f32 1.0, %v2235_v56  ;;  %v1802_v20 = vmul.f32 1.442695, %v1743_v32  ;;  %2907 = vrcp.f32 %v5433_v38  ;;  %v1729_v41 = vsub.f32 0.0, %v5150_v39 }
 0x3e1   : > { %v2117_v46 = vmul.f32 %v5354_v2, %v2116_v3  ;;  %2909 = vpow2.f32 %v1788_v60  ;;  %v5452_v50 = vadd.f32 %v4931_v57, %v1713_v1  ;;  %v1997_v8 = vmul.f32 %v5386_v12, %v1996_v14 }
 0x3e2   : > { %2448 = vrot.lane.b32.xlu1 %v2896_v28, %s3017_s11  ;;  %v1920_v28 = vmul.f32 %v5437_v19, %v5357_v5  ;;  %v2902_v34 = vpop.eup %2901  ;;  %v1804_v7 = vmul.f32 1.442695, %v1744_v37  ;;  %2911 = vpow2.f32 %v1760_v17  ;;  %vm1999_vm11 = vweird.f32 %v5285_v25 }
 0x3e3   : > { %2438 = vrot.lane.b32.xlu2 %v2898_v36, %s3017_s11  ;;  %v2005_v44 = vand.u32 2147483648, %v5285_v25  ;;  %v2904_v57 = vpop.eup %2903  ;;  %v1772_v36 = vmul.f32 1.442695, %v1728_v16  ;;  %2913 = vpow2.f32 %v1776_v0  ;;  %vm5467_vm13 = vcmp.eq.f32.partialorder %v2003_v40, 8.507059e+37 }
 0x3e4   : > { %v1987_v15 = vsel %vm5463_vm12, %v5283_v31, %v1983_v58  ;;  %vm2120_vm14 = vweird.f32 %v5354_v2  ;;  %2915 = vpow2.f32 %v1802_v20  ;;  %v1774_v56 = vmul.f32 1.442695, %v1729_v41 }
 0x3e5   : > { %vm2000_vm15 = vweird.f32 %v5386_v12  ;;  %v2118_v22 = vadd.f32 %v5354_v2, %v2117_v46  ;;  %v5478_v32 = vpop.eup %2905  ;;  %2917 = vtanh.f32 %v5452_v50  ;;  %v1921_v3 = vsub.f32 1.0, %v1920_v28  ;;  %vm5500_vm1 = vmor %vm2119_vm9, %vm2120_vm14 }
 0x3e6   : > { %v1998_v60 = vadd.f32 %v5386_v12, %v1997_v8  ;;  %v2237_v14 = vmul.f32 %v5365_v61, %v2236_v26  ;;  %v5483_v31 = vpop.eup %2907  ;;  %2919 = vpow2.f32 %v1804_v7  ;;  %v5485_v58 = vadd.f32 1.0, %v2904_v57  ;;  %vm5509_vm2 = vmor %vm1999_vm11, %vm2000_vm15 }
 0x3e7   : > { %v2006_v37 = vor.u32 1.1754944e-38, %v2005_v44  ;;  %vm5487_vm0 = vcmp.eq.f32.partialorder %v2123_v30, 8.507059e+37  ;;  %v2910_v1 = vpop.eup %2909  ;;  %2921 = vpow2.f32 %v1772_v36  ;;  %v5494_v40 = vsel %vm5440_vm8, %v5414_v6, %v1987_v15 }
 0x3e8   : > { %v2126_v0 = vor.u32 1.1754944e-38, %v2125_v33  ;;  %v2243_v30 = vand.u32 2147483647, %v5281_v45  ;;  %v2912_v26 = vpop.eup %2911  ;;  %2923 = vpow2.f32 %v1774_v56  ;;  %v2140_v47 = vand.u32 2147483648, %v5426_v27 }
 0x3e9   : > { %v2122_v18 = vsel %vm5500_vm1, %v5354_v2, %v2118_v22  ;;  %vm2240_vm3 = vweird.f32 %v5365_v61  ;;  %v2914_v33 = vpop.eup %2913  ;;  %v1922_v20 = vmul.f32 %v5437_v19, %v1921_v3  ;;  %v2002_v41 = vsel %vm5509_vm2, %v5386_v12, %v1998_v60 }
 0x3ea   : > { %v2130_v25 = vmul.f32 %v5478_v32, %v5426_v27  ;;  %v2238_v46 = vadd.f32 %v5365_v61, %v2237_v14  ;;  %v2916_v28 = vpop.eup %2915  ;;  %v5525_v8 = vadd.f32 1.0, %v2910_v1  ;;  %2925 = vrcp.f32 %v5485_v58 }
 0x3eb   : > { %2444 = vrot.lane.b32.xlu2 %v2902_v34, %s3017_s11  ;;  %v2010_v2 = vmul.f32 %v5483_v31, %v5433_v38  ;;  %v2245_v34 = vand.u32 2147483648, %v5281_v45  ;;  %v2918_v7 = vpop.eup %2917  ;;  %v5531_v44 = vadd.f32 1.0, %v2912_v26  ;;  %v2138_v12 = vand.u32 2147483647, %v5426_v27 }
 0x3ec   : > { %vm2239_vm5 = vweird.f32 %v5281_v45  ;;  %vm5535_vm6 = vcmp.eq.f32.partialorder %v2243_v30, 8.507059e+37  ;;  %v2920_v57 = vpop.eup %2919  ;;  %v5539_v36 = vadd.f32 1.0, %v2914_v33  ;;  %v5544_v15 = vsel %vm5467_vm13, %v2006_v37, %v2002_v41 }
 0x3ed   : > { %v5546_v56 = vor.u32 1.1754944e-38, %v2140_v47  ;;  %v5550_v22 = vsel %vm5487_vm0, %v2126_v0, %v2122_v18  ;;  %vm5554_vm7 = vmor %vm2239_vm5, %vm2240_vm3  ;;  %v2922_v3 = vpop.eup %2921  ;;  %v1923_v60 = vadd.f32 %v5437_v19, %v1922_v20  ;;  %vm1925_vm8 = vweird.f32 %v5437_v19 }
 0x3ee   : > { %v2131_v55 = vsub.f32 1.0, %v2130_v25  ;;  %v2242_v14 = vsel %vm5554_vm7, %v5365_v61, %v2238_v46  ;;  %v2924_v37 = vpop.eup %2923  ;;  %2927 = vrcp.f32 %v5525_v8  ;;  %v1930_v17 = vand.u32 2147483648, %v5357_v5 }
 0x3ef   : > { %v2011_v1 = vsub.f32 1.0, %v2010_v2  ;;  %v2246_v16 = vor.u32 1.1754944e-38, %v2245_v34  ;;  %v5565_v0 = vadd.f32 1.0, %v2920_v57  ;;  %2929 = vrcp.f32 %v5531_v44 }
 0x3f0   : > { %vm1924_vm9 = vweird.f32 %v5357_v5  ;;  %v1928_v30 = vand.u32 2147483647, %v5357_v5  ;;  %v5570_v26 = vpop.eup %2925  ;;  %v5572_v6 = vadd.f32 1.0, %v2916_v28  ;;  %v5574_v61 = vadd.f32 1.0, %v2922_v3 }
 0x3f1   : > { %2931 = vrcp.f32 %v5539_v36  ;;  %vm5579_vm11 = vmor %vm1924_vm9, %vm1925_vm8  ;;  %v5585_v18 = vsel %vm5535_vm6, %v2246_v16, %v2242_v14  ;;  %v1737_v5 = vsub.f32 0.0, %v5171_v21  ;;  %v5588_v33 = vadd.f32 1.0, %v2924_v37 }
 0x3f2   : > { %v1927_v20 = vsel %vm5579_vm11, %v5437_v19, %v1923_v60  ;;  %v2132_v41 = vmul.f32 %v5478_v32, %v2131_v55  ;;  %vm2134_vm12 = vweird.f32 %v5426_v27  ;;  %v1739_v25 = vsub.f32 0.0, %v5096_v54 }
 0x3f3   : > { %2450 = vrot.lane.b32.xlu2 %v2918_v7, %s3017_s11  ;;  %v1931_v46 = vor.u32 1.1754944e-38, %v1930_v17  ;;  %v2012_v28 = vmul.f32 %v5483_v31, %v2011_v1  ;;  %vm2135_vm13 = vweird.f32 %v5478_v32  ;;  %2933 = vrcp.f32 %v5565_v0 }
 0x3f4   : > { %v1731_v21 = vsub.f32 0.0, %v5105_v43  ;;  %vm1929_vm14 = vcmp.eq.f32.partialorder %v1928_v30, 8.507059e+37  ;;  %v1950_v2 = vmul.f32 %v5570_v26, %v5485_v58  ;;  %v5602_v19 = vpop.eup %2927  ;;  %2935 = vrcp.f32 %v5574_v61  ;;  %vm5644_vm5 = vmor %vm2134_vm12, %vm2135_vm13 }
 0x3f5   : > { %v1932_v34 = vsel %vm1929_vm14, %v1931_v46, %v1927_v20  ;;  %v2018_v54 = vand.u32 2147483647, %v5433_v38  ;;  %v2020_v39 = vand.u32 2147483648, %v5433_v38  ;;  %v5607_v57 = vpop.eup %2929  ;;  %v1790_v45 = vmul.f32 1.442695, %v1737_v5 }
 0x3f6   : > { %2937 = vrcp.f32 %v5588_v33  ;;  %v5611_v3 = vadd.f32 %v5478_v32, %v2132_v41  ;;  %v1738_v55 = vsub.f32 0.0, %v5275_v48  ;;  %v1794_v14 = vmul.f32 1.442695, %v1739_v25 }
 0x3f7   : > { %v5613_v60 = vpop.eup %2931  ;;  %v2013_v37 = vadd.f32 %v5483_v31, %v2012_v28  ;;  %vm2015_vm15 = vweird.f32 %v5483_v31  ;;  %v1778_v17 = vmul.f32 1.442695, %v1731_v21  ;;  %v1951_v16 = vsub.f32 1.0, %v1950_v2 }
 0x3f8   : > { %v1745_v30 = vsub.f32 0.0, %v5174_v4  ;;  %vm2014_vm1 = vweird.f32 %v5433_v38  ;;  %v1935_v47 = vmul.f32 %v5607_v57, %v5531_v44  ;;  %v2145_v48 = vmul.f32 %v5602_v19, %v5525_v8 }
 0x3f9   : > { %v5624_v5 = vpop.eup %2933  ;;  %2939 = vpow2.f32 %v1790_v45  ;;  %vm5626_vm2 = vmor %vm2014_vm1, %vm2015_vm15  ;;  %v2055_v25 = vmul.f32 %v5613_v60, %v5539_v36  ;;  %v2155_v4 = vand.u32 2147483648, %v5525_v8  ;;  %v1792_v46 = vmul.f32 1.442695, %v1738_v55 }
 0x3fa   : > { %v5633_v38 = vpop.eup %2935  ;;  %2941 = vpow2.f32 %v1794_v14  ;;  %v2017_v28 = vsel %vm5626_vm2, %v5483_v31, %v2013_v37  ;;  %vm2019_vm3 = vcmp.eq.f32.partialorder %v2018_v54, 8.507059e+37  ;;  %v2137_v31 = vsel %vm5644_vm5, %v5478_v32, %v5611_v3 }
 0x3fb   : > { %v2399_v7 = vpop.permute.xlu0 %2398  ;;  %2943 = vpow2.f32 %v1778_v17  ;;  %v1806_v54 = vmul.f32 1.442695, %v1745_v30  ;;  %v2146_v55 = vsub.f32 1.0, %v2145_v48  ;;  %v2153_v14 = vand.u32 2147483647, %v5525_v8 }
 0x3fc   : > { %v2489_v43 = vmul.f32 %v2399_v7, %v1932_v34  ;;  %v5648_v2 = vpop.eup %2937  ;;  %v2021_v34 = vor.u32 1.1754944e-38, %v2020_v39  ;;  %v1952_v7 = vmul.f32 %v5570_v26, %v1951_v16  ;;  %v5657_v41 = vor.u32 1.1754944e-38, %v2155_v4 }
 0x3fd   : > { %2945 = vpow2.f32 %v1792_v46  ;;  %v5661_v39 = vmul.f32 %v5648_v2, %v5588_v33  ;;  %v2025_v17 = vmul.f32 %v5633_v38, %v5574_v61  ;;  %v5667_v16 = vmul.f32 %v5624_v5, %v5565_v0 }
 0x3fe   : > { %vm2521_vm0 = vcmp.ge.f32.partialorder %v2489_v43, 0.0  ;;  %v2553_v1 = vmul.f32 0.2, %v2489_v43  ;;  %vm1955_vm7 = vweird.f32 %v5570_v26  ;;  %2947 = vpow2.f32 %v1806_v54 }
 0x3ff   : > { %v2940_v30 = vpop.eup %2939  ;;  %v5674_v46 = vmul.f32 %v5602_v19, %v2146_v55  ;;  %vm1954_vm8 = vweird.f32 %v5485_v58  ;;  %vm1939_vm11 = vweird.f32 %v5531_v44  ;;  %v2026_v55 = vsub.f32 1.0, %v2025_v17 }
 0x400   : > { %v2585_v20 = vsel %vm2521_vm0, %v2489_v43, %v2553_v1  ;;  %v1936_v43 = vsub.f32 1.0, %v1935_v47  ;;  %v2022_v1 = vsel %vm2019_vm3, %v2021_v34, %v2017_v28  ;;  %v1953_v47 = vadd.f32 %v5570_v26, %v1952_v7  ;;  %v2942_v48 = vpop.eup %2941  ;;  %vm5683_vm9 = vmor %vm1954_vm8, %vm1955_vm7 }
 0x401   : > { %2617 = vst.msk [vmem:[%s5009_s17 + $0x28] sm:$0xff] %vm1460_vm10, %v2585_v20  ;;  %v2056_v20 = vsub.f32 1.0, %v2055_v25  ;;  %v1960_v25 = vand.u32 2147483648, %v5485_v58  ;;  %v2944_v28 = vpop.eup %2943  ;;  %v5679_v7 = vadd.f32 1.0, %v2940_v30  ;;  %v1945_v30 = vand.u32 2147483648, %v5531_v44 }
 0x402   : > { %v1937_v4 = vmul.f32 %v5607_v57, %v1936_v43  ;;  %v2041_v43 = vsub.f32 1.0, %v5661_v39  ;;  %vm1940_vm12 = vweird.f32 %v5607_v57  ;;  %vm2060_vm14 = vweird.f32 %v5613_v60 }
 0x403   : > { %v2405_v45 = vpop.permute.xlu0 %2404  ;;  %v2057_v9 = vmul.f32 %v5613_v60, %v2056_v20  ;;  %v1943_v20 = vand.u32 2147483647, %v5531_v44  ;;  %v1961_v63 = vor.u32 1.1754944e-38, %v1960_v25  ;;  %vm2059_vm15 = vweird.f32 %v5539_v36  ;;  %vm5711_vm2 = vmor %vm1939_vm11, %vm1940_vm12 }
 0x404   : > { %v2492_v37 = vmul.f32 %v2405_v45, %v5370_v53  ;;  %v1958_v45 = vand.u32 2147483647, %v5485_v58  ;;  %v1957_v58 = vsel %vm5683_vm9, %v5570_v26, %v1953_v47  ;;  %v1938_v59 = vadd.f32 %v5607_v57, %v1937_v4  ;;  %vm5723_vm3 = vmor %vm2059_vm15, %vm2060_vm14 }
 0x405   : > { %v2058_v17 = vadd.f32 %v5613_v60, %v2057_v9  ;;  %v2065_v54 = vand.u32 2147483648, %v5539_v36  ;;  %vm2150_vm0 = vweird.f32 %v5602_v19  ;;  %v2027_v44 = vmul.f32 %v5633_v38, %v2026_v55 }
 0x406   : > { %vm2524_vm6 = vcmp.ge.f32.partialorder %v2492_v37, 0.0  ;;  %v2556_v53 = vmul.f32 0.2, %v2492_v37  ;;  %vm1959_vm13 = vcmp.eq.f32.partialorder %v1958_v45, 8.507059e+37  ;;  %vm1944_vm8 = vcmp.eq.f32.partialorder %v1943_v20, 8.507059e+37 }
 0x407   : > { %v2035_v55 = vand.u32 2147483648, %v5574_v61  ;;  %vm2030_vm11 = vweird.f32 %v5633_v38  ;;  %v2148_v20 = vadd.f32 %v5602_v19, %v5674_v46  ;;  %vm2045_vm12 = vweird.f32 %v5648_v2 }
 0x408   : > { %v2588_v34 = vsel %vm2524_vm6, %v2492_v37, %v2556_v53  ;;  %v5689_v37 = vadd.f32 1.0, %v2942_v48  ;;  %v2946_v53 = vpop.eup %2945  ;;  %v1962_v48 = vsel %vm1959_vm13, %v1961_v63, %v1957_v58  ;;  %vm2149_vm6 = vweird.f32 %v5525_v8 }
 0x409   : > { %2620 = vst.msk [vmem:[%s5009_s17 + $0x40] sm:$0xff] %vm1460_vm10, %v2588_v34  ;;  %v5696_v34 = vadd.f32 1.0, %v2944_v28  ;;  %v2948_v26 = vpop.eup %2947  ;;  %v2063_v28 = vand.u32 2147483647, %v5539_v36  ;;  %v5715_v63 = vadd.f32 1.0, %v2946_v53  ;;  %v1942_v36 = vsel %vm5711_vm2, %v5607_v57, %v1938_v59  ;;  %vm5769_vm2 = vmor %vm2149_vm6, %vm2150_vm0 }
 0x40a   : > { %2949 = vrcp.f32 %v5689_v37  ;;  %v2062_v58 = vsel %vm5723_vm3, %v5613_v60, %v2058_v17  ;;  %v5732_v53 = vadd.f32 1.0, %v2948_v26  ;;  %v1946_v59 = vor.u32 1.1754944e-38, %v1945_v30 }
 0x40b   : > { %v2411_v42 = vpop.permute.xlu0 %2410  ;;  %2951 = vrcp.f32 %v5696_v34  ;;  %v2066_v57 = vor.u32 1.1754944e-38, %v2065_v54  ;;  %vm2064_vm9 = vcmp.eq.f32.partialorder %v2063_v28, 8.507059e+37  ;;  %v2028_v9 = vadd.f32 %v5633_v38, %v2027_v44 }
 0x40c   : > { %v2495_v39 = vmul.f32 %v2411_v42, %v2022_v1  ;;  %2953 = vrcp.f32 %v5679_v7  ;;  %vm5755_vm15 = vcmp.eq.f32.partialorder %v2153_v14, 8.507059e+37  ;;  %vm2029_vm0 = vweird.f32 %v5574_v61 }
 0x40d   : > { %v2403_v47 = vpop.permute.xlu2 %2402  ;;  %v2067_v60 = vsel %vm2064_vm9, %v2066_v57, %v2062_v58  ;;  %2955 = vrcp.f32 %v5715_v63  ;;  %v2050_v58 = vand.u32 2147483648, %v5588_v33 }
 0x40e   : > { %vm2527_vm1 = vcmp.ge.f32.partialorder %v2495_v39, 0.0  ;;  %v2559_v42 = vmul.f32 0.2, %v2495_v39  ;;  %v2491_v1 = vmul.f32 %v2403_v47, %v1962_v48  ;;  %v2042_v47 = vmul.f32 %v5648_v2, %v2041_v43 }
 0x40f   : > { %2957 = vrcp.f32 %v5732_v53 }
 0x410   : > { %v2591_v4 = vsel %vm2527_vm1, %v2495_v39, %v2559_v42  ;;  %vm2523_vm7 = vcmp.ge.f32.partialorder %v2491_v1, 0.0  ;;  %v2555_v45 = vmul.f32 0.2, %v2491_v1  ;;  %v1947_v42 = vsel %vm1944_vm8, %v1946_v59, %v1942_v36  ;;  %v5742_v26 = vpop.eup %2949  ;;  %vm5802_vm8 = vmor %vm2029_vm0, %vm2030_vm11 }
 0x411   : > { %2623 = vst.msk [vmem:[%s5009_s17 + $0x58] sm:$0xff] %vm1460_vm10, %v2591_v4  ;;  %v5747_v28 = vpop.eup %2951  ;;  %v2190_v44 = vmul.f32 %v5742_v26, %v5689_v37  ;;  %vm2044_vm1 = vweird.f32 %v5588_v33 }
 0x412   : > { %v2587_v48 = vsel %vm2523_vm7, %v2491_v1, %v2555_v45  ;;  %v2043_v1 = vadd.f32 %v5648_v2, %v2042_v47  ;;  %v2048_v45 = vand.u32 2147483647, %v5588_v33  ;;  %v5775_v47 = vpop.eup %2953  ;;  %vm5782_vm7 = vmor %vm2044_vm1, %vm2045_vm12  ;;  %vm2195_vm1 = vweird.f32 %v5742_v26 }
 0x413   : > { %2619 = vst.msk [vmem:[%s5009_s17 + $0x38] sm:$0xff] %vm1460_vm10, %v2587_v48  ;;  %v2417_v17 = vpop.permute.xlu0 %2416  ;;  %v1747_v48 = vsub.f32 0.0, %v5452_v50  ;;  %v5787_v8 = vpop.eup %2955 }
 0x414   : > { %v2401_v39 = vpop.permute.xlu1 %2400  ;;  %v2498_v30 = vmul.f32 %v2417_v17, %v2067_v60  ;;  %v2047_v50 = vsel %vm5782_vm7, %v5648_v2, %v2043_v1  ;;  %v2036_v60 = vor.u32 1.1754944e-38, %v2035_v55  ;;  %v2152_v17 = vsel %vm5769_vm2, %v5602_v19, %v2148_v20 }
 0x415   : > { %v2490_v43 = vmul.f32 %v2401_v39, %v1947_v42  ;;  %v2409_v54 = vpop.permute.xlu2 %2408  ;;  %v2033_v42 = vand.u32 2147483647, %v5574_v61  ;;  %vm2049_vm6 = vcmp.eq.f32.partialorder %v2048_v45, 8.507059e+37  ;;  %v2191_v2 = vsub.f32 1.0, %v2190_v44 }
 0x416   : > { %vm2530_vm14 = vcmp.ge.f32.partialorder %v2498_v30, 0.0  ;;  %v2562_v25 = vmul.f32 0.2, %v2498_v30  ;;  %v2494_v4 = vmul.f32 %v2409_v54, %v5544_v15  ;;  %v2070_v15 = vmul.f32 %v5747_v28, %v5696_v34 }
 0x417   : > { %vm2522_vm13 = vcmp.ge.f32.partialorder %v2490_v43, 0.0  ;;  %v2554_v36 = vmul.f32 0.2, %v2490_v43  ;;  %v2032_v55 = vsel %vm5802_vm8, %v5633_v38, %v2028_v9  ;;  %v1746_v1 = vsub.f32 0.0, %v5311_v51 }
 0x418   : > { %v2594_v57 = vsel %vm2530_vm14, %v2498_v30, %v2562_v25  ;;  %vm2526_vm3 = vcmp.ge.f32.partialorder %v2494_v4, 0.0  ;;  %v2558_v39 = vmul.f32 0.2, %v2494_v4  ;;  %v2051_v25 = vor.u32 1.1754944e-38, %v2050_v58 }
 0x419   : > { %v2586_v59 = vsel %vm2522_vm13, %v2490_v43, %v2554_v36  ;;  %2626 = vst.msk [vmem:[%s5009_s17 + $0x70] sm:$0xff] %vm1460_vm10, %v2594_v57  ;;  %v5798_v43 = vpop.eup %2957  ;;  %v2071_v20 = vsub.f32 1.0, %v2070_v15  ;;  %v2175_v44 = vmul.f32 %v5787_v8, %v5715_v63  ;;  %vm2034_vm12 = vcmp.eq.f32.partialorder %v2033_v42, 8.507059e+37 }
 0x41a   : > { %2618 = vst.msk [vmem:[%s5009_s17 + $0x30] sm:$0xff] %vm1460_vm10, %v2586_v59  ;;  %v2590_v30 = vsel %vm2526_vm3, %v2494_v4, %v2558_v39  ;;  %v1810_v4 = vmul.f32 1.442695, %v1747_v48  ;;  %v2052_v45 = vsel %vm2049_vm6, %v2051_v25, %v2047_v50  ;;  %v2192_v51 = vmul.f32 %v5742_v26, %v2191_v2 }
 0x41b   : > { %v2423_v36 = vpop.permute.xlu0 %2422  ;;  %2622 = vst.msk [vmem:[%s5009_s17 + $0x50] sm:$0xff] %vm1460_vm10, %v2590_v30  ;;  %v2037_v15 = vsel %vm2034_vm12, %v2036_v60, %v2032_v55  ;;  %v2072_v48 = vmul.f32 %v5747_v28, %v2071_v20  ;;  %vm5825_vm14 = vcmp.eq.f32.partialorder %v2138_v12, 8.507059e+37  ;;  %v5835_v46 = vmul.f32 %v5798_v43, %v5732_v53 }
 0x41c   : > { %v2407_v54 = vpop.permute.xlu1 %2406  ;;  %v2501_v19 = vmul.f32 %v2423_v36, %v5421_v49  ;;  %v2157_v49 = vsel %vm5755_vm15, %v5657_v41, %v2152_v17  ;;  %v5831_v41 = vmul.f32 %v5775_v47, %v5679_v7  ;;  %v1808_v50 = vmul.f32 1.442695, %v1746_v1 }
 0x41d   : > { %v2493_v61 = vmul.f32 %v2407_v54, %v5494_v40  ;;  %v2415_v58 = vpop.permute.xlu2 %2414  ;;  %2959 = vpow2.f32 %v1810_v4  ;;  %vm2194_vm15 = vweird.f32 %v5689_v37  ;;  %v2176_v42 = vsub.f32 1.0, %v2175_v44 }
 0x41e   : > { %vm2533_vm11 = vcmp.ge.f32.partialorder %v2501_v19, 0.0  ;;  %v2565_v40 = vmul.f32 0.2, %v2501_v19  ;;  %v2497_v14 = vmul.f32 %v2415_v58, %v2052_v45  ;;  %v2193_v17 = vadd.f32 %v5742_v26, %v2192_v51  ;;  %vm5855_vm6 = vmor %vm2194_vm15, %vm2195_vm1 }
 0x41f   : > { %vm2525_vm9 = vcmp.ge.f32.partialorder %v2493_v61, 0.0  ;;  %v2557_v57 = vmul.f32 0.2, %v2493_v61  ;;  %v2198_v30 = vand.u32 2147483647, %v5689_v37  ;;  %v2073_v25 = vadd.f32 %v5747_v28, %v2072_v48 }
 0x420   : > { %v2597_v9 = vsel %vm2533_vm11, %v2501_v19, %v2565_v40  ;;  %vm2529_vm13 = vcmp.ge.f32.partialorder %v2497_v14, 0.0  ;;  %v2561_v39 = vmul.f32 0.2, %v2497_v14  ;;  %vm2075_vm2 = vweird.f32 %v5747_v28 }
 0x421   : > { %v2589_v38 = vsel %vm2525_vm9, %v2493_v61, %v2557_v57  ;;  %2629 = vst.msk [vmem:[%s5009_s17 + $0x88] sm:$0xff] %vm1460_vm10, %v2597_v9  ;;  %vm2074_vm3 = vweird.f32 %v5696_v34  ;;  %v2078_v2 = vand.u32 2147483647, %v5696_v34  ;;  %v2080_v61 = vand.u32 2147483648, %v5696_v34 }
 0x422   : > { %2621 = vst.msk [vmem:[%s5009_s17 + $0x48] sm:$0xff] %vm1460_vm10, %v2589_v38  ;;  %v2593_v27 = vsel %vm2529_vm13, %v2497_v14, %v2561_v39  ;;  %v2200_v19 = vand.u32 2147483648, %v5689_v37  ;;  %2961 = vpow2.f32 %v1808_v50  ;;  %vm5860_vm8 = vmor %vm2074_vm3, %vm2075_vm2  ;;  %v2177_v45 = vmul.f32 %v5787_v8, %v2176_v42 }
 0x423   : > { %v2429_v60 = vpop.permute.xlu0 %2428  ;;  %2625 = vst.msk [vmem:[%s5009_s17 + $0x68] sm:$0xff] %vm1460_vm10, %v2593_v27  ;;  %v2161_v58 = vsub.f32 1.0, %v5831_v41  ;;  %v2960_v44 = vpop.eup %2959  ;;  %v2077_v37 = vsel %vm5860_vm8, %v5747_v28, %v2073_v25  ;;  %v2197_v14 = vsel %vm5855_vm6, %v5742_v26, %v2193_v17  ;;  %2963 = vrcp.f32 %v5572_v6 }
 0x424   : > { %v2413_v12 = vpop.permute.xlu1 %2412  ;;  %v2504_v36 = vmul.f32 %v2429_v60, %v2157_v49  ;;  %v2081_v49 = vor.u32 1.1754944e-38, %v2080_v61  ;;  %v2201_v51 = vor.u32 1.1754944e-38, %v2200_v19  ;;  %vm2079_vm11 = vcmp.eq.f32.partialorder %v2078_v2, 8.507059e+37 }
 0x425   : > { %v2496_v54 = vmul.f32 %v2413_v12, %v2037_v15  ;;  %v2421_v59 = vpop.permute.xlu2 %2420  ;;  %vm2199_vm12 = vcmp.eq.f32.partialorder %v2198_v30, 8.507059e+37  ;;  %v2142_v26 = vsel %vm5825_vm14, %v5546_v56, %v2137_v31  ;;  %v2281_v39 = vsub.f32 1.0, %v5835_v46 }
 0x426   : > { %vm2536_vm0 = vcmp.ge.f32.partialorder %v2504_v36, 0.0  ;;  %v2568_v20 = vmul.f32 0.2, %v2504_v36  ;;  %v2500_v4 = vmul.f32 %v2421_v59, %v5376_v52  ;;  %v2082_v9 = vsel %vm2079_vm11, %v2081_v49, %v2077_v37 }
 0x427   : > { %vm2528_vm7 = vcmp.ge.f32.partialorder %v2496_v54, 0.0  ;;  %v2560_v55 = vmul.f32 0.2, %v2496_v54  ;;  %v2202_v15 = vsel %vm2199_vm12, %v2201_v51, %v2197_v14  ;;  %v5886_v41 = vadd.f32 1.0, %v2960_v44 }
 0x428   : > { %v2600_v40 = vsel %vm2536_vm0, %v2504_v36, %v2568_v20  ;;  %vm2532_vm9 = vcmp.ge.f32.partialorder %v2500_v4, 0.0  ;;  %v2564_v52 = vmul.f32 0.2, %v2500_v4  ;;  %v2266_v42 = vsub.f32 1.0, %v5667_v16  ;;  %v2962_v32 = vpop.eup %2961 }
 0x429   : > { %v2592_v57 = vsel %vm2528_vm7, %v2496_v54, %v2560_v55  ;;  %2632 = vst.msk [vmem:[%s5009_s17 + $0xa0] sm:$0xff] %vm1460_vm10, %v2600_v40  ;;  %v2178_v33 = vadd.f32 %v5787_v8, %v2177_v45  ;;  %vm2180_vm5 = vweird.f32 %v5787_v8  ;;  %v2162_v56 = vmul.f32 %v5775_v47, %v2161_v58  ;;  %v5899_v17 = vpop.eup %2963 }
 0x42a   : > { %2624 = vst.msk [vmem:[%s5009_s17 + $0x60] sm:$0xff] %vm1460_vm10, %v2592_v57  ;;  %v2596_v28 = vsel %vm2532_vm9, %v2500_v4, %v2564_v52  ;;  %v2168_v31 = vand.u32 2147483647, %v5679_v7  ;;  %vm2225_vm15 = vweird.f32 %v5277_v62  ;;  %vm2179_vm1 = vweird.f32 %v5715_v63 }
 0x42b   : > { %v2435_v48 = vpop.permute.xlu0 %2434  ;;  %2628 = vst.msk [vmem:[%s5009_s17 + $0x80] sm:$0xff] %vm1460_vm10, %v2596_v28  ;;  %v2185_v16 = vand.u32 2147483648, %v5715_v63  ;;  %v2282_v60 = vmul.f32 %v5798_v43, %v2281_v39  ;;  %2965 = vrcp.f32 %v5886_v41  ;;  %v2183_v36 = vand.u32 2147483647, %v5715_v63  ;;  %vm5910_vm7 = vmor %vm2179_vm1, %vm2180_vm5 }
 0x42c   : > { %v2419_v38 = vpop.permute.xlu1 %2418  ;;  %v2507_v21 = vmul.f32 %v2435_v48, %v2202_v15  ;;  %vm2224_vm2 = vweird.f32 %v5207_v10  ;;  %v5904_v25 = vadd.f32 1.0, %v2962_v32  ;;  %vm2164_vm0 = vweird.f32 %v5679_v7 }
 0x42d   : > { %v2499_v50 = vmul.f32 %v2419_v38, %v2082_v9  ;;  %v2427_v3 = vpop.permute.xlu2 %2426  ;;  %v2182_v63 = vsel %vm5910_vm7, %v5787_v8, %v2178_v33  ;;  %vm2165_vm6 = vweird.f32 %v5775_v47  ;;  %v2170_v61 = vand.u32 2147483648, %v5679_v7 }
 0x42e   : > { %vm2539_vm14 = vcmp.ge.f32.partialorder %v2507_v21, 0.0  ;;  %v2571_v27 = vmul.f32 0.2, %v2507_v21  ;;  %v2503_v12 = vmul.f32 %v2427_v3, %v2142_v26  ;;  %vm2284_vm8 = vweird.f32 %v5732_v53 }
 0x42f   : > { %vm2531_vm13 = vcmp.ge.f32.partialorder %v2499_v50, 0.0  ;;  %v2563_v46 = vmul.f32 0.2, %v2499_v50  ;;  %v2186_v1 = vor.u32 1.1754944e-38, %v2185_v16  ;;  %v2163_v4 = vadd.f32 %v5775_v47, %v2162_v56 }
 0x430   : > { %v2603_v54 = vsel %vm2539_vm14, %v2507_v21, %v2571_v27  ;;  %vm2535_vm3 = vcmp.ge.f32.partialorder %v2503_v12, 0.0  ;;  %v2567_v59 = vmul.f32 0.2, %v2503_v12  ;;  %vm2285_vm9 = vweird.f32 %v5798_v43 }
 0x431   : > { %v2595_v30 = vsel %vm2531_vm13, %v2499_v50, %v2563_v46  ;;  %2635 = vst.msk [vmem:[%s5009_s17 + $0xb8] sm:$0xff] %vm1460_vm10, %v2603_v54  ;;  %vm2184_vm11 = vcmp.eq.f32.partialorder %v2183_v36, 8.507059e+37  ;;  %v2283_v45 = vadd.f32 %v5798_v43, %v2282_v60  ;;  %2967 = vrcp.f32 %v5904_v25  ;;  %v5933_v37 = vpop.eup %2965  ;;  %vm5939_vm13 = vmor %vm2164_vm0, %vm2165_vm6 }
 0x432   : > { %2627 = vst.msk [vmem:[%s5009_s17 + $0x78] sm:$0xff] %vm1460_vm10, %v2595_v30  ;;  %v2599_v19 = vsel %vm2535_vm3, %v2503_v12, %v2567_v59  ;;  %v2187_v58 = vsel %vm2184_vm11, %v2186_v1, %v2182_v63  ;;  %v2288_v57 = vand.u32 2147483647, %v5732_v53  ;;  %v2290_v40 = vand.u32 2147483648, %v5732_v53  ;;  %vm5947_vm14 = vmor %vm2284_vm8, %vm2285_vm9 }
 0x433   : > { %v2441_v20 = vpop.permute.xlu0 %2440  ;;  %2631 = vst.msk [vmem:[%s5009_s17 + $0x98] sm:$0xff] %vm1460_vm10, %v2599_v19  ;;  %v2171_v49 = vor.u32 1.1754944e-38, %v2170_v61  ;;  %v2267_v26 = vmul.f32 %v5624_v5, %v2266_v42  ;;  %v2250_v28 = vmul.f32 %v5899_v17, %v5572_v6  ;;  %v2167_v15 = vsel %vm5939_vm13, %v5775_v47, %v2163_v4  ;;  %vm5966_vm3 = vmor %vm2224_vm2, %vm2225_vm15 }
 0x434   : > { %v2425_v55 = vpop.permute.xlu1 %2424  ;;  %v2510_v8 = vmul.f32 %v2441_v20, %v5585_v18  ;;  %v2287_v48 = vsel %vm5947_vm14, %v5798_v43, %v2283_v45  ;;  %v2291_v39 = vor.u32 1.1754944e-38, %v2290_v40  ;;  %v2310_v47 = vmul.f32 %v5933_v37, %v5886_v41 }
 0x435   : > { %v2502_v34 = vmul.f32 %v2425_v55, %v5550_v22  ;;  %v2433_v44 = vpop.permute.xlu2 %2432  ;;  %vm2169_vm7 = vcmp.eq.f32.partialorder %v2168_v31, 8.507059e+37  ;;  %vm2289_vm0 = vcmp.eq.f32.partialorder %v2288_v57, 8.507059e+37  ;;  %v2227_v43 = vsel %vm5966_vm3, %v5277_v62, %v5424_v13 }
 0x436   : > { %vm2542_vm5 = vcmp.ge.f32.partialorder %v2510_v8, 0.0  ;;  %v2574_v22 = vmul.f32 0.2, %v2510_v8  ;;  %v2506_v52 = vmul.f32 %v2433_v44, %v2187_v58  ;;  %v2231_v21 = vor.u32 1.1754944e-38, %v2230_v35 }
 0x437   : > { %vm2534_vm12 = vcmp.ge.f32.partialorder %v2502_v34, 0.0  ;;  %v2566_v14 = vmul.f32 0.2, %v2502_v34  ;;  %v5982_v42 = vpop.eup %2967  ;;  %v2172_v3 = vsel %vm2169_vm7, %v2171_v49, %v2167_v15  ;;  %v2292_v56 = vsel %vm2289_vm0, %v2291_v39, %v2287_v48 }
 0x438   : > { %v2606_v9 = vsel %vm2542_vm5, %v2510_v8, %v2574_v22  ;;  %vm2538_vm1 = vcmp.ge.f32.partialorder %v2506_v52, 0.0  ;;  %v2570_v53 = vmul.f32 0.2, %v2506_v52  ;;  %v2251_v27 = vsub.f32 1.0, %v2250_v28 }
 0x439   : > { %v2598_v38 = vsel %vm2534_vm12, %v2502_v34, %v2566_v14  ;;  %2638 = vst.msk [vmem:[%s5009_s17 + $0xd0] sm:$0xff] %vm1460_vm10, %v2606_v9  ;;  %v6596_v12 = vand.u32 2147483647, %v5207_v10  ;;  %v6597_v62 = vand.u32 2147483648, %v5119_v24  ;;  %v2268_v60 = vadd.f32 %v5624_v5, %v2267_v26 }
 0x43a   : > { %2630 = vst.msk [vmem:[%s5009_s17 + $0x90] sm:$0xff] %vm1460_vm10, %v2598_v38  ;;  %v2602_v32 = vsel %vm2538_vm1, %v2506_v52, %v2570_v53  ;;  %vm2270_vm2 = vweird.f32 %v5624_v5  ;;  %v2311_v30 = vsub.f32 1.0, %v2310_v47  ;;  %v2275_v10 = vand.u32 2147483648, %v5565_v0 }
 0x43b   : > { %v2447_v46 = vpop.permute.xlu0 %2446  ;;  %2634 = vst.msk [vmem:[%s5009_s17 + $0xb0] sm:$0xff] %vm1460_vm10, %v2602_v32  ;;  %vm2229_vm15 = vcmp.eq.f32.partialorder %v6596_v12, 8.507059e+37  ;;  %v2216_v13 = vor.u32 1.1754944e-38, %v6597_v62  ;;  %v2252_v2 = vmul.f32 %v5899_v17, %v2251_v27  ;;  %v2295_v63 = vmul.f32 %v5982_v42, %v5904_v25 }
 0x43c   : > { %v2431_v33 = vpop.permute.xlu1 %2430  ;;  %v2513_v31 = vmul.f32 %v2447_v46, %v2292_v56  ;;  %v2232_v16 = vsel %vm2229_vm15, %v2231_v21, %v2227_v43  ;;  %vm2269_vm9 = vweird.f32 %v5565_v0  ;;  %v2273_v55 = vand.u32 2147483647, %v5565_v0 }
 0x43d   : > { %v2505_v7 = vmul.f32 %v2431_v33, %v2172_v3  ;;  %v2439_v35 = vpop.permute.xlu2 %2438  ;;  %v6598_v1 = vand.u32 2147483647, %v5119_v24  ;;  %vm6004_vm5 = vmor %vm2269_vm9, %vm2270_vm2  ;;  %v6601_v0 = vsel %vm5382_vm4, %v5167_v11, %v5349_v23  ;;  %vm2255_vm13 = vweird.f32 %v5899_v17 }
 0x43e   : > { %vm2545_vm8 = vcmp.ge.f32.partialorder %v2513_v31, 0.0  ;;  %v2577_v36 = vmul.f32 0.2, %v2513_v31  ;;  %v2509_v59 = vmul.f32 %v2439_v35, %v2232_v16  ;;  %v2272_v8 = vsel %vm6004_vm5, %v5624_v5, %v2268_v60 }
 0x43f   : > { %vm2537_vm6 = vcmp.ge.f32.partialorder %v2505_v7, 0.0  ;;  %v2569_v54 = vmul.f32 0.2, %v2505_v7  ;;  %vm2214_vm12 = vcmp.eq.f32.partialorder %v6598_v1, 8.507059e+37  ;;  %v2312_v24 = vmul.f32 %v5933_v37, %v2311_v30 }
 0x440   : > { %v2609_v19 = vsel %vm2545_vm8, %v2513_v31, %v2577_v36  ;;  %vm2541_vm11 = vcmp.ge.f32.partialorder %v2509_v59, 0.0  ;;  %v2573_v20 = vmul.f32 0.2, %v2509_v59  ;;  %v2217_v34 = vsel %vm2214_vm12, %v2216_v13, %v6601_v0 }
 0x441   : > { %v2601_v61 = vsel %vm2537_vm6, %v2505_v7, %v2569_v54  ;;  %2641 = vst.msk [vmem:[%s5009_s17 + $0xe8] sm:$0xff] %vm1460_vm10, %v2609_v19  ;;  %v2276_v44 = vor.u32 1.1754944e-38, %v2275_v10  ;;  %v2253_v57 = vadd.f32 %v5899_v17, %v2252_v2  ;;  %v2296_v40 = vsub.f32 1.0, %v2295_v63 }
 0x442   : > { %2633 = vst.msk [vmem:[%s5009_s17 + $0xa8] sm:$0xff] %vm1460_vm10, %v2601_v61  ;;  %v2605_v45 = vsel %vm2541_vm11, %v2509_v59, %v2573_v20  ;;  %vm2274_vm14 = vcmp.eq.f32.partialorder %v2273_v55, 8.507059e+37  ;;  %vm2254_vm4 = vweird.f32 %v5572_v6  ;;  %v2258_v5 = vand.u32 2147483647, %v5572_v6 }
 0x443   : > { %2637 = vst.msk [vmem:[%s5009_s17 + $0xc8] sm:$0xff] %vm1460_vm10, %v2605_v45  ;;  %v2277_v11 = vsel %vm2274_vm14, %v2276_v44, %v2272_v8  ;;  %v2260_v14 = vand.u32 2147483648, %v5572_v6  ;;  %vm2315_vm1 = vweird.f32 %v5933_v37  ;;  %vm6029_vm7 = vmor %vm2254_vm4, %vm2255_vm13  ;;  %v2313_v49 = vadd.f32 %v5933_v37, %v2312_v24 }
 0x444   : > { %v2437_v58 = vpop.permute.xlu1 %2436  ;;  %v2257_v51 = vsel %vm6029_vm7, %v5899_v17, %v2253_v57  ;;  %vm2314_vm0 = vweird.f32 %v5886_v41  ;;  %v2320_v6 = vand.u32 2147483648, %v5886_v41  ;;  %v2297_v26 = vmul.f32 %v5982_v42, %v2296_v40 }
 0x445   : > { %v2508_v29 = vmul.f32 %v2437_v58, %v2217_v34  ;;  %v2445_v23 = vpop.permute.xlu2 %2444  ;;  %v2318_v9 = vand.u32 2147483647, %v5886_v41  ;;  %v2261_v15 = vor.u32 1.1754944e-38, %v2260_v14  ;;  %vm2316_vm2 = vmor %vm2314_vm0, %vm2315_vm1  ;;  %vm2259_vm6 = vcmp.eq.f32.partialorder %v2258_v5, 8.507059e+37 }
 0x446   : > { %v2512_v18 = vmul.f32 %v2445_v23, %v2277_v11  ;;  %v2317_v17 = vsel %vm2316_vm2, %v5933_v37, %v2313_v49  ;;  %v2321_v50 = vor.u32 1.1754944e-38, %v2320_v6  ;;  %v2298_v41 = vadd.f32 %v5982_v42, %v2297_v26 }
 0x447   : > { %vm2540_vm3 = vcmp.ge.f32.partialorder %v2508_v29, 0.0  ;;  %v2572_v22 = vmul.f32 0.2, %v2508_v29  ;;  %v2262_v53 = vsel %vm2259_vm6, %v2261_v15, %v2257_v51  ;;  %vm2319_vm8 = vcmp.eq.f32.partialorder %v2318_v9, 8.507059e+37 }
 0x448   : > { %vm2544_vm15 = vcmp.ge.f32.partialorder %v2512_v18, 0.0  ;;  %v2576_v38 = vmul.f32 0.2, %v2512_v18  ;;  %vm2300_vm9 = vweird.f32 %v5982_v42  ;;  %v2322_v43 = vsel %vm2319_vm8, %v2321_v50, %v2317_v17 }
 0x449   : > { %v2604_v28 = vsel %vm2540_vm3, %v2508_v29, %v2572_v22  ;;  %vm2299_vm11 = vweird.f32 %v5904_v25  ;;  %v2305_v32 = vand.u32 2147483648, %v5904_v25  ;;  %v2303_v33 = vand.u32 2147483647, %v5904_v25 }
 0x44a   : > { %2636 = vst.msk [vmem:[%s5009_s17 + $0xc0] sm:$0xff] %vm1460_vm10, %v2604_v28  ;;  %v2608_v48 = vsel %vm2544_vm15, %v2512_v18, %v2576_v38  ;;  %vm2301_vm5 = vmor %vm2299_vm11, %vm2300_vm9 }
 0x44b   : > { %2640 = vst.msk [vmem:[%s5009_s17 + $0xe0] sm:$0xff] %vm1460_vm10, %v2608_v48  ;;  %v2302_v27 = vsel %vm2301_vm5, %v5982_v42, %v2298_v41  ;;  %v2306_v7 = vor.u32 1.1754944e-38, %v2305_v32  ;;  %vm2304_vm14 = vcmp.eq.f32.partialorder %v2303_v33, 8.507059e+37 }
 0x44c   : > { %v2443_v39 = vpop.permute.xlu1 %2442 }
 0x44d   : > { %v2511_v47 = vmul.f32 %v2443_v39, %v2262_v53  ;;  %v2451_v21 = vpop.permute.xlu2 %2450  ;;  %v2307_v12 = vsel %vm2304_vm14, %v2306_v7, %v2302_v27 }
 0x44e   : > { %v2515_v3 = vmul.f32 %v2451_v21, %v2322_v43 }
 0x44f   : > { %vm2543_vm12 = vcmp.ge.f32.partialorder %v2511_v47, 0.0  ;;  %v2575_v37 = vmul.f32 0.2, %v2511_v47 }
 0x450   : > { %vm2547_vm13 = vcmp.ge.f32.partialorder %v2515_v3, 0.0  ;;  %v2579_v46 = vmul.f32 0.2, %v2515_v3 }
 0x451   : > { %v2607_v56 = vsel %vm2543_vm12, %v2511_v47, %v2575_v37 }
 0x452   : > { %2639 = vst.msk [vmem:[%s5009_s17 + $0xd8] sm:$0xff] %vm1460_vm10, %v2607_v56  ;;  %v2611_v31 = vsel %vm2547_vm13, %v2515_v3, %v2579_v46 }
 0x453   : > { %2643 = vst.msk [vmem:[%s5009_s17 + $0xf8] sm:$0xff] %vm1460_vm10, %v2611_v31 }
 0x454   : > { %v2449_v62 = vpop.permute.xlu1 %2448 }
 0x455   : > { %v2514_v13 = vmul.f32 %v2449_v62, %v2307_v12 }
 0x457   : > { %vm2546_vm4 = vcmp.ge.f32.partialorder %v2514_v13, 0.0  ;;  %v2578_v16 = vmul.f32 0.2, %v2514_v13 }
 0x459   : > { %v2610_v25 = vsel %vm2546_vm4, %v2514_v13, %v2578_v16 }
 0x45a   : > { %2642 = vst.msk [vmem:[%s5009_s17 + $0xf0] sm:$0xff] %vm1460_vm10, %v2610_v25 }
 0x45b PF: > { %s13_s12 = sadd.s32 1, %s3007_s12  }
 0x45c   : > { %p10_p4 = scmp.ge.s32.totalorder %s13_s12, 4  }
 0x45e   :  { %12 = sbr.rel (!%p10_p4) target bundleno = 1 (0x1), region = 62 }

</bundles_post_ra>
